<compile_context>
chip_gen: v5e
topology: v5e:2x2
jax: 0.10.0
libtpu: 0.0.40
codegen_flags: <defaults>
</compile_context>

<pallas_src>
import jax
import jax.numpy as jnp
from jax import lax
from jax.experimental import pallas as pl
from jax.experimental.pallas import tpu as pltpu

EPS = 1e-5

_COMPILER_PARAMS = pltpu.CompilerParams(
    dimension_semantics=("parallel",),
    vmem_limit_bytes=32 * 1024 * 1024,
)


# ----------------------------- kernel helpers -------------------------------
def _conv3x3_same(x, w_ref):
    """3x3 'same' conv (stride 1, no bias) of one image.

    x:     (H, W, C) float32 values.
    w_ref: (3, 3*C, Co) bfloat16 ref with w_ref[dy][dx*C + c, o] = w_hwio[dy, dx, c, o].
    Returns (H*W, Co) float32 (MXU matmuls with f32 accumulation).
    """
    H, W, C = x.shape
    Co = w_ref.shape[-1]

    # dx taps: build the two W-shifted copies once (XLU roll + VPU mask),
    # reuse across the dy loop, and merge the 3 taps into the contraction dim.
    col = lax.broadcasted_iota(jnp.int32, (1, W, 1), 1)
    x_m1 = jnp.where(col >= 1, pltpu.roll(x, 1, axis=1), 0.0)          # x[:, w-1, :]
    x_p1 = jnp.where(col <= W - 2, pltpu.roll(x, W - 1, axis=1), 0.0)  # x[:, w+1, :]
    xcat = jnp.concatenate([x_m1, x, x_p1], axis=-1)                   # (H, W, 3C)

    # dy taps: zero rows top/bottom, slice along the cheap major axis.
    zrow = jnp.zeros((1, W, 3 * C), xcat.dtype)
    xrows = jnp.concatenate([zrow, xcat, zrow], axis=0)                # (H+2, W, 3C)

    acc = jnp.zeros((H * W, Co), jnp.float32)
    for dy in range(3):
        op = xrows[dy:dy + H].reshape(H * W, 3 * C).astype(jnp.bfloat16)
        acc = acc + jnp.dot(op, w_ref[dy], preferred_element_type=jnp.float32)
    return acc


def _conv1_kernel(xin_ref, w1_ref, y1_ref, s1_ref, q1_ref):
    """Conv1 on one image + per-image BN partial sums (one-pass statistics)."""
    H, W, _ = xin_ref.shape
    cmid = w1_ref.shape[-1]
    x = xin_ref[...].astype(jnp.float32)
    acc = _conv3x3_same(x, w1_ref)                        # (H*W, cmid) f32
    s1_ref[...] = jnp.sum(acc, axis=0, keepdims=True)
    q1_ref[...] = jnp.sum(acc * acc, axis=0, keepdims=True)
    y1_ref[...] = acc.reshape(H, W, cmid)


def _conv2_kernel(y1_ref, sc1_ref, sh1_ref, w2_ref, y2_ref, s2_ref, q2_ref):
    """BN1 (fused scale/shift) + ReLU + Conv2 on one image + BN2 partial sums."""
    H, W, _ = y1_ref.shape
    cout = w2_ref.shape[-1]
    h1 = jnp.maximum(y1_ref[...] * sc1_ref[...] + sh1_ref[...], 0.0)   # f32
    acc = _conv3x3_same(h1, w2_ref)
    s2_ref[...] = jnp.sum(acc, axis=0, keepdims=True)
    q2_ref[...] = jnp.sum(acc * acc, axis=0, keepdims=True)
    y2_ref[...] = acc.reshape(H, W, cout)


def _bn_relu_kernel(y_ref, sc_ref, sh_ref, o_ref):
    """Final BN2 + ReLU, lane-dense (H, W*C) layout -> unmasked stores."""
    o_ref[...] = jnp.maximum(y_ref[...] * sc_ref[...] + sh_ref[...], 0.0)


# ------------------------------- host glue ----------------------------------
def _bn_scale_shift(s, q, count, gamma, beta):
    """Fold batch stats (partial sums) into a fused per-channel scale/shift."""
    mean = jnp.sum(s, axis=(0, 1)) / count
    var = jnp.sum(q, axis=(0, 1)) / count - mean * mean      # biased variance
    scale = gamma * lax.rsqrt(var + EPS)
    shift = beta - mean * scale
    return scale.astype(jnp.float32), shift.astype(jnp.float32)


@jax.jit
def up_forward(x1_nchw, x2_nchw, wt, wb, w1, g1, b1, w2, g2, b2):
    """Up.forward.  x1: (N, Ci, h, w), x2: (N, Ci//2, 2h, 2w) -> (N, Co, 2h, 2w).

    Parameters use PyTorch layouts: wt (Ci, Ci//2, 2, 2) + wb (Ci//2,) for the
    ConvTranspose2d, w1/w2 in OIHW (bias-free convs), g*/b* BatchNorm affine.
    """
    x1 = jnp.transpose(x1_nchw, (0, 2, 3, 1)).astype(jnp.float32)   # NHWC
    x2 = jnp.transpose(x2_nchw, (0, 2, 3, 1)).astype(jnp.float32)
    n, h, w, ci = x1.shape
    cup = wt.shape[1]
    cmid = w1.shape[0]
    cout = w2.shape[0]
    H, W = 2 * h, 2 * w

    # Conv weights: OIHW -> HWIO -> (3, 3*Cin, Cout) with (dx, cin) merged so a
    # single MXU dot per dy has contraction depth K = 3*Cin.
    w1r = jnp.transpose(w1, (2, 3, 1, 0)).reshape(3, 3 * ci, cmid).astype(jnp.bfloat16)
    w2r = jnp.transpose(w2, (2, 3, 1, 0)).reshape(3, 3 * cmid, cout).astype(jnp.bfloat16)
    wt4 = jnp.transpose(wt, (2, 3, 0, 1)).astype(jnp.float32)       # (2, 2, Ci, Ci//2)

    # --- ConvTranspose2d(k=2, s=2) + channel concat (XLA glue) --------------
    u = jnp.einsum('nhwc,yxcd->nhywxd', x1, wt4,
                   preferred_element_type=jnp.float32)
    u = u.reshape(n, H, W, cup) + wb.reshape(1, 1, 1, cup).astype(jnp.float32)
    assert u.shape == x2.shape, f'get wrong shape: x1 shape: {u.shape} x2: {x2.shape}'
    xin = jnp.concatenate([x2, u], axis=-1).astype(jnp.bfloat16)    # (n, H, W, ci)

    # --- Pass 1: Conv1 + BN1 partial stats -----------------------------------
    y1, s1, q1 = pl.pallas_call(
        _conv1_kernel,
        grid=(n,),
        in_specs=[
            pl.BlockSpec((None, H, W, ci), lambda i: (i, 0, 0, 0)),
            pl.BlockSpec((3, 3 * ci, cmid), lambda i: (0, 0, 0)),
        ],
        out_specs=(
            pl.BlockSpec((None, H, W, cmid), lambda i: (i, 0, 0, 0)),
            pl.BlockSpec((None, 1, cmid), lambda i: (i, 0, 0)),
            pl.BlockSpec((None, 1, cmid), lambda i: (i, 0, 0)),
        ),
        out_shape=(
            jax.ShapeDtypeStruct((n, H, W, cmid), jnp.float32),
            jax.ShapeDtypeStruct((n, 1, cmid), jnp.float32),
            jax.ShapeDtypeStruct((n, 1, cmid), jnp.float32),
        ),
        compiler_params=_COMPILER_PARAMS,
    )(xin, w1r)

    count = n * H * W
    sc1, sh1 = _bn_scale_shift(s1, q1, count, g1, b1)
    sc1 = sc1.reshape(1, cmid)
    sh1 = sh1.reshape(1, cmid)

    # --- Pass 2: BN1+ReLU (fused affine) + Conv2 + BN2 partial stats ---------
    y2, s2, q2 = pl.pallas_call(
        _conv2_kernel,
        grid=(n,),
        in_specs=[
            pl.BlockSpec((None, H, W, cmid), lambda i: (i, 0, 0, 0)),
            pl.BlockSpec((1, cmid), lambda i: (0, 0)),
            pl.BlockSpec((1, cmid), lambda i: (0, 0)),
            pl.BlockSpec((3, 3 * cmid, cout), lambda i: (0, 0, 0)),
        ],
        out_specs=(
            pl.BlockSpec((None, H, W, cout), lambda i: (i, 0, 0, 0)),
            pl.BlockSpec((None, 1, cout), lambda i: (i, 0, 0)),
            pl.BlockSpec((None, 1, cout), lambda i: (i, 0, 0)),
        ),
        out_shape=(
            jax.ShapeDtypeStruct((n, H, W, cout), jnp.float32),
            jax.ShapeDtypeStruct((n, 1, cout), jnp.float32),
            jax.ShapeDtypeStruct((n, 1, cout), jnp.float32),
        ),
        compiler_params=_COMPILER_PARAMS,
    )(y1, sc1, sh1, w2r)

    sc2, sh2 = _bn_scale_shift(s2, q2, count, g2, b2)
    sc2_t = jnp.tile(sc2, W).reshape(1, W * cout)   # per-lane scale for (H, W*C) slab
    sh2_t = jnp.tile(sh2, W).reshape(1, W * cout)

    # --- Pass 3: BN2 + ReLU on a lane-dense output slab -----------------------
    y2_ld = y2.reshape(n, H, W * cout)
    out_ld = pl.pallas_call(
        _bn_relu_kernel,
        grid=(n,),
        in_specs=[
            pl.BlockSpec((None, H, W * cout), lambda i: (i, 0, 0)),
            pl.BlockSpec((1, W * cout), lambda i: (0, 0)),
            pl.BlockSpec((1, W * cout), lambda i: (0, 0)),
        ],
        out_specs=pl.BlockSpec((None, H, W * cout), lambda i: (i, 0, 0)),
        out_shape=jax.ShapeDtypeStruct((n, H, W * cout), jnp.float32),
        compiler_params=_COMPILER_PARAMS,
    )(y2_ld, sc2_t, sh2_t)

    out = out_ld.reshape(n, H, W, cout)
    return jnp.transpose(out, (0, 3, 1, 2))          # NHWC -> NCHW


# ------------------------------- reference ----------------------------------
def _up_reference(x1_nchw, x2_nchw, wt, wb, w1, g1, b1, w2, g2, b2, compute_dtype):
    """Pure-JAX reference mirroring the PyTorch Up module (training-mode BN).

    compute_dtype sets the conv operand precision (float32 == PyTorch
    semantics, bfloat16 == matched to the kernel's MXU operand precision);
    accumulation is float32 either way.
    """
    cd = compute_dtype
    x1 = jnp.transpose(x1_nchw, (0, 2, 3, 1)).astype(jnp.float32)
    x2 = jnp.transpose(x2_nchw, (0, 2, 3, 1)).astype(jnp.float32)
    n, h, w, _ = x1.shape
    cup = wt.shape[1]
    wt4 = jnp.transpose(wt, (2, 3, 0, 1)).astype(jnp.float32)
    w1h = jnp.transpose(w1, (2, 3, 1, 0))
    w2h = jnp.transpose(w2, (2, 3, 1, 0))

    u = jnp.einsum('nhwc,yxcd->nhywxd', x1, wt4, preferred_element_type=jnp.float32)
    u = u.reshape(n, 2 * h, 2 * w, cup) + wb.reshape(1, 1, 1, cup)
    x = jnp.concatenate([x2, u], axis=-1)

    dn = ('NHWC', 'HWIO', 'NHWC')

    def conv_bn_relu(x, wh, g, b):
        y = lax.conv_general_dilated(
            x.astype(cd), wh.astype(cd), (1, 1), 'SAME',
            dimension_numbers=dn, preferred_element_type=jnp.float32)
        m = jnp.mean(y, axis=(0, 1, 2))
        v = jnp.mean(y * y, axis=(0, 1, 2)) - m * m
        return jnp.maximum((y - m) * (g * lax.rsqrt(v + EPS)) + b, 0.0)

    x = conv_bn_relu(x, w1h, g1, b1)
    x = conv_bn_relu(x, w2h, g2, b2)
    return jnp.transpose(x, (0, 3, 1, 2))


# --------------------------------- main --------------------------------------
if __name__ == "__main__":
    N = 2
    in_channel = 4            # x1 channels; x2 has in_channel // 2
    out_channel = 8
    h = w = 8                 # x1 spatial; x2 / output are 2h x 2w = 16 x 16

    key = jax.random.PRNGKey(0)
    keys = jax.random.split(key, 10)

    x1 = jax.random.normal(keys[0], (N, in_channel, h, w), jnp.float32)
    x2 = jax.random.normal(keys[1], (N, in_channel // 2, 2 * h, 2 * w), jnp.float32)

    # ConvTranspose2d(in_channel, in_channel // 2, kernel_size=2, stride=2)
    wt = 0.3 * jax.random.normal(keys[2], (in_channel, in_channel // 2, 2, 2), jnp.float32)
    wb = 0.1 * jax.random.normal(keys[3], (in_channel // 2,), jnp.float32)

    # DoubleConv(in_channel, out_channel): mid_channel defaults to out_channel.
    w1 = 0.2 * jax.random.normal(keys[4], (out_channel, in_channel, 3, 3), jnp.float32)
    w2 = 0.2 * jax.random.normal(keys[5], (out_channel, out_channel, 3, 3), jnp.float32)
    g1 = 1.0 + 0.1 * jax.random.normal(keys[6], (out_channel,), jnp.float32)
    b1 = 0.1 * jax.random.normal(keys[7], (out_channel,), jnp.float32)
    g2 = 1.0 + 0.1 * jax.random.normal(keys[8], (out_channel,), jnp.float32)
    b2 = 0.1 * jax.random.normal(keys[9], (out_channel,), jnp.float32)

    out = up_forward(x1, x2, wt, wb, w1, g1, b1, w2, g2, b2)
    out = jax.block_until_ready(out)
    assert out.shape == (N, out_channel, 2 * h, 2 * w), out.shape

    # Precision-matched reference (bf16 MXU operands, f32 accumulation): tight.
    ref_m = jax.block_until_ready(
        _up_reference(x1, x2, wt, wb, w1, g1, b1, w2, g2, b2, jnp.bfloat16))
    err_m = float(jnp.max(jnp.abs(out - ref_m)))
    assert jnp.allclose(out, ref_m, atol=2e-3, rtol=2e-3), err_m

    # Full-f32 reference (PyTorch semantics): loose bound covering the
    # intentional bf16 operand rounding on the MXU.
    ref_f = jax.block_until_ready(
        _up_reference(x1, x2, wt, wb, w1, g1, b1, w2, g2, b2, jnp.float32))
    err_f = float(jnp.max(jnp.abs(out - ref_f)))
    assert jnp.allclose(out, ref_f, atol=5e-2, rtol=5e-2), err_f

    print("KERNEL_OK")
</pallas_src>

<mosaic_0001>
module attributes {stable_mosaic.version = 11 : i64} {
  func.func @_conv1_kernel(%arg0: i32, %arg1: memref<1x16x16x4xbf16, #tpu.memory_space<vmem>>, %arg2: memref<3x12x8xbf16, #tpu.memory_space<vmem>>, %arg3: memref<1x16x16x8xf32, #tpu.memory_space<vmem>>, %arg4: memref<1x1x8xf32, #tpu.memory_space<vmem>>, %arg5: memref<1x1x8xf32, #tpu.memory_space<vmem>>) attributes {dimension_semantics = [#tpu.dimension_semantics<parallel>], iteration_bounds = array<i64: 2>, scalar_prefetch = 0 : i64, scratch_operands = 0 : i64, tpu.core_type = #tpu.core_type<tc>, window_params = [{transform_indices = @transform_0, window_bounds = array<i64: 1, 16, 16, 4>}, {pipeline_mode = #tpu.pipeline_mode<synchronous>, transform_indices = @transform_1, window_bounds = array<i64: 3, 12, 8>}, {transform_indices = @transform_2, window_bounds = array<i64: 1, 16, 16, 8>}, {transform_indices = @transform_3, window_bounds = array<i64: 1, 1, 8>}, {transform_indices = @transform_4, window_bounds = array<i64: 1, 1, 8>}]} {
    %c0 = arith.constant 0 : index
    %c0_0 = arith.constant 0 : index
    %c0_1 = arith.constant 0 : index
    %c0_2 = arith.constant 0 : index
    %0 = vector.load %arg1[%c0, %c0_0, %c0_1, %c0_2] : memref<1x16x16x4xbf16, #tpu.memory_space<vmem>>, vector<1x16x16x4xbf16>
    %1 = vector.shape_cast %0 : vector<1x16x16x4xbf16> to vector<16x16x4xbf16>
    %2 = arith.extf %1 : vector<16x16x4xbf16> to vector<16x16x4xf32>
    %3 = tpu.iota {dimensions = array<i32: 1>} : vector<1x16x1xi32>
    %c1_i32 = arith.constant 1 : i32
    %4 = vector.broadcast %c1_i32 : i32 to vector<1x16x1xi32>
    %5 = arith.cmpi sge, %3, %4 : vector<1x16x1xi32>
    %c1_i32_3 = arith.constant 1 : i32
    %6 = tpu.dynamic_rotate %2 by %c1_i32_3 dim 1 : vector<16x16x4xf32>, i32 -> vector<16x16x4xf32>
    %cst = arith.constant 0.000000e+00 : f32
    %7 = vector.shape_cast %5 : vector<1x16x1xi1> to vector<1x16x1xi1>
    %8 = vector.broadcast %7 : vector<1x16x1xi1> to vector<16x16x4xi1>
    %9 = vector.broadcast %cst : f32 to vector<16x16x4xf32>
    %10 = arith.select %8, %6, %9 : vector<16x16x4xi1>, vector<16x16x4xf32>
    %c14_i32 = arith.constant 14 : i32
    %11 = vector.broadcast %c14_i32 : i32 to vector<1x16x1xi32>
    %12 = arith.cmpi sle, %3, %11 : vector<1x16x1xi32>
    %c15_i32 = arith.constant 15 : i32
    %13 = tpu.dynamic_rotate %2 by %c15_i32 dim 1 : vector<16x16x4xf32>, i32 -> vector<16x16x4xf32>
    %cst_4 = arith.constant 0.000000e+00 : f32
    %14 = vector.shape_cast %12 : vector<1x16x1xi1> to vector<1x16x1xi1>
    %15 = vector.broadcast %14 : vector<1x16x1xi1> to vector<16x16x4xi1>
    %16 = vector.broadcast %cst_4 : f32 to vector<16x16x4xf32>
    %17 = arith.select %15, %13, %16 : vector<16x16x4xi1>, vector<16x16x4xf32>
    %18 = tpu.concatenate %10, %2, %17 in 2 : vector<16x16x4xf32>, vector<16x16x4xf32>, vector<16x16x4xf32> -> vector<16x16x12xf32>
    %cst_5 = arith.constant 0.000000e+00 : f32
    %19 = vector.broadcast %cst_5 : f32 to vector<1x16x12xf32>
    %20 = tpu.concatenate %19, %18, %19 in 0 : vector<1x16x12xf32>, vector<16x16x12xf32>, vector<1x16x12xf32> -> vector<18x16x12xf32>
    %cst_6 = arith.constant 0.000000e+00 : f32
    %21 = vector.broadcast %cst_6 : f32 to vector<256x8xf32>
    %22 = vector.extract_strided_slice %20 {offsets = [0, 0, 0], sizes = [16, 16, 12], strides = [1, 1, 1]} : vector<18x16x12xf32> to vector<16x16x12xf32>
    %23 = vector.shape_cast %22 : vector<16x16x12xf32> to vector<256x12xf32>
    %24 = arith.truncf %23 : vector<256x12xf32> to vector<256x12xbf16>
    %c0_7 = arith.constant 0 : index
    %c0_8 = arith.constant 0 : index
    %c0_9 = arith.constant 0 : index
    %25 = vector.load %arg2[%c0_7, %c0_8, %c0_9] : memref<3x12x8xbf16, #tpu.memory_space<vmem>>, vector<1x12x8xbf16>
    %26 = vector.shape_cast %25 : vector<1x12x8xbf16> to vector<12x8xbf16>
    %cst_10 = arith.constant dense<0.000000e+00> : vector<256x8xf32>
    %27 = tpu.matmul %24, %26, %cst_10 {dimension_numbers = #tpu.dot_dimension_numbers<[1], [0], [0], [1], [0, 0, 1, 1], [], []>} : vector<256x12xbf16>, vector<12x8xbf16>, vector<256x8xf32> -> vector<256x8xf32>
    %28 = arith.addf %21, %27 : vector<256x8xf32>
    %29 = vector.extract_strided_slice %20 {offsets = [1, 0, 0], sizes = [16, 16, 12], strides = [1, 1, 1]} : vector<18x16x12xf32> to vector<16x16x12xf32>
    %30 = vector.shape_cast %29 : vector<16x16x12xf32> to vector<256x12xf32>
    %31 = arith.truncf %30 : vector<256x12xf32> to vector<256x12xbf16>
    %c1 = arith.constant 1 : index
    %c0_11 = arith.constant 0 : index
    %c0_12 = arith.constant 0 : index
    %32 = vector.load %arg2[%c1, %c0_11, %c0_12] : memref<3x12x8xbf16, #tpu.memory_space<vmem>>, vector<1x12x8xbf16>
    %33 = vector.shape_cast %32 : vector<1x12x8xbf16> to vector<12x8xbf16>
    %cst_13 = arith.constant dense<0.000000e+00> : vector<256x8xf32>
    %34 = tpu.matmul %31, %33, %cst_13 {dimension_numbers = #tpu.dot_dimension_numbers<[1], [0], [0], [1], [0, 0, 1, 1], [], []>} : vector<256x12xbf16>, vector<12x8xbf16>, vector<256x8xf32> -> vector<256x8xf32>
    %35 = arith.addf %28, %34 : vector<256x8xf32>
    %36 = vector.extract_strided_slice %20 {offsets = [2, 0, 0], sizes = [16, 16, 12], strides = [1, 1, 1]} : vector<18x16x12xf32> to vector<16x16x12xf32>
    %37 = vector.shape_cast %36 : vector<16x16x12xf32> to vector<256x12xf32>
    %38 = arith.truncf %37 : vector<256x12xf32> to vector<256x12xbf16>
    %c2 = arith.constant 2 : index
    %c0_14 = arith.constant 0 : index
    %c0_15 = arith.constant 0 : index
    %39 = vector.load %arg2[%c2, %c0_14, %c0_15] : memref<3x12x8xbf16, #tpu.memory_space<vmem>>, vector<1x12x8xbf16>
    %40 = vector.shape_cast %39 : vector<1x12x8xbf16> to vector<12x8xbf16>
    %cst_16 = arith.constant dense<0.000000e+00> : vector<256x8xf32>
    %41 = tpu.matmul %38, %40, %cst_16 {dimension_numbers = #tpu.dot_dimension_numbers<[1], [0], [0], [1], [0, 0, 1, 1], [], []>} : vector<256x12xbf16>, vector<12x8xbf16>, vector<256x8xf32> -> vector<256x8xf32>
    %42 = arith.addf %35, %41 : vector<256x8xf32>
    %cst_17 = arith.constant dense<0.000000e+00> : vector<8xf32>
    %43 = vector.multi_reduction <add>, %42, %cst_17 [0] : vector<256x8xf32> to vector<8xf32>
    %44 = vector.shape_cast %43 : vector<8xf32> to vector<1x8xf32>
    %c0_18 = arith.constant 0 : index
    %c0_19 = arith.constant 0 : index
    %c0_20 = arith.constant 0 : index
    %45 = vector.load %arg4[%c0_18, %c0_19, %c0_20] : memref<1x1x8xf32, #tpu.memory_space<vmem>>, vector<1x1x8xf32>
    %46 = vector.shape_cast %45 : vector<1x1x8xf32> to vector<1x8xf32>
    %47 = vector.shape_cast %44 : vector<1x8xf32> to vector<1x1x8xf32>
    tpu.vector_store %arg4[%c0_18, %c0_19, %c0_20], %47 {strides = array<i32>} : memref<1x1x8xf32, #tpu.memory_space<vmem>>, vector<1x1x8xf32>,
    %48 = arith.mulf %42, %42 : vector<256x8xf32>
    %cst_21 = arith.constant dense<0.000000e+00> : vector<8xf32>
    %49 = vector.multi_reduction <add>, %48, %cst_21 [0] : vector<256x8xf32> to vector<8xf32>
    %50 = vector.shape_cast %49 : vector<8xf32> to vector<1x8xf32>
    %c0_22 = arith.constant 0 : index
    %c0_23 = arith.constant 0 : index
    %c0_24 = arith.constant 0 : index
    %51 = vector.load %arg5[%c0_22, %c0_23, %c0_24] : memref<1x1x8xf32, #tpu.memory_space<vmem>>, vector<1x1x8xf32>
    %52 = vector.shape_cast %51 : vector<1x1x8xf32> to vector<1x8xf32>
    %53 = vector.shape_cast %50 : vector<1x8xf32> to vector<1x1x8xf32>
    tpu.vector_store %arg5[%c0_22, %c0_23, %c0_24], %53 {strides = array<i32>} : memref<1x1x8xf32, #tpu.memory_space<vmem>>, vector<1x1x8xf32>,
    %54 = vector.shape_cast %42 : vector<256x8xf32> to vector<16x16x8xf32>
    %c0_25 = arith.constant 0 : index
    %c0_26 = arith.constant 0 : index
    %c0_27 = arith.constant 0 : index
    %c0_28 = arith.constant 0 : index
    %55 = vector.load %arg3[%c0_25, %c0_26, %c0_27, %c0_28] : memref<1x16x16x8xf32, #tpu.memory_space<vmem>>, vector<1x16x16x8xf32>
    %56 = vector.shape_cast %55 : vector<1x16x16x8xf32> to vector<16x16x8xf32>
    %57 = vector.shape_cast %54 : vector<16x16x8xf32> to vector<1x16x16x8xf32>
    tpu.vector_store %arg3[%c0_25, %c0_26, %c0_27, %c0_28], %57 {strides = array<i32>} : memref<1x16x16x8xf32, #tpu.memory_space<vmem>>, vector<1x16x16x8xf32>,
    return
  }
  func.func @transform_0(%arg0: i32) -> (i32, i32, i32, i32) {
    %c0_i32 = arith.constant 0 : i32
    %c0_i32_0 = arith.constant 0 : i32
    %c0_i32_1 = arith.constant 0 : i32
    %c0_i32_2 = arith.constant 0 : i32
    return %arg0, %c0_i32, %c0_i32_0, %c0_i32_1 : i32, i32, i32, i32
  }
  func.func @transform_1(%arg0: i32) -> (i32, i32, i32) {
    %c0_i32 = arith.constant 0 : i32
    %c0_i32_0 = arith.constant 0 : i32
    %c0_i32_1 = arith.constant 0 : i32
    %c0_i32_2 = arith.constant 0 : i32
    return %c0_i32, %c0_i32_0, %c0_i32_1 : i32, i32, i32
  }
  func.func @transform_2(%arg0: i32) -> (i32, i32, i32, i32) {
    %c0_i32 = arith.constant 0 : i32
    %c0_i32_0 = arith.constant 0 : i32
    %c0_i32_1 = arith.constant 0 : i32
    %c0_i32_2 = arith.constant 0 : i32
    return %arg0, %c0_i32, %c0_i32_0, %c0_i32_1 : i32, i32, i32, i32
  }
  func.func @transform_3(%arg0: i32) -> (i32, i32, i32) {
    %c0_i32 = arith.constant 0 : i32
    %c0_i32_0 = arith.constant 0 : i32
    %c0_i32_1 = arith.constant 0 : i32
    return %arg0, %c0_i32, %c0_i32_0 : i32, i32, i32
  }
  func.func @transform_4(%arg0: i32) -> (i32, i32, i32) {
    %c0_i32 = arith.constant 0 : i32
    %c0_i32_0 = arith.constant 0 : i32
    %c0_i32_1 = arith.constant 0 : i32
    return %arg0, %c0_i32, %c0_i32_0 : i32, i32, i32
  }
}

module attributes {stable_mosaic.version = 11 : i64} {
  func.func @_conv2_kernel(%arg0: i32, %arg1: memref<1x16x16x8xf32, #tpu.memory_space<vmem>>, %arg2: memref<1x8xf32, #tpu.memory_space<vmem>>, %arg3: memref<1x8xf32, #tpu.memory_space<vmem>>, %arg4: memref<3x24x8xbf16, #tpu.memory_space<vmem>>, %arg5: memref<1x16x16x8xf32, #tpu.memory_space<vmem>>, %arg6: memref<1x1x8xf32, #tpu.memory_space<vmem>>, %arg7: memref<1x1x8xf32, #tpu.memory_space<vmem>>) attributes {dimension_semantics = [#tpu.dimension_semantics<parallel>], iteration_bounds = array<i64: 2>, scalar_prefetch = 0 : i64, scratch_operands = 0 : i64, tpu.core_type = #tpu.core_type<tc>, window_params = [{transform_indices = @transform_0, window_bounds = array<i64: 1, 16, 16, 8>}, {pipeline_mode = #tpu.pipeline_mode<synchronous>, transform_indices = @transform_1, window_bounds = array<i64: 1, 8>}, {pipeline_mode = #tpu.pipeline_mode<synchronous>, transform_indices = @transform_2, window_bounds = array<i64: 1, 8>}, {pipeline_mode = #tpu.pipeline_mode<synchronous>, transform_indices = @transform_3, window_bounds = array<i64: 3, 24, 8>}, {transform_indices = @transform_4, window_bounds = array<i64: 1, 16, 16, 8>}, {transform_indices = @transform_5, window_bounds = array<i64: 1, 1, 8>}, {transform_indices = @transform_6, window_bounds = array<i64: 1, 1, 8>}]} {
    %c0 = arith.constant 0 : index
    %c0_0 = arith.constant 0 : index
    %c0_1 = arith.constant 0 : index
    %c0_2 = arith.constant 0 : index
    %0 = vector.load %arg1[%c0, %c0_0, %c0_1, %c0_2] : memref<1x16x16x8xf32, #tpu.memory_space<vmem>>, vector<1x16x16x8xf32>
    %1 = vector.shape_cast %0 : vector<1x16x16x8xf32> to vector<16x16x8xf32>
    %c0_3 = arith.constant 0 : index
    %c0_4 = arith.constant 0 : index
    %2 = vector.load %arg2[%c0_3, %c0_4] : memref<1x8xf32, #tpu.memory_space<vmem>>, vector<1x8xf32>
    %3 = vector.shape_cast %2 : vector<1x8xf32> to vector<1x1x8xf32>
    %4 = vector.broadcast %3 : vector<1x1x8xf32> to vector<16x16x8xf32>
    %5 = arith.mulf %1, %4 : vector<16x16x8xf32>
    %c0_5 = arith.constant 0 : index
    %c0_6 = arith.constant 0 : index
    %6 = vector.load %arg3[%c0_5, %c0_6] : memref<1x8xf32, #tpu.memory_space<vmem>>, vector<1x8xf32>
    %7 = vector.shape_cast %6 : vector<1x8xf32> to vector<1x1x8xf32>
    %8 = vector.broadcast %7 : vector<1x1x8xf32> to vector<16x16x8xf32>
    %9 = arith.addf %5, %8 : vector<16x16x8xf32>
    %cst = arith.constant 0.000000e+00 : f32
    %10 = vector.broadcast %cst : f32 to vector<16x16x8xf32>
    %11 = arith.maximumf %9, %10 : vector<16x16x8xf32>
    %12 = tpu.iota {dimensions = array<i32: 1>} : vector<1x16x1xi32>
    %c1_i32 = arith.constant 1 : i32
    %13 = vector.broadcast %c1_i32 : i32 to vector<1x16x1xi32>
    %14 = arith.cmpi sge, %12, %13 : vector<1x16x1xi32>
    %c1_i32_7 = arith.constant 1 : i32
    %15 = tpu.dynamic_rotate %11 by %c1_i32_7 dim 1 : vector<16x16x8xf32>, i32 -> vector<16x16x8xf32>
    %cst_8 = arith.constant 0.000000e+00 : f32
    %16 = vector.shape_cast %14 : vector<1x16x1xi1> to vector<1x16x1xi1>
    %17 = vector.broadcast %16 : vector<1x16x1xi1> to vector<16x16x8xi1>
    %18 = vector.broadcast %cst_8 : f32 to vector<16x16x8xf32>
    %19 = arith.select %17, %15, %18 : vector<16x16x8xi1>, vector<16x16x8xf32>
    %c14_i32 = arith.constant 14 : i32
    %20 = vector.broadcast %c14_i32 : i32 to vector<1x16x1xi32>
    %21 = arith.cmpi sle, %12, %20 : vector<1x16x1xi32>
    %c15_i32 = arith.constant 15 : i32
    %22 = tpu.dynamic_rotate %11 by %c15_i32 dim 1 : vector<16x16x8xf32>, i32 -> vector<16x16x8xf32>
    %cst_9 = arith.constant 0.000000e+00 : f32
    %23 = vector.shape_cast %21 : vector<1x16x1xi1> to vector<1x16x1xi1>
    %24 = vector.broadcast %23 : vector<1x16x1xi1> to vector<16x16x8xi1>
    %25 = vector.broadcast %cst_9 : f32 to vector<16x16x8xf32>
    %26 = arith.select %24, %22, %25 : vector<16x16x8xi1>, vector<16x16x8xf32>
    %27 = tpu.concatenate %19, %11, %26 in 2 : vector<16x16x8xf32>, vector<16x16x8xf32>, vector<16x16x8xf32> -> vector<16x16x24xf32>
    %cst_10 = arith.constant 0.000000e+00 : f32
    %28 = vector.broadcast %cst_10 : f32 to vector<1x16x24xf32>
    %29 = tpu.concatenate %28, %27, %28 in 0 : vector<1x16x24xf32>, vector<16x16x24xf32>, vector<1x16x24xf32> -> vector<18x16x24xf32>
    %cst_11 = arith.constant 0.000000e+00 : f32
    %30 = vector.broadcast %cst_11 : f32 to vector<256x8xf32>
    %31 = vector.extract_strided_slice %29 {offsets = [0, 0, 0], sizes = [16, 16, 24], strides = [1, 1, 1]} : vector<18x16x24xf32> to vector<16x16x24xf32>
    %32 = vector.shape_cast %31 : vector<16x16x24xf32> to vector<256x24xf32>
    %33 = arith.truncf %32 : vector<256x24xf32> to vector<256x24xbf16>
    %c0_12 = arith.constant 0 : index
    %c0_13 = arith.constant 0 : index
    %c0_14 = arith.constant 0 : index
    %34 = vector.load %arg4[%c0_12, %c0_13, %c0_14] : memref<3x24x8xbf16, #tpu.memory_space<vmem>>, vector<1x24x8xbf16>
    %35 = vector.shape_cast %34 : vector<1x24x8xbf16> to vector<24x8xbf16>
    %cst_15 = arith.constant dense<0.000000e+00> : vector<256x8xf32>
    %36 = tpu.matmul %33, %35, %cst_15 {dimension_numbers = #tpu.dot_dimension_numbers<[1], [0], [0], [1], [0, 0, 1, 1], [], []>} : vector<256x24xbf16>, vector<24x8xbf16>, vector<256x8xf32> -> vector<256x8xf32>
    %37 = arith.addf %30, %36 : vector<256x8xf32>
    %38 = vector.extract_strided_slice %29 {offsets = [1, 0, 0], sizes = [16, 16, 24], strides = [1, 1, 1]} : vector<18x16x24xf32> to vector<16x16x24xf32>
    %39 = vector.shape_cast %38 : vector<16x16x24xf32> to vector<256x24xf32>
    %40 = arith.truncf %39 : vector<256x24xf32> to vector<256x24xbf16>
    %c1 = arith.constant 1 : index
    %c0_16 = arith.constant 0 : index
    %c0_17 = arith.constant 0 : index
    %41 = vector.load %arg4[%c1, %c0_16, %c0_17] : memref<3x24x8xbf16, #tpu.memory_space<vmem>>, vector<1x24x8xbf16>
    %42 = vector.shape_cast %41 : vector<1x24x8xbf16> to vector<24x8xbf16>
    %cst_18 = arith.constant dense<0.000000e+00> : vector<256x8xf32>
    %43 = tpu.matmul %40, %42, %cst_18 {dimension_numbers = #tpu.dot_dimension_numbers<[1], [0], [0], [1], [0, 0, 1, 1], [], []>} : vector<256x24xbf16>, vector<24x8xbf16>, vector<256x8xf32> -> vector<256x8xf32>
    %44 = arith.addf %37, %43 : vector<256x8xf32>
    %45 = vector.extract_strided_slice %29 {offsets = [2, 0, 0], sizes = [16, 16, 24], strides = [1, 1, 1]} : vector<18x16x24xf32> to vector<16x16x24xf32>
    %46 = vector.shape_cast %45 : vector<16x16x24xf32> to vector<256x24xf32>
    %47 = arith.truncf %46 : vector<256x24xf32> to vector<256x24xbf16>
    %c2 = arith.constant 2 : index
    %c0_19 = arith.constant 0 : index
    %c0_20 = arith.constant 0 : index
    %48 = vector.load %arg4[%c2, %c0_19, %c0_20] : memref<3x24x8xbf16, #tpu.memory_space<vmem>>, vector<1x24x8xbf16>
    %49 = vector.shape_cast %48 : vector<1x24x8xbf16> to vector<24x8xbf16>
    %cst_21 = arith.constant dense<0.000000e+00> : vector<256x8xf32>
    %50 = tpu.matmul %47, %49, %cst_21 {dimension_numbers = #tpu.dot_dimension_numbers<[1], [0], [0], [1], [0, 0, 1, 1], [], []>} : vector<256x24xbf16>, vector<24x8xbf16>, vector<256x8xf32> -> vector<256x8xf32>
    %51 = arith.addf %44, %50 : vector<256x8xf32>
    %cst_22 = arith.constant dense<0.000000e+00> : vector<8xf32>
    %52 = vector.multi_reduction <add>, %51, %cst_22 [0] : vector<256x8xf32> to vector<8xf32>
    %53 = vector.shape_cast %52 : vector<8xf32> to vector<1x8xf32>
    %c0_23 = arith.constant 0 : index
    %c0_24 = arith.constant 0 : index
    %c0_25 = arith.constant 0 : index
    %54 = vector.load %arg6[%c0_23, %c0_24, %c0_25] : memref<1x1x8xf32, #tpu.memory_space<vmem>>, vector<1x1x8xf32>
    %55 = vector.shape_cast %54 : vector<1x1x8xf32> to vector<1x8xf32>
    %56 = vector.shape_cast %53 : vector<1x8xf32> to vector<1x1x8xf32>
    tpu.vector_store %arg6[%c0_23, %c0_24, %c0_25], %56 {strides = array<i32>} : memref<1x1x8xf32, #tpu.memory_space<vmem>>, vector<1x1x8xf32>,
    %57 = arith.mulf %51, %51 : vector<256x8xf32>
    %cst_26 = arith.constant dense<0.000000e+00> : vector<8xf32>
    %58 = vector.multi_reduction <add>, %57, %cst_26 [0] : vector<256x8xf32> to vector<8xf32>
    %59 = vector.shape_cast %58 : vector<8xf32> to vector<1x8xf32>
    %c0_27 = arith.constant 0 : index
    %c0_28 = arith.constant 0 : index
    %c0_29 = arith.constant 0 : index
    %60 = vector.load %arg7[%c0_27, %c0_28, %c0_29] : memref<1x1x8xf32, #tpu.memory_space<vmem>>, vector<1x1x8xf32>
    %61 = vector.shape_cast %60 : vector<1x1x8xf32> to vector<1x8xf32>
    %62 = vector.shape_cast %59 : vector<1x8xf32> to vector<1x1x8xf32>
    tpu.vector_store %arg7[%c0_27, %c0_28, %c0_29], %62 {strides = array<i32>} : memref<1x1x8xf32, #tpu.memory_space<vmem>>, vector<1x1x8xf32>,
    %63 = vector.shape_cast %51 : vector<256x8xf32> to vector<16x16x8xf32>
    %c0_30 = arith.constant 0 : index
    %c0_31 = arith.constant 0 : index
    %c0_32 = arith.constant 0 : index
    %c0_33 = arith.constant 0 : index
    %64 = vector.load %arg5[%c0_30, %c0_31, %c0_32, %c0_33] : memref<1x16x16x8xf32, #tpu.memory_space<vmem>>, vector<1x16x16x8xf32>
    %65 = vector.shape_cast %64 : vector<1x16x16x8xf32> to vector<16x16x8xf32>
    %66 = vector.shape_cast %63 : vector<16x16x8xf32> to vector<1x16x16x8xf32>
    tpu.vector_store %arg5[%c0_30, %c0_31, %c0_32, %c0_33], %66 {strides = array<i32>} : memref<1x16x16x8xf32, #tpu.memory_space<vmem>>, vector<1x16x16x8xf32>,
    return
  }
  func.func @transform_0(%arg0: i32) -> (i32, i32, i32, i32) {
    %c0_i32 = arith.constant 0 : i32
    %c0_i32_0 = arith.constant 0 : i32
    %c0_i32_1 = arith.constant 0 : i32
    %c0_i32_2 = arith.constant 0 : i32
    return %arg0, %c0_i32, %c0_i32_0, %c0_i32_1 : i32, i32, i32, i32
  }
  func.func @transform_1(%arg0: i32) -> (i32, i32) {
    %c0_i32 = arith.constant 0 : i32
    %c0_i32_0 = arith.constant 0 : i32
    %c0_i32_1 = arith.constant 0 : i32
    return %c0_i32, %c0_i32_0 : i32, i32
  }
  func.func @transform_2(%arg0: i32) -> (i32, i32) {
    %c0_i32 = arith.constant 0 : i32
    %c0_i32_0 = arith.constant 0 : i32
    %c0_i32_1 = arith.constant 0 : i32
    return %c0_i32, %c0_i32_0 : i32, i32
  }
  func.func @transform_3(%arg0: i32) -> (i32, i32, i32) {
    %c0_i32 = arith.constant 0 : i32
    %c0_i32_0 = arith.constant 0 : i32
    %c0_i32_1 = arith.constant 0 : i32
    %c0_i32_2 = arith.constant 0 : i32
    return %c0_i32, %c0_i32_0, %c0_i32_1 : i32, i32, i32
  }
  func.func @transform_4(%arg0: i32) -> (i32, i32, i32, i32) {
    %c0_i32 = arith.constant 0 : i32
    %c0_i32_0 = arith.constant 0 : i32
    %c0_i32_1 = arith.constant 0 : i32
    %c0_i32_2 = arith.constant 0 : i32
    return %arg0, %c0_i32, %c0_i32_0, %c0_i32_1 : i32, i32, i32, i32
  }
  func.func @transform_5(%arg0: i32) -> (i32, i32, i32) {
    %c0_i32 = arith.constant 0 : i32
    %c0_i32_0 = arith.constant 0 : i32
    %c0_i32_1 = arith.constant 0 : i32
    return %arg0, %c0_i32, %c0_i32_0 : i32, i32, i32
  }
  func.func @transform_6(%arg0: i32) -> (i32, i32, i32) {
    %c0_i32 = arith.constant 0 : i32
    %c0_i32_0 = arith.constant 0 : i32
    %c0_i32_1 = arith.constant 0 : i32
    return %arg0, %c0_i32, %c0_i32_0 : i32, i32, i32
  }
}

module attributes {stable_mosaic.version = 11 : i64} {
  func.func @_bn_relu_kernel(%arg0: i32, %arg1: memref<1x16x128xf32, #tpu.memory_space<vmem>>, %arg2: memref<1x128xf32, #tpu.memory_space<vmem>>, %arg3: memref<1x128xf32, #tpu.memory_space<vmem>>, %arg4: memref<1x16x128xf32, #tpu.memory_space<vmem>>) attributes {dimension_semantics = [#tpu.dimension_semantics<parallel>], iteration_bounds = array<i64: 2>, scalar_prefetch = 0 : i64, scratch_operands = 0 : i64, tpu.core_type = #tpu.core_type<tc>, window_params = [{transform_indices = @transform_0, window_bounds = array<i64: 1, 16, 128>}, {pipeline_mode = #tpu.pipeline_mode<synchronous>, transform_indices = @transform_1, window_bounds = array<i64: 1, 128>}, {pipeline_mode = #tpu.pipeline_mode<synchronous>, transform_indices = @transform_2, window_bounds = array<i64: 1, 128>}, {transform_indices = @transform_3, window_bounds = array<i64: 1, 16, 128>}]} {
    %c0 = arith.constant 0 : index
    %c0_0 = arith.constant 0 : index
    %c0_1 = arith.constant 0 : index
    %0 = vector.load %arg1[%c0, %c0_0, %c0_1] : memref<1x16x128xf32, #tpu.memory_space<vmem>>, vector<1x16x128xf32>
    %1 = vector.shape_cast %0 : vector<1x16x128xf32> to vector<16x128xf32>
    %c0_2 = arith.constant 0 : index
    %c0_3 = arith.constant 0 : index
    %2 = vector.load %arg2[%c0_2, %c0_3] : memref<1x128xf32, #tpu.memory_space<vmem>>, vector<1x128xf32>
    %3 = vector.broadcast %2 : vector<1x128xf32> to vector<16x128xf32>
    %4 = arith.mulf %1, %3 : vector<16x128xf32>
    %c0_4 = arith.constant 0 : index
    %c0_5 = arith.constant 0 : index
    %5 = vector.load %arg3[%c0_4, %c0_5] : memref<1x128xf32, #tpu.memory_space<vmem>>, vector<1x128xf32>
    %6 = vector.broadcast %5 : vector<1x128xf32> to vector<16x128xf32>
    %7 = arith.addf %4, %6 : vector<16x128xf32>
    %cst = arith.constant 0.000000e+00 : f32
    %8 = vector.broadcast %cst : f32 to vector<16x128xf32>
    %9 = arith.maximumf %7, %8 : vector<16x128xf32>
    %c0_6 = arith.constant 0 : index
    %c0_7 = arith.constant 0 : index
    %c0_8 = arith.constant 0 : index
    %10 = vector.load %arg4[%c0_6, %c0_7, %c0_8] : memref<1x16x128xf32, #tpu.memory_space<vmem>>, vector<1x16x128xf32>
    %11 = vector.shape_cast %10 : vector<1x16x128xf32> to vector<16x128xf32>
    %12 = vector.shape_cast %9 : vector<16x128xf32> to vector<1x16x128xf32>
    tpu.vector_store %arg4[%c0_6, %c0_7, %c0_8], %12 {strides = array<i32>} : memref<1x16x128xf32, #tpu.memory_space<vmem>>, vector<1x16x128xf32>,
    return
  }
  func.func @transform_0(%arg0: i32) -> (i32, i32, i32) {
    %c0_i32 = arith.constant 0 : i32
    %c0_i32_0 = arith.constant 0 : i32
    %c0_i32_1 = arith.constant 0 : i32
    return %arg0, %c0_i32, %c0_i32_0 : i32, i32, i32
  }
  func.func @transform_1(%arg0: i32) -> (i32, i32) {
    %c0_i32 = arith.constant 0 : i32
    %c0_i32_0 = arith.constant 0 : i32
    %c0_i32_1 = arith.constant 0 : i32
    return %c0_i32, %c0_i32_0 : i32, i32
  }
  func.func @transform_2(%arg0: i32) -> (i32, i32) {
    %c0_i32 = arith.constant 0 : i32
    %c0_i32_0 = arith.constant 0 : i32
    %c0_i32_1 = arith.constant 0 : i32
    return %c0_i32, %c0_i32_0 : i32, i32
  }
  func.func @transform_3(%arg0: i32) -> (i32, i32, i32) {
    %c0_i32 = arith.constant 0 : i32
    %c0_i32_0 = arith.constant 0 : i32
    %c0_i32_1 = arith.constant 0 : i32
    return %arg0, %c0_i32, %c0_i32_0 : i32, i32, i32
  }
}

</mosaic_0001>

<bundles_post_ra>
// kernel: tile.18
= control target key start
LH: loop header
LB: loop body
LE: loop exit
PB: predicated region body
PF: predicated region fallthrough
CT: control target
= control target key end

     0   :  { %s28_s0 = inlined_call_operand.vmem [shape: f32[8], index: 0, kind: input, shape index: {}]   ;;  %s29_s1 = inlined_call_operand.vmem [shape: f32[16,8], index: 1, kind: output, shape index: {}]  }
   0x1   :  { %v4_v0 = vld [vmem:[%s28_s0] ss:$0 sm:$0xff] }
   0x2   :  { %5 = vst [vmem:[%s29_s1] sm:$0xff] %v4_v0 }
   0x3   :  { %8 = vst [vmem:[%s29_s1 + $0x8] sm:$0xff] %v4_v0 }

// kernel: tile.19
= control target key start
LH: loop header
LB: loop body
LE: loop exit
PB: predicated region body
PF: predicated region fallthrough
CT: control target
= control target key end

     0   :  { %s131_s10 = smov 120   ;;  %s132_s11 = smov 104   ;;  %vm3_vm0 = vcmask 64512   ;;  %vm9_vm1 = vcmask 1048512   ;;  %vm15_vm2 = vcmask 982912   ;;  %vm21_vm3 = vcmask 917312   ;;  %s207_s0 = inlined_call_operand.vmem [shape: f32[16,8], index: 0, kind: input, shape index: {}]   ;;  %s208_s1 = inlined_call_operand.vmem [shape: f32[1,128], index: 1, kind: output, shape index: {}]  }
   0x1   :  { %v101_v0 = vld [vmem:[%s207_s0 + $0xf] sm:$0x1]   ;;  %v103_v1 = vld [vmem:[%s207_s0 + $0xd] sm:$0x1]   ;;  %v105_v2 = vld [vmem:[%s207_s0 + $0xb] sm:$0x1]  }
   0x2   :  { %7 = vrot.lane.b32.xlu0 %v101_v0, %s131_s10  ;;  %19 = vrot.lane.b32.xlu1 %v103_v1, %s132_s11  ;;  %s133_s14 = smov 88   ;;  %v102_v3 = vld [vmem:[%s207_s0 + $0xe] sm:$0x1]   ;;  %v104_v4 = vld [vmem:[%s207_s0 + $0xc] sm:$0x1]   ;;  %s134_s19 = smov 112  }
   0x3   :  { %31 = vrot.lane.b32.xlu2 %v105_v2, %s133_s14  ;;  %s135_s20 = smov 96   ;;  %v106_v5 = vld [vmem:[%s207_s0 + $0xa] sm:$0x1]   ;;  %s136_s23 = smov 80   ;;  %v107_v6 = vld [vmem:[%s207_s0 + $0x9] sm:$0x1]  }
   0x4   :  { %v108_v7 = vld [vmem:[%s207_s0 + $0x8] sm:$0x1]   ;;  %s137_s28 = smov 72   ;;  %s138_s29 = smov 64   ;;  %v109_v8 = vld [vmem:[%s207_s0 + $0x7] sm:$0x1]  }
   0x5   :  { %s139_s3 = smov 56   ;;  %v110_v9 = vld [vmem:[%s207_s0 + $0x6] sm:$0x1]   ;;  %v111_v10 = vld [vmem:[%s207_s0 + $0x5] sm:$0x1]   ;;  %s140_s8 = smov 48  }
   0x6   :  { %s141_s9 = smov 40   ;;  %v112_v11 = vld [vmem:[%s207_s0 + $0x4] sm:$0x1]   ;;  %s142_s12 = smov 32   ;;  %v113_v12 = vld [vmem:[%s207_s0 + $0x3] sm:$0x1]  }
   0x7   :  { %v114_v13 = vld [vmem:[%s207_s0 + $0x2] sm:$0x1]   ;;  %s143_s17 = smov 24   ;;  %s144_s18 = smov 16   ;;  %v115_v14 = vld [vmem:[%s207_s0 + $0x1] sm:$0x1]  }
   0x8   :  { %s145_s21 = smov 8   ;;  %v2_v15 = vld [vmem:[%s207_s0] sm:$0x1]   ;;  %vm27_vm4 = vcmask 851712   ;;  %vm33_vm5 = vcmask 786112   ;;  %vm39_vm6 = vcmask 720512  }
   0x9   :  { %4 = vst.msk [vmem:[#allocation0] sm:$0x1] %vm3_vm0, %v2_v15   ;;  %vm45_vm7 = vcmask 654912   ;;  %vm51_vm8 = vcmask 589312   ;;  %vm57_vm9 = vcmask 523712   ;;  %vm63_vm10 = vcmask 458112  }
   0xa   :  { %13 = vrot.lane.b32.xlu0 %v102_v3, %s134_s19  ;;  %25 = vrot.lane.b32.xlu1 %v104_v4, %s135_s20  ;;  %vm69_vm11 = vcmask 392512   ;;  %vm75_vm12 = vcmask 326912   ;;  %vm81_vm13 = vcmask 261312   ;;  %vm87_vm14 = vcmask 195712  }
   0xb   :  { %37 = vrot.lane.b32.xlu2 %v106_v5, %s136_s23  ;;  %vm93_vm15 = vcmask 130112  }
  0x12   :  { %43 = vrot.lane.b32.xlu0 %v107_v6, %s137_s28  ;;  %49 = vrot.lane.b32.xlu1 %v108_v7, %s138_s29 }
  0x13   :  { %55 = vrot.lane.b32.xlu2 %v109_v8, %s139_s3 }
  0x1a   :  { %61 = vrot.lane.b32.xlu0 %v110_v9, %s140_s8  ;;  %67 = vrot.lane.b32.xlu1 %v111_v10, %s141_s9 }
  0x1b   :  { %73 = vrot.lane.b32.xlu2 %v112_v11, %s142_s12 }
  0x22   :  { %79 = vrot.lane.b32.xlu0 %v113_v12, %s143_s17  ;;  %85 = vrot.lane.b32.xlu1 %v114_v13, %s144_s18 }
  0x23   :  { %91 = vrot.lane.b32.xlu2 %v115_v14, %s145_s21 }
  0x5d   :  { %v32_v16 = vpop.permute.xlu2 %31  }
  0x65   :  { %v38_v17 = vpop.permute.xlu2 %37  }
  0x6d   :  { %v56_v18 = vpop.permute.xlu2 %55  }
  0x74   :  { %v8_v19 = vpop.permute.xlu0 %7   ;;  %v20_v20 = vpop.permute.xlu1 %19  }
  0x75   :  { %10 = vst.msk [vmem:[#allocation0] sm:$0x1] %vm9_vm1, %v8_v19   ;;  %v74_v21 = vpop.permute.xlu2 %73  }
  0x7c   :  { %v14_v22 = vpop.permute.xlu0 %13   ;;  %v26_v23 = vpop.permute.xlu1 %25  }
  0x7d   :  { %16 = vst.msk [vmem:[#allocation0] sm:$0x1] %vm15_vm2, %v14_v22   ;;  %v92_v24 = vpop.permute.xlu2 %91  }
  0x7e   :  { %22 = vst.msk [vmem:[#allocation0] sm:$0x1] %vm21_vm3, %v20_v20  }
  0x7f   :  { %28 = vst.msk [vmem:[#allocation0] sm:$0x1] %vm27_vm4, %v26_v23  }
  0x80   :  { %34 = vst.msk [vmem:[#allocation0] sm:$0x1] %vm33_vm5, %v32_v16  }
  0x81   :  { %40 = vst.msk [vmem:[#allocation0] sm:$0x1] %vm39_vm6, %v38_v17  }
  0x84   :  { %v44_v25 = vpop.permute.xlu0 %43   ;;  %v50_v26 = vpop.permute.xlu1 %49  }
  0x85   :  { %46 = vst.msk [vmem:[#allocation0] sm:$0x1] %vm45_vm7, %v44_v25  }
  0x86   :  { %52 = vst.msk [vmem:[#allocation0] sm:$0x1] %vm51_vm8, %v50_v26  }
  0x87   :  { %58 = vst.msk [vmem:[#allocation0] sm:$0x1] %vm57_vm9, %v56_v18  }
  0x8c   :  { %v62_v27 = vpop.permute.xlu0 %61   ;;  %v68_v28 = vpop.permute.xlu1 %67  }
  0x8d   :  { %64 = vst.msk [vmem:[#allocation0] sm:$0x1] %vm63_vm10, %v62_v27  }
  0x8e   :  { %70 = vst.msk [vmem:[#allocation0] sm:$0x1] %vm69_vm11, %v68_v28  }
  0x8f   :  { %76 = vst.msk [vmem:[#allocation0] sm:$0x1] %vm75_vm12, %v74_v21  }
  0x94   :  { %v80_v29 = vpop.permute.xlu0 %79   ;;  %v86_v30 = vpop.permute.xlu1 %85  }
  0x95   :  { %82 = vst.msk [vmem:[#allocation0] sm:$0x1] %vm81_vm13, %v80_v29  }
  0x96   :  { %88 = vst.msk [vmem:[#allocation0] sm:$0x1] %vm87_vm14, %v86_v30  }
  0x97   :  { %94 = vst.msk [vmem:[#allocation0] sm:$0x1] %vm93_vm15, %v92_v24  }
  0x9e   :  { %v97_v31 = vld [vmem:[#allocation0] sm:$0x1] }
  0x9f   :  { %100 = vst [vmem:[%s208_s1] sm:$0x1] %v97_v31 }

// kernel: up_forward.5
= control target key start
LH: loop header
LB: loop body
LE: loop exit
PB: predicated region body
PF: predicated region fallthrough
CT: control target
= control target key end

     0   :  { %s295_s12 = smov 0   ;;  %s312_s0 = inlined_call_operand.vmem [shape: f32[2,16,128], index: 0, kind: input, shape index: {}]   ;;  %s313_s1 = inlined_call_operand.vmem [shape: f32[1,128], index: 1, kind: input, shape index: {}]   ;;  %s314_s2 = inlined_call_operand.vmem [shape: f32[1,128], index: 2, kind: input, shape index: {}]   ;;  %s315_s3 = inlined_call_operand.vmem [shape: f32[2,16,128], index: 3, kind: output, shape index: {}]  }
   0x1 LB: > { %s244_s13 = sadd.s32 4294967295, %s273_s12   ;;  %p248_p0 = scmp.ge.s32.totalorder %s273_s12, 1  ;;  %s273_s12 = sphi %s295_s12, %s13_s12  }
   0x2   : > { %p137_p1 = scmp.lt.s32.totalorder %s273_s12, 3 }
   0x4   : > { %p138_p2 = pnand %p248_p0, %p137_p1 }
   0x5   : > { %p161_p3 = scmp.lt.s32.totalorder (!%p138_p2), %s244_s13, 1 }
   0x6   : > { %141 = sbr.rel (%p138_p2) target bundleno = 23 (0x17), region = 32 }
   0xb   : > { %s317_s13 = smov (!%p161_p3, %s244_s13), 1  ;;  %v265_v0 = vld [vmem:[%s313_s1] ss:$0 sm:$0xff] }
   0xc   : > { %s255_s16 = sshll.u32 %s317_s13, 4  ;;  %v266_v1 = vld [vmem:[%s314_s2] ss:$0 sm:$0xff] }
   0xd   : > { %s165_s19 = scalar_lea.vmem %s312_s0, %s255_s16  ;;  %s170_s24 = scalar_lea.vmem %s315_s3, %s255_s16 }
   0xe   : > { %v171_v2 = vld [vmem:[%s165_s19] sm:$0xff]  ;;  %v172_v3 = vld [vmem:[%s165_s19 + $0x8] sm:$0xff] }
   0xf   : > { %v177_v4 = vmul.f32 %v265_v0, %v171_v2  ;;  %v178_v5 = vmul.f32 %v265_v0, %v172_v3 }
  0x11   : > { %v183_v6 = vadd.f32 %v266_v1, %v177_v4  ;;  %v184_v7 = vadd.f32 %v266_v1, %v178_v5 }
  0x13   : > { %v185_v8 = vmax.f32 %v183_v6, 0.0  ;;  %v186_v9 = vmax.f32 %v184_v7, 0.0 }
  0x15   : > { %187 = vst [vmem:[%s170_s24] sm:$0xff] %v185_v8 }
  0x16   : > { %188 = vst [vmem:[%s170_s24 + $0x8] sm:$0xff] %v186_v9 }
  0x17 PF: > { %s13_s12 = sadd.s32 1, %s273_s12  }
  0x18   : > { %p10_p4 = scmp.ge.s32.totalorder %s13_s12, 4  }
  0x1a   :  { %12 = sbr.rel (!%p10_p4) target bundleno = 1 (0x1), region = 62 }

// kernel: up_forward.3
= control target key start
LH: loop header
LB: loop body
LE: loop exit
PB: predicated region body
PF: predicated region fallthrough
CT: control target
= control target key end

     0   :  { %s1889_s15 = smov 0   ;;  %s2736_s0 = inlined_call_operand.vmem [shape: bf16[2,16,16,4], index: 0, kind: input, shape index: {}]   ;;  %s2737_s1 = inlined_call_operand.vmem [shape: bf16[3,12,8], index: 1, kind: input, shape index: {}]   ;;  %s2738_s2 = inlined_call_operand.vmem [shape: f32[2,16,16,8], index: 2, kind: output, shape index: {0}]   ;;  %s2739_s3 = inlined_call_operand.vmem [shape: f32[2,1,8], index: 3, kind: output, shape index: {1}]   ;;  %s2740_s4 = inlined_call_operand.vmem [shape: f32[2,1,8], index: 4, kind: output, shape index: {2}]  }
   0x1 LB: > { %s1522_s16 = sadd.s32 4294967295, %s1859_s15   ;;  %p1526_p0 = scmp.ge.s32.totalorder %s1859_s15, 1  ;;  %s1859_s15 = sphi %s1889_s15, %s15_s15  }
   0x2   : > { %p167_p1 = scmp.lt.s32.totalorder %s1859_s15, 3 }
   0x4   : > { %p168_p2 = pnand %p1526_p0, %p167_p1 }
   0x5   : > { %p199_p3 = scmp.lt.s32.totalorder (!%p168_p2), %s1522_s16, 1  ;;  %s1861_s21 = smov (!%p168_p2), 4  }
   0x6   : > { %171 = sbr.rel (%p168_p2) target bundleno = 499 (0x1f3), region = 28  ;;  %s1862_s22 = smov (!%p168_p2), 8  }
   0xb   : > { %v280_v0 = vlaneseq  ;;  %s2742_s16 = smov (!%p199_p3, %s1522_s16), 1  ;;  %vm887_vm2 = vcmask 1045504   ;;  %vm745_vm5 = vcmask 31744   ;;  %vm778_vm6 = vcmask 64512  }
   0xc   : > { %s1595_s17 = sshll.u32 %s2742_s16, 7  ;;  %vm838_vm7 = vcmask 97280   ;;  %s1596_s9 = sshll.u32 %s2742_s16, 8  ;;  %vm1281_vm8 = vcmask 57344  }
   0xd   : > { %v1899_v1 = vshrl.u32 %v280_v0, 7  ;;  %s1905_s20 = scalar_lea.vmem %s2736_s0, %s1595_s17  ;;  %s2467_s12 = scalar_lea.vmem %s2738_s2, %s1596_s9 }
   0xe   : > { %v1664_v3 = vld [vmem:[%s1905_s20 + $0x8] sm:$0xff]   ;;  %v1601_v4 = vld [vmem:[%s1905_s20] sm:$0xff]   ;;  %v1665_v5 = vld [vmem:[%s1905_s20 + $0x10] sm:$0xff]   ;;  %s211_s17 = scalar_lea.vmem %s2739_s3, %s2742_s16 }
   0xf   : > { %v1908_v2 = vadd.s32 8, %v1899_v1  ;;  %v1913_v6 = vunpack.c.l.bf16 %v1664_v3  ;;  %v1915_v7 = vunpack.c.h.bf16 %v1664_v3  ;;  %v1917_v8 = vunpack.c.l.bf16 %v1601_v4  ;;  %v1675_v10 = vld [vmem:[%s1905_s20 + $0x60] sm:$0xff]   ;;  %v1666_v33 = vld [vmem:[%s1905_s20 + $0x18] sm:$0xff]   ;;  %v1676_v44 = vld [vmem:[%s1905_s20 + $0x68] sm:$0xff]  }
  0x10   : > { %v1919_v9 = vunpack.c.h.bf16 %v1601_v4  ;;  %vm420_vm0 = vcmp.lt.s32.totalorder %v1899_v1, 7  ;;  %v1923_v11 = vunpack.c.l.bf16 %v1665_v5  ;;  %v1928_v13 = vunpack.c.h.bf16 %v1665_v5  ;;  %v1667_v57 = vld [vmem:[%s1905_s20 + $0x20] sm:$0xff]   ;;  %v1677_v58 = vld [vmem:[%s1905_s20 + $0x70] sm:$0xff]  }
  0x11   : > { %v1693_v12 = vpack.i.bf16 %v1915_v7, %v1913_v6  ;;  %vm387_vm1 = vcmp.le.s32.totalorder %v1908_v2, 14  ;;  %v1930_v14 = vunpack.c.l.bf16 %v1675_v10  ;;  %v389_v16 = vrot.slane %v1913_v6, 1 }
  0x12   : > { %v1703_v15 = vpack.i.bf16 %v1919_v9, %v1917_v8  ;;  %v405_v17 = vrot.slane %v1915_v7, 1  ;;  %v1936_v18 = vunpack.c.h.bf16 %v1675_v10  ;;  %v388_v19 = vrot.slane %v1917_v8, 1 }
  0x13   : > { %1694 = vrot.lane.b32.xlu0 %v1693_v12, %s1861_s21  ;;  %v404_v20 = vrot.slane %v1919_v9, 1  ;;  %v390_v23 = vrot.slane %v1923_v11, 1  ;;  %v406_v27 = vrot.slane %v1928_v13, 1  ;;  %v400_v29 = vrot.slane %v1930_v14, 1 }
  0x14   : > { %1704 = vrot.lane.b32.xlu1 %v1703_v15, %s1861_s21  ;;  %v422_v21 = vsel %vm420_vm0, %v389_v16, %v405_v17  ;;  %v438_v22 = vsel %vm420_vm0, %v405_v17, %v389_v16  ;;  %v416_v30 = vrot.slane %v1936_v18, 1  ;;  %v1713_v32 = vpack.i.bf16 %v1928_v13, %v1923_v11 }
  0x15   : > { %v460_v24 = vsel %vm387_vm1, %v438_v22, 0.0  ;;  %v421_v25 = vsel %vm420_vm0, %v388_v19, %v404_v20  ;;  %v437_v26 = vsel %vm420_vm0, %v404_v20, %v388_v19  ;;  %v439_v35 = vsel %vm420_vm0, %v406_v27, %v390_v23  ;;  %v1678_v20 = vld [vmem:[%s1905_s20 + $0x78] sm:$0xff]  }
  0x16   : > { %v458_v28 = vsel %vm387_vm1, %v437_v26, 0.0  ;;  %v1698_v31 = vpack.i.bf16 %v460_v24, %v422_v21  ;;  %1714 = vrot.lane.b32.xlu2 %v1713_v32, %s1861_s21  ;;  %v449_v36 = vsel %vm420_vm0, %v416_v30, %v400_v29  ;;  %v1966_v37 = vunpack.c.l.bf16 %v1666_v33 }
  0x17   : > { %v1708_v34 = vpack.i.bf16 %v458_v28, %v421_v25  ;;  %v1968_v38 = vunpack.c.h.bf16 %v1666_v33  ;;  %v423_v39 = vsel %vm420_vm0, %v390_v23, %v406_v27  ;;  %v462_v40 = vsel %vm387_vm1, %v439_v35, 0.0  ;;  %v1668_v23 = vld [vmem:[%s1905_s20 + $0x28] sm:$0xff]   ;;  %v1555_v33 = vld [vmem:[%s2737_s1] sm:$0xf] }
  0x18   : > { %v433_v41 = vsel %vm420_vm0, %v400_v29, %v416_v30  ;;  %v482_v42 = vsel %vm387_vm1, %v449_v36, 0.0  ;;  %v1718_v43 = vpack.i.bf16 %v1936_v18, %v1930_v14  ;;  %v391_v45 = vrot.slane %v1966_v37, 1 }
  0x19   : > { %v407_v46 = vrot.slane %v1968_v38, 1  ;;  %v1723_v47 = vpack.i.bf16 %v462_v40, %v423_v39  ;;  %v1728_v48 = vpack.i.bf16 %v482_v42, %v433_v41  ;;  %v1985_v49 = vunpack.c.l.bf16 %v1676_v44 }
  0x1a   : > { %v1987_v50 = vunpack.c.h.bf16 %v1676_v44  ;;  %v1733_v56 = vpack.i.bf16 %v1968_v38, %v1966_v37  ;;  %v2008_v62 = vunpack.c.l.bf16 %v1667_v57  ;;  %v2010_v63 = vunpack.c.h.bf16 %v1667_v57  ;;  %v1669_v44 = vld [vmem:[%s1905_s20 + $0x30] sm:$0xff]  }
  0x1b   : > { %1699 = vrot.lane.b32.xlu0 %v1698_v31, %s1862_s22  ;;  %v440_v51 = vsel %vm420_vm0, %v407_v46, %v391_v45  ;;  %v401_v52 = vrot.slane %v1985_v49, 1  ;;  %v424_v54 = vsel %vm420_vm0, %v391_v45, %v407_v46  ;;  %v2012_v0 = vunpack.c.l.bf16 %v1677_v58 }
  0x1c   : > { %1709 = vrot.lane.b32.xlu1 %v1708_v34, %s1862_s22  ;;  %v417_v53 = vrot.slane %v1987_v50, 1  ;;  %v464_v55 = vsel %vm387_vm1, %v440_v51, 0.0  ;;  %v1738_v59 = vpack.i.bf16 %v1987_v50, %v1985_v49  ;;  %v2014_v3 = vunpack.c.h.bf16 %v1677_v58  ;;  %v1597_v34 = vld [vmem:[%s2737_s1] sm:$0x30] }
  0x1d   : > { %v1743_v61 = vpack.i.bf16 %v464_v55, %v424_v54  ;;  %v392_v10 = vrot.slane %v2008_v62, 1  ;;  %v408_v12 = vrot.slane %v2010_v63, 1  ;;  %v402_v15 = vrot.slane %v2012_v0, 1 }
  0x1e   : > { %1719 = vrot.lane.b32.xlu2 %v1718_v43, %s1861_s21  ;;  %v450_v60 = vsel %vm420_vm0, %v417_v53, %v401_v52  ;;  %v434_v4 = vsel %vm420_vm0, %v401_v52, %v417_v53  ;;  %v418_v16 = vrot.slane %v2014_v3, 1  ;;  %v1753_v19 = vpack.i.bf16 %v2010_v63, %v2008_v62 }
  0x1f   : > { %v484_v5 = vsel %vm387_vm1, %v450_v60, 0.0  ;;  %v441_v21 = vsel %vm420_vm0, %v408_v12, %v392_v10  ;;  %v1758_v22 = vpack.i.bf16 %v2014_v3, %v2012_v0  ;;  %v2038_v25 = vunpack.c.l.bf16 %v1678_v20 }
  0x20   : > { %v1748_v17 = vpack.i.bf16 %v484_v5, %v434_v4  ;;  %v451_v24 = vsel %vm420_vm0, %v418_v16, %v402_v15  ;;  %v2040_v26 = vunpack.c.h.bf16 %v1678_v20  ;;  %v425_v27 = vsel %vm420_vm0, %v392_v10, %v408_v12  ;;  %v1670_v5 = vld [vmem:[%s1905_s20 + $0x38] sm:$0xff]  }
  0x21   : > { %v466_v28 = vsel %vm387_vm1, %v441_v21, 0.0  ;;  %v2047_v29 = vunpack.c.l.bf16 %v1668_v23  ;;  %v2049_v30 = vunpack.c.h.bf16 %v1668_v23  ;;  %v435_v31 = vsel %vm420_vm0, %v402_v15, %v418_v16 }
  0x22   : > { %v486_v32 = vsel %vm387_vm1, %v451_v24, 0.0  ;;  %v1763_v39 = vpack.i.bf16 %v466_v28, %v425_v27  ;;  %v403_v40 = vrot.slane %v2038_v25, 1  ;;  %v419_v41 = vrot.slane %v2040_v26, 1 }
  0x23   : > { %1724 = vrot.lane.b32.xlu0 %v1723_v47, %s1862_s22  ;;  %v393_v35 = vrot.slane %v2047_v29, 1  ;;  %v409_v36 = vrot.slane %v2049_v30, 1  ;;  %v1556_v42 = vor.u32 %v1597_v34, %v1555_v33  ;;  %v1768_v43 = vpack.i.bf16 %v486_v32, %v435_v31 }
  0x24   : > { %1729 = vrot.lane.b32.xlu1 %v1728_v48, %s1862_s22  ;;  %v1773_v45 = vpack.i.bf16 %v2049_v30, %v2047_v29  ;;  %v452_v48 = vsel %vm420_vm0, %v419_v41, %v403_v40  ;;  %v2078_v51 = vunpack.c.l.bf16 %v1669_v44  ;;  %v2080_v52 = vunpack.c.h.bf16 %v1669_v44 }
  0x25   : > { %v2070_v46 = vsel %vm887_vm2, %v1556_v42, 0  ;;  %v442_v47 = vsel %vm420_vm0, %v409_v36, %v393_v35  ;;  %v426_v53 = vsel %vm420_vm0, %v393_v35, %v409_v36  ;;  %v1863_v55 = vmov 0.0|0.0  }
  0x26   : > { %1734 = vrot.lane.b32.xlu2 %v1733_v56, %s1861_s21  ;;  %998 = vmatpush.bf16.msra.mxu1 %v2070_v46  ;;  %v468_v54 = vsel %vm387_vm1, %v442_v47, 0.0  ;;  %v436_v56 = vsel %vm420_vm0, %v403_v40, %v419_v41  ;;  %v488_v57 = vsel %vm387_vm1, %v452_v48, 0.0  ;;  %v1778_v58 = vpack.i.bf16 %v2040_v26, %v2038_v25  ;;  %v1671_v47 = vld [vmem:[%s1905_s20 + $0x40] sm:$0xff]  }
  0x27   : > { %v394_v60 = vrot.slane %v2078_v51, 1  ;;  %v1783_v4 = vpack.i.bf16 %v468_v54, %v426_v53  ;;  %v1788_v10 = vpack.i.bf16 %v488_v57, %v436_v56  ;;  %v1793_v24 = vpack.i.bf16 %v2080_v52, %v2078_v51 }
  0x28   : > { %v302_v44 = vrot.slane %v1915_v7, 7  ;;  %vm317_vm3 = vcmp.lt.s32.totalorder %v1899_v1, 1  ;;  %v301_v48 = vrot.slane %v1919_v9, 7  ;;  %v285_v53 = vrot.slane %v1917_v8, 7 }
  0x29   : > { %999 = vmatmul.bf16.vlgmr.msra.gmra.mxu1 %v1863_v55  ;;  %v2150_v54 = vunpack.c.l.bf16 %v1671_v47  ;;  %v2152_v56 = vunpack.c.h.bf16 %v1671_v47  ;;  %vm283_vm4 = vcmp.ge.s32.totalorder %v1899_v1, 1 }
  0x2a   : > { %v2164_v9 = vsel %vm317_vm3, %v285_v53, %v301_v48  ;;  %v334_v8 = vsel %vm317_vm3, %v301_v48, %v285_v53  ;;  %v303_v48 = vrot.slane %v1928_v13, 7  ;;  %v297_v53 = vrot.slane %v1930_v14, 7 }
  0x2b   : > { %1739 = vrot.lane.b32.xlu0 %v1738_v59, %s1861_s21  ;;  %v1674_v59 = vld [vmem:[%s1905_s20 + $0x58] sm:$0xff]  }
  0x2c   : > { %1744 = vrot.lane.b32.xlu1 %v1743_v61, %s1862_s22  ;;  %v410_v61 = vrot.slane %v2080_v52, 1  ;;  %v2099_v12 = vunpack.c.l.bf16 %v1674_v59  ;;  %v2101_v15 = vunpack.c.h.bf16 %v1674_v59 }
  0x2e   : > { %1749 = vrot.lane.b32.xlu2 %v1748_v17, %s1862_s22  ;;  %v443_v16 = vsel %vm420_vm0, %v410_v61, %v394_v60  ;;  %v2106_v17 = vunpack.c.l.bf16 %v1670_v5  ;;  %v399_v20 = vrot.slane %v2099_v12, 1  ;;  %v415_v21 = vrot.slane %v2101_v15, 1 }
  0x2f   : > { %v470_v23 = vsel %vm387_vm1, %v443_v16, 0.0  ;;  %v1798_v31 = vpack.i.bf16 %v2101_v15, %v2099_v12 }
  0x30   : > { %v395_v27 = vrot.slane %v2106_v17, 1  ;;  %v448_v32 = vsel %vm420_vm0, %v415_v21, %v399_v20  ;;  %v432_v34 = vsel %vm420_vm0, %v399_v20, %v415_v21  ;;  %v1576_v20 = vld [vmem:[%s2737_s1 + $0x10] sm:$0xf]  ;;  %v1599_v21 = vld [vmem:[%s2737_s1 + $0x10] sm:$0x30] }
  0x31   : > { %v480_v35 = vsel %vm387_vm1, %v448_v32, 0.0 }
  0x33   : > { %1754 = vrot.lane.b32.xlu0 %v1753_v19, %s1861_s21  ;;  %v2108_v19 = vunpack.c.h.bf16 %v1670_v5  ;;  %v1535_v5 = vld [vmem:[%s2737_s1 + $0x8] sm:$0xf] }
  0x34   : > { %1759 = vrot.lane.b32.xlu1 %v1758_v22, %s1861_s21  ;;  %v427_v22 = vsel %vm420_vm0, %v394_v60, %v410_v61 }
  0x35   : > { %v411_v28 = vrot.slane %v2108_v19, 1  ;;  %v1803_v33 = vpack.i.bf16 %v470_v23, %v427_v22  ;;  %v1813_v42 = vpack.i.bf16 %v2108_v19, %v2106_v17  ;;  %v1577_v22 = vor.u32 %v1599_v21, %v1576_v20 }
  0x36   : > { %1764 = vrot.lane.b32.xlu2 %v1763_v39, %s1862_s22  ;;  %v1808_v39 = vpack.i.bf16 %v480_v35, %v432_v34  ;;  %v1673_v35 = vld [vmem:[%s1905_s20 + $0x50] sm:$0xff]  }
  0x37   : > { %v444_v36 = vsel %vm420_vm0, %v411_v28, %v395_v27  ;;  %v428_v40 = vsel %vm420_vm0, %v395_v27, %v411_v28  ;;  %v1672_v27 = vld [vmem:[%s1905_s20 + $0x48] sm:$0xff]   ;;  %s214_s20 = scalar_lea.vmem %s2740_s4, %s2742_s16 }
  0x38   : > { %v472_v41 = vsel %vm387_vm1, %v444_v36, 0.0  ;;  %v2194_v28 = vunpack.c.l.bf16 %v1672_v27 }
  0x3b   : > { %1769 = vrot.lane.b32.xlu0 %v1768_v43, %s1862_s22  ;;  %v1818_v43 = vpack.i.bf16 %v472_v41, %v428_v40 }
  0x3c   : > { %1774 = vrot.lane.b32.xlu1 %v1773_v45, %s1861_s21  ;;  %v286_v45 = vrot.slane %v1913_v6, 7  ;;  %v396_v6 = vrot.slane %v2150_v54, 1 }
  0x3e   : > { %1779 = vrot.lane.b32.xlu2 %v1778_v58, %s1861_s21  ;;  %v2156_v57 = vsel %vm317_vm3, %v286_v45, %v302_v44  ;;  %v335_v7 = vsel %vm317_vm3, %v302_v44, %v286_v45  ;;  %v412_v58 = vrot.slane %v2152_v56, 1 }
  0x40   : > { %v445_v59 = vsel %vm420_vm0, %v412_v58, %v396_v6  ;;  %v429_v60 = vsel %vm420_vm0, %v396_v6, %v412_v58  ;;  %v313_v6 = vrot.slane %v1936_v18, 7 }
  0x41   : > { %v474_v61 = vsel %vm387_vm1, %v445_v59, 0.0 }
  0x43   : > { %1784 = vrot.lane.b32.xlu0 %v1783_v4, %s1862_s22  ;;  %v1828_v4 = vpack.i.bf16 %v474_v61, %v429_v60 }
  0x44   : > { %1789 = vrot.lane.b32.xlu1 %v1788_v10, %s1862_s22  ;;  %v1598_v10 = vld [vmem:[%s2737_s1 + $0x8] sm:$0x30] }
  0x45   : > { %v1536_v16 = vor.u32 %v1598_v10, %v1535_v5  ;;  %v397_v5 = vrot.slane %v2194_v28, 1 }
  0x46   : > { %1794 = vrot.lane.b32.xlu2 %v1793_v24, %s1861_s21  ;;  %v2189_v24 = vsel %vm887_vm2, %v1577_v22, 0 }
  0x47   : > { %v889_v23 = vsel %vm887_vm2, %v1536_v16, 0  ;;  %1098 = vmatpush.bf16.msra.mxu2 %v2189_v24 }
  0x48   : > { %898 = vmatpush.bf16.msra.mxu0 %v889_v23  ;;  %1679 = vmatpush.bf16.msra.mxu3 %v889_v23  ;;  %v346_v23 = vsel %vm317_vm3, %v313_v6, %v297_v53 }
  0x4b   : > { %1799 = vrot.lane.b32.xlu0 %v1798_v31, %s1861_s21  ;;  %v2196_v31 = vunpack.c.h.bf16 %v1672_v27 }
  0x4c   : > { %1804 = vrot.lane.b32.xlu1 %v1803_v33, %s1862_s22  ;;  %1680 = vmatpush.bf16.msrb.mxu3 %v2070_v46  ;;  %v1823_v33 = vpack.i.bf16 %v2152_v56, %v2150_v54  ;;  %v2207_v46 = vunpack.c.l.bf16 %v1673_v35 }
  0x4d   : > { %v1833_v32 = vpack.i.bf16 %v2196_v31, %v2194_v28  ;;  %v413_v10 = vrot.slane %v2196_v31, 1 }
  0x4e   : > { %1809 = vrot.lane.b32.xlu2 %v1808_v39, %s1862_s22  ;;  %v2209_v39 = vunpack.c.h.bf16 %v1673_v35  ;;  %v398_v44 = vrot.slane %v2207_v46, 1 }
  0x50   : > { %v1843_v41 = vpack.i.bf16 %v2209_v39, %v2207_v46  ;;  %v414_v45 = vrot.slane %v2209_v39, 1 }
  0x53   : > { %1814 = vrot.lane.b32.xlu0 %v1813_v42, %s1861_s21  ;;  %v356_v42 = vsel %vm283_vm4, %v335_v7, 0.0  ;;  %v431_v7 = vsel %vm420_vm0, %v398_v44, %v414_v45 }
  0x54   : > { %1819 = vrot.lane.b32.xlu1 %v1818_v43, %s1862_s22  ;;  %v354_v43 = vsel %vm283_vm4, %v334_v8, 0.0  ;;  %v447_v8 = vsel %vm420_vm0, %v414_v45, %v398_v44 }
  0x55   : > { %v478_v13 = vsel %vm387_vm1, %v447_v8, 0.0 }
  0x56   : > { %1824 = vrot.lane.b32.xlu2 %v1823_v33, %s1861_s21  ;;  %v1848_v18 = vpack.i.bf16 %v478_v13, %v431_v7  ;;  %v378_v7 = vsel %vm283_vm4, %v346_v23, 0.0 }
  0x5b   : > { %1829 = vrot.lane.b32.xlu0 %v1828_v4, %s1862_s22  ;;  %v287_v4 = vrot.slane %v1923_v11, 7 }
  0x5c   : > { %1834 = vrot.lane.b32.xlu1 %v1833_v32, %s1861_s21 }
  0x63   : > { %1844 = vrot.lane.b32.xlu0 %v1843_v41, %s1861_s21  ;;  %v430_v41 = vsel %vm420_vm0, %v397_v5, %v413_v10 }
  0x64   : > { %1849 = vrot.lane.b32.xlu1 %v1848_v18, %s1862_s22 }
  0x70   : > { %v2204_v34 = vpop.permute.xlu2 %1714 }
  0x71   : > { %v1716_v18 = vunpack.i.l.bf16 %v2204_v34 }
  0x78   : > { %v1720_v58 = vpop.permute.xlu2 %1719 }
  0x85   : > { %v1695_v36 = vpop.permute.xlu0 %1694 }
  0x86   : > { %v1705_v40 = vpop.permute.xlu1 %1704  ;;  %v1696_v47 = vunpack.i.l.bf16 %v1695_v36  ;;  %v1697_v59 = vunpack.i.h.bf16 %v1695_v36 }
  0x87   : > { %v1706_v60 = vunpack.i.l.bf16 %v1705_v40  ;;  %v1707_v61 = vunpack.i.h.bf16 %v1705_v40 }
  0x88   : > { %v748_v16 = vsel %vm745_vm5, %v356_v42, %v1696_v47  ;;  %v749_v11 = vsel %vm745_vm5, %v2156_v57, %v1697_v59  ;;  %v1722_v47 = vunpack.i.h.bf16 %v1720_v58  ;;  %v1721_v59 = vunpack.i.l.bf16 %v1720_v58 }
  0x89   : > { %v746_v27 = vsel %vm745_vm5, %v354_v43, %v1706_v60  ;;  %v747_v35 = vsel %vm745_vm5, %v2164_v9, %v1707_v61  ;;  %v446_v43 = vsel %vm420_vm0, %v413_v10, %v397_v5  ;;  %v330_v60 = vsel %vm317_vm3, %v297_v53, %v313_v6  ;;  %v1735_v61 = vpop.permute.xlu2 %1734 }
  0x8a   : > { %v476_v9 = vsel %vm387_vm1, %v446_v43, 0.0  ;;  %v336_v58 = vsel %vm317_vm3, %v303_v48, %v287_v4  ;;  %v771_v2 = vsel %vm745_vm5, %v330_v60, %v1722_v47  ;;  %v1717_v6 = vunpack.i.h.bf16 %v2204_v34 }
  0x8b   : > { %v1838_v8 = vpack.i.bf16 %v476_v9, %v430_v41  ;;  %v288_v43 = vrot.slane %v1966_v37, 7 }
  0x8d   : > { %v1700_v14 = vpop.permute.xlu0 %1699  ;;  %1839 = vrot.lane.b32.xlu2 %v1838_v8, %s1862_s22 }
  0x8e   : > { %v1702_v20 = vunpack.i.h.bf16 %v1700_v14  ;;  %v1701_v21 = vunpack.i.l.bf16 %v1700_v14  ;;  %v1710_v22 = vpop.permute.xlu1 %1709  ;;  %v770_v14 = vsel %vm745_vm5, %v378_v7, %v1721_v59 }
  0x8f   : > { %v1712_v32 = vunpack.i.h.bf16 %v1710_v22  ;;  %v1711_v33 = vunpack.i.l.bf16 %v1710_v22  ;;  %v314_v22 = vrot.slane %v1987_v50, 7 }
  0x90   : > { %v781_v36 = vsel %vm778_vm6, %v748_v16, %v1701_v21  ;;  %v782_v40 = vsel %vm778_vm6, %v749_v11, %v1702_v20  ;;  %v320_v16 = vsel %vm317_vm3, %v287_v4, %v303_v48  ;;  %v358_v20 = vsel %vm283_vm4, %v336_v58, 0.0 }
  0x91   : > { %v779_v42 = vsel %vm778_vm6, %v746_v27, %v1711_v33  ;;  %v780_v57 = vsel %vm778_vm6, %v747_v35, %v1712_v32  ;;  %v813_v44 = vpack.c.bf16 %v782_v40, %v781_v36  ;;  %v298_v21 = vrot.slane %v1985_v49, 7  ;;  %v1750_v41 = vpop.permute.xlu2 %1749 }
  0x92   : > { %v812_v45 = vpack.c.bf16 %v780_v57, %v779_v42  ;;  %v750_v34 = vsel %vm745_vm5, %v358_v20, %v1716_v18  ;;  %v751_v35 = vsel %vm745_vm5, %v320_v16, %v1717_v6  ;;  %v1752_v59 = vunpack.i.h.bf16 %v1750_v41 }
  0x93   : > { %1578 = vmatmul.msk.bf16.vlgmr.msra.gmra.mxu2 %vm838_vm7, %v813_v44  ;;  %v347_v49 = vsel %vm317_vm3, %v314_v22, %v298_v21  ;;  %v331_v42 = vsel %vm317_vm3, %v298_v21, %v314_v22  ;;  %v315_v18 = vrot.slane %v2014_v3, 7 }
  0x94   : > { %1537 = vmatmul.msk.bf16.vlgmr.msra.gmra.mxu0 %vm838_vm7, %v812_v45  ;;  %1557 = vmatmul.msk.bf16.gmra.mxu1 %vm838_vm7, %v812_v45  ;;  %v380_v57 = vsel %vm283_vm4, %v347_v49, 0.0  ;;  %v304_v45 = vrot.slane %v1968_v38, 7 }
  0x95   : > { %v1725_v13 = vpop.permute.xlu0 %1724 }
  0x96   : > { %v1730_v53 = vpop.permute.xlu1 %1729  ;;  %v1727_v27 = vunpack.i.h.bf16 %v1725_v13  ;;  %v1726_v32 = vunpack.i.l.bf16 %v1725_v13  ;;  %v337_v8 = vsel %vm317_vm3, %v304_v45, %v288_v43  ;;  %v321_v13 = vsel %vm317_vm3, %v288_v43, %v304_v45 }
  0x97   : > { %v1732_v5 = vunpack.i.h.bf16 %v1730_v53  ;;  %v1731_v10 = vunpack.i.l.bf16 %v1730_v53  ;;  %v360_v53 = vsel %vm283_vm4, %v337_v8, 0.0 }
  0x98   : > { %v783_v50 = vsel %vm778_vm6, %v750_v34, %v1726_v32  ;;  %v784_v4 = vsel %vm778_vm6, %v751_v35, %v1727_v27  ;;  %v289_v34 = vrot.slane %v2008_v62, 7  ;;  %v305_v35 = vrot.slane %v2010_v63, 7 }
  0x99   : > { %v803_v23 = vsel %vm778_vm6, %v770_v14, %v1731_v10  ;;  %v804_v11 = vsel %vm778_vm6, %v771_v2, %v1732_v5  ;;  %v814_v47 = vpack.c.bf16 %v784_v4, %v783_v50  ;;  %v1737_v2 = vunpack.i.h.bf16 %v1735_v61 }
  0x9a   : > { %v2274_v33 = vpack.c.bf16 %v804_v11, %v803_v23  ;;  %v1736_v14 = vunpack.i.l.bf16 %v1735_v61  ;;  %v338_v62 = vsel %vm317_vm3, %v305_v35, %v289_v34 }
  0x9b   : > { %v753_v20 = vsel %vm745_vm5, %v321_v13, %v1737_v2 }
  0x9c   : > { %1549 = vmatmul.msk.bf16.vlgmr.msra.gmra.mxu3 %vm838_vm7, %v2274_v33  ;;  %v752_v21 = vsel %vm745_vm5, %v360_v53, %v1736_v14 }
  0x9d   : > { %v1740_v48 = vpop.permute.xlu0 %1739  ;;  %1681 = vmatpush.bf16.msra.mxu3 %v2189_v24  ;;  %v1751_v24 = vunpack.i.l.bf16 %v1750_v41 }
  0x9e   : > { %v1742_v36 = vunpack.i.h.bf16 %v1740_v48  ;;  %v1741_v40 = vunpack.i.l.bf16 %v1740_v48  ;;  %v1745_v7 = vpop.permute.xlu1 %1744 }
  0x9f   : > { %v1747_v5 = vunpack.i.h.bf16 %v1745_v7  ;;  %v1746_v10 = vunpack.i.l.bf16 %v1745_v7 }
  0xa0   : > { %v773_v9 = vsel %vm745_vm5, %v331_v42, %v1742_v36  ;;  %v772_v60 = vsel %vm745_vm5, %v380_v57, %v1741_v40  ;;  %v1765_v40 = vpop.permute.xlu2 %1764  ;;  %v322_v57 = vsel %vm317_vm3, %v289_v34, %v305_v35  ;;  %v296_v35 = vrot.slane %v2099_v12, 7 }
  0xa1   : > { %v805_v37 = vsel %vm778_vm6, %v772_v60, %v1751_v24  ;;  %v806_v38 = vsel %vm778_vm6, %v773_v9, %v1752_v59  ;;  %v785_v22 = vsel %vm778_vm6, %v752_v21, %v1746_v10  ;;  %v786_v23 = vsel %vm778_vm6, %v753_v20, %v1747_v5 }
  0xa2   : > { %v2304_v6 = vpack.c.bf16 %v806_v38, %v805_v37  ;;  %v815_v49 = vpack.c.bf16 %v786_v23, %v785_v22  ;;  %v362_v59 = vsel %vm283_vm4, %v338_v62, 0.0  ;;  %v316_v9 = vrot.slane %v2040_v26, 7 }
  0xa3   : > { %1579 = vmatmul.msk.bf16.gmra.mxu2 %vm838_vm7, %v814_v47  ;;  %v1767_v60 = vunpack.i.h.bf16 %v1765_v40  ;;  %v1766_v7 = vunpack.i.l.bf16 %v1765_v40  ;;  %v306_v5 = vrot.slane %v2049_v30, 7 }
  0xa4   : > { %1538 = vmatmul.msk.bf16.gmra.mxu0 %vm838_vm7, %v813_v44  ;;  %1558 = vmatmul.msk.bf16.gmra.mxu1 %vm838_vm7, %v813_v44  ;;  %v299_v44 = vrot.slane %v2012_v0, 7 }
  0xa5   : > { %v1755_v58 = vpop.permute.xlu0 %1754 }
  0xa6   : > { %v1760_v16 = vpop.permute.xlu1 %1759  ;;  %v348_v61 = vsel %vm317_vm3, %v315_v18, %v299_v44  ;;  %v332_v27 = vsel %vm317_vm3, %v299_v44, %v315_v18  ;;  %v1757_v43 = vunpack.i.h.bf16 %v1755_v58  ;;  %v1756_v45 = vunpack.i.l.bf16 %v1755_v58 }
  0xa7   : > { %v1762_v0 = vunpack.i.h.bf16 %v1760_v16  ;;  %v1761_v11 = vunpack.i.l.bf16 %v1760_v16  ;;  %v382_v32 = vsel %vm283_vm4, %v348_v61, 0.0  ;;  %v290_v18 = vrot.slane %v2047_v29, 7 }
  0xa8   : > { %v1780_v8 = vpop.permute.xlu2 %1779  ;;  %v755_v37 = vsel %vm745_vm5, %v322_v57, %v1757_v43  ;;  %v754_v38 = vsel %vm745_vm5, %v362_v59, %v1756_v45  ;;  %v291_v45 = vrot.slane %v2078_v51, 7  ;;  %v307_v59 = vrot.slane %v2080_v52, 7 }
  0xa9   : > { %v775_v4 = vsel %vm745_vm5, %v332_v27, %v1762_v0  ;;  %v774_v36 = vsel %vm745_vm5, %v382_v32, %v1761_v11  ;;  %v787_v13 = vsel %vm778_vm6, %v754_v38, %v1766_v7  ;;  %v788_v2 = vsel %vm778_vm6, %v755_v37, %v1767_v60 }
  0xaa   : > { %v1781_v14 = vunpack.i.l.bf16 %v1780_v8  ;;  %v816_v10 = vpack.c.bf16 %v788_v2, %v787_v13  ;;  %v339_v29 = vsel %vm317_vm3, %v306_v5, %v290_v18  ;;  %v323_v11 = vsel %vm317_vm3, %v290_v18, %v306_v5 }
  0xab   : > { %v364_v32 = vsel %vm283_vm4, %v339_v29, 0.0  ;;  %v340_v37 = vsel %vm317_vm3, %v307_v59, %v291_v45  ;;  %v324_v2 = vsel %vm317_vm3, %v291_v45, %v307_v59  ;;  %v1000_v45 = vpop.f32.mrf.mxu1 }
  0xac   : > { %1550 = vmatmul.msk.bf16.gmra.mxu3 %vm838_vm7, %v2304_v6 }
  0xad   : > { %v1770_v3 = vpop.permute.xlu0 %1769 }
  0xae   : > { %v1772_v48 = vunpack.i.h.bf16 %v1770_v3  ;;  %v1771_v50 = vunpack.i.l.bf16 %v1770_v3  ;;  %v1775_v41 = vpop.permute.xlu1 %1774 }
  0xaf   : > { %v1777_v3 = vunpack.i.h.bf16 %v1775_v41  ;;  %v1776_v27 = vunpack.i.l.bf16 %v1775_v41 }
  0xb0   : > { %v807_v63 = vsel %vm778_vm6, %v774_v36, %v1771_v50  ;;  %v808_v42 = vsel %vm778_vm6, %v775_v4, %v1772_v48  ;;  %v1795_v23 = vpop.permute.xlu2 %1794 }
  0xb1   : > { %v2335_v24 = vpack.c.bf16 %v808_v42, %v807_v63  ;;  %v757_v4 = vsel %vm745_vm5, %v323_v11, %v1777_v3  ;;  %v756_v36 = vsel %vm745_vm5, %v364_v32, %v1776_v27  ;;  %v1797_v38 = vunpack.i.h.bf16 %v1795_v23 }
  0xb3   : > { %1580 = vmatmul.msk.bf16.gmra.mxu2 %vm838_vm7, %v815_v49 }
  0xb4   : > { %1539 = vmatmul.msk.bf16.gmra.mxu0 %vm838_vm7, %v814_v47  ;;  %1559 = vmatmul.msk.bf16.gmra.mxu1 %vm838_vm7, %v814_v47  ;;  %v300_v47 = vrot.slane %v2038_v25, 7  ;;  %v1782_v25 = vunpack.i.h.bf16 %v1780_v8 }
  0xb5   : > { %v1785_v22 = vpop.permute.xlu0 %1784 }
  0xb6   : > { %v349_v58 = vsel %vm317_vm3, %v316_v9, %v300_v47  ;;  %v1790_v26 = vpop.permute.xlu1 %1789  ;;  %v333_v53 = vsel %vm317_vm3, %v300_v47, %v316_v9  ;;  %v1787_v48 = vunpack.i.h.bf16 %v1785_v22  ;;  %v1786_v50 = vunpack.i.l.bf16 %v1785_v22 }
  0xb7   : > { %v384_v44 = vsel %vm283_vm4, %v349_v58, 0.0  ;;  %v1792_v16 = vunpack.i.h.bf16 %v1790_v26  ;;  %v1791_v20 = vunpack.i.l.bf16 %v1790_v26  ;;  %v777_v21 = vsel %vm745_vm5, %v333_v53, %v1782_v25 }
  0xb8   : > { %v776_v61 = vsel %vm745_vm5, %v384_v44, %v1781_v14  ;;  %v789_v62 = vsel %vm778_vm6, %v756_v36, %v1786_v50  ;;  %v790_v63 = vsel %vm778_vm6, %v757_v4, %v1787_v48  ;;  %v1796_v58 = vunpack.i.l.bf16 %v1795_v23 }
  0xb9   : > { %v809_v30 = vsel %vm778_vm6, %v776_v61, %v1791_v20  ;;  %v810_v0 = vsel %vm778_vm6, %v777_v21, %v1792_v16  ;;  %v817_v47 = vpack.c.bf16 %v790_v63, %v789_v62  ;;  %v366_v25 = vsel %vm283_vm4, %v340_v37, 0.0 }
  0xba   : > { %v2366_v34 = vpack.c.bf16 %v810_v0, %v809_v30  ;;  %v759_v44 = vsel %vm745_vm5, %v324_v2, %v1797_v38  ;;  %v758_v18 = vsel %vm745_vm5, %v366_v25, %v1796_v58  ;;  %v292_v16 = vrot.slane %v2106_v17, 7 }
  0xbb   : > { %v308_v20 = vrot.slane %v2108_v19, 7  ;;  %v293_v48 = vrot.slane %v2150_v54, 7  ;;  %v309_v50 = vrot.slane %v2152_v56, 7 }
  0xbc   : > { %1551 = vmatmul.msk.bf16.gmra.mxu3 %vm838_vm7, %v2335_v24 }
  0xbd   : > { %v1800_v40 = vpop.permute.xlu0 %1799  ;;  %v341_v22 = vsel %vm317_vm3, %v308_v20, %v292_v16  ;;  %v325_v0 = vsel %vm317_vm3, %v292_v16, %v308_v20  ;;  %v342_v36 = vsel %vm317_vm3, %v309_v50, %v293_v48  ;;  %v326_v63 = vsel %vm317_vm3, %v293_v48, %v309_v50 }
  0xbe   : > { %v1802_v12 = vunpack.i.h.bf16 %v1800_v40  ;;  %v1801_v42 = vunpack.i.l.bf16 %v1800_v40  ;;  %v1805_v13 = vpop.permute.xlu1 %1804  ;;  %v368_v17 = vsel %vm283_vm4, %v341_v22, 0.0  ;;  %v370_v54 = vsel %vm283_vm4, %v342_v36, 0.0 }
  0xbf   : > { %v1807_v26 = vunpack.i.h.bf16 %v1805_v13  ;;  %v1806_v53 = vunpack.i.l.bf16 %v1805_v13 }
  0xc1   : > { %v791_v5 = vsel %vm778_vm6, %v758_v18, %v1806_v53  ;;  %v311_v18 = vrot.slane %v2209_v39, 7 }
  0xc3   : > { %1581 = vmatmul.msk.bf16.gmra.mxu2 %vm838_vm7, %v816_v10 }
  0xc4   : > { %1540 = vmatmul.msk.bf16.gmra.mxu0 %vm838_vm7, %v815_v49  ;;  %1560 = vmatmul.msk.bf16.gmra.mxu1 %vm838_vm7, %v815_v49  ;;  %v312_v49 = vrot.slane %v2101_v15, 7  ;;  %v1810_v15 = vpop.permute.xlu2 %1809 }
  0xc5   : > { %v1812_v9 = vunpack.i.h.bf16 %v1810_v15  ;;  %v1811_v60 = vunpack.i.l.bf16 %v1810_v15  ;;  %v1815_v61 = vpop.permute.xlu0 %1814 }
  0xc6   : > { %v345_v41 = vsel %vm317_vm3, %v312_v49, %v296_v35  ;;  %v329_v57 = vsel %vm317_vm3, %v296_v35, %v312_v49  ;;  %v1817_v23 = vunpack.i.h.bf16 %v1815_v61  ;;  %v1816_v29 = vunpack.i.l.bf16 %v1815_v61  ;;  %v1820_v30 = vpop.permute.xlu1 %1819 }
  0xc7   : > { %v376_v43 = vsel %vm283_vm4, %v345_v41, 0.0  ;;  %v769_v7 = vsel %vm745_vm5, %v329_v57, %v1802_v12  ;;  %v1822_v19 = vunpack.i.h.bf16 %v1820_v30  ;;  %v1821_v11 = vunpack.i.l.bf16 %v1820_v30 }
  0xc8   : > { %v768_v8 = vsel %vm745_vm5, %v376_v43, %v1801_v42  ;;  %v802_v52 = vsel %vm778_vm6, %v769_v7, %v1812_v9  ;;  %v761_v3 = vsel %vm745_vm5, %v325_v0, %v1817_v23  ;;  %v760_v27 = vsel %vm745_vm5, %v368_v17, %v1816_v29 }
  0xc9   : > { %v801_v51 = vsel %vm778_vm6, %v768_v8, %v1811_v60  ;;  %v793_v32 = vsel %vm778_vm6, %v760_v27, %v1821_v11  ;;  %v794_v35 = vsel %vm778_vm6, %v761_v3, %v1822_v19  ;;  %v310_v9 = vrot.slane %v2196_v31, 7  ;;  %v1002_v31 = vpop.f32.mrf.mxu1 }
  0xca   : > { %v2397_v14 = vpack.c.bf16 %v802_v52, %v801_v51  ;;  %v819_v49 = vpack.c.bf16 %v794_v35, %v793_v32 }
  0xcc   : > { %1552 = vmatmul.msk.bf16.gmra.mxu3 %vm838_vm7, %v2366_v34  ;;  %v1825_v4 = vpop.permute.xlu2 %1824 }
  0xcd   : > { %v1827_v40 = vunpack.i.h.bf16 %v1825_v4  ;;  %v1826_v41 = vunpack.i.l.bf16 %v1825_v4  ;;  %v1830_v62 = vpop.permute.xlu0 %1829 }
  0xce   : > { %v1832_v56 = vunpack.i.h.bf16 %v1830_v62  ;;  %v1831_v12 = vunpack.i.l.bf16 %v1830_v62  ;;  %v1835_v60 = vpop.permute.xlu1 %1834 }
  0xcf   : > { %v763_v42 = vsel %vm745_vm5, %v326_v63, %v1827_v40  ;;  %v762_v15 = vsel %vm745_vm5, %v370_v54, %v1826_v41  ;;  %v1837_v8 = vunpack.i.h.bf16 %v1835_v60  ;;  %v1836_v37 = vunpack.i.l.bf16 %v1835_v60 }
  0xd0   : > { %v795_v57 = vsel %vm778_vm6, %v762_v15, %v1831_v12  ;;  %v796_v43 = vsel %vm778_vm6, %v763_v42, %v1832_v56 }
  0xd1   : > { %v820_v59 = vpack.c.bf16 %v796_v43, %v795_v57 }
  0xd3   : > { %1582 = vmatmul.msk.bf16.gmra.mxu2 %vm838_vm7, %v817_v47 }
  0xd4   : > { %1541 = vmatmul.msk.bf16.gmra.mxu0 %vm838_vm7, %v816_v10  ;;  %1561 = vmatmul.msk.bf16.gmra.mxu1 %vm838_vm7, %v816_v10  ;;  %v792_v10 = vsel %vm778_vm6, %v759_v44, %v1807_v26  ;;  %v295_v44 = vrot.slane %v2207_v46, 7 }
  0xd5   : > { %v818_v21 = vpack.c.bf16 %v792_v10, %v791_v5  ;;  %v1845_v16 = vpop.permute.xlu0 %1844 }
  0xd6   : > { %v344_v20 = vsel %vm317_vm3, %v311_v18, %v295_v44  ;;  %v1847_v61 = vunpack.i.h.bf16 %v1845_v16  ;;  %v1846_v22 = vunpack.i.l.bf16 %v1845_v16  ;;  %v1850_v23 = vpop.permute.xlu1 %1849  ;;  %v328_v39 = vsel %vm317_vm3, %v295_v44, %v311_v18 }
  0xd7   : > { %v374_v29 = vsel %vm283_vm4, %v344_v20, 0.0  ;;  %v1852_v0 = vunpack.i.h.bf16 %v1850_v23  ;;  %v1851_v17 = vunpack.i.l.bf16 %v1850_v23 }
  0xd8   : > { %v767_v3 = vsel %vm745_vm5, %v328_v39, %v1847_v61  ;;  %v766_v27 = vsel %vm745_vm5, %v374_v29, %v1846_v22 }
  0xd9   : > { %v799_v32 = vsel %vm778_vm6, %v766_v27, %v1851_v17  ;;  %v800_v1 = vsel %vm778_vm6, %v767_v3, %v1852_v0 }
  0xda   : > { %v822_v36 = vpack.c.bf16 %v800_v1, %v799_v32 }
  0xdc   : > { %1568 = vmatmul.msk.bf16.vlgmr.msrb.gmra.mxu3 %vm838_vm7, %v2397_v14 }
  0xe3   : > { %1583 = vmatmul.msk.bf16.gmra.mxu2 %vm838_vm7, %v818_v21 }
  0xe4   : > { %1542 = vmatmul.msk.bf16.gmra.mxu0 %vm838_vm7, %v817_v47  ;;  %1562 = vmatmul.msk.bf16.gmra.mxu1 %vm838_vm7, %v817_v47  ;;  %v294_v47 = vrot.slane %v2194_v28, 7 }
  0xe6   : > { %v343_v7 = vsel %vm317_vm3, %v310_v9, %v294_v47  ;;  %v327_v52 = vsel %vm317_vm3, %v294_v47, %v310_v9 }
  0xe7   : > { %v1840_v51 = vpop.permute.xlu2 %1839  ;;  %v372_v28 = vsel %vm283_vm4, %v343_v7, 0.0  ;;  %v765_v13 = vsel %vm745_vm5, %v327_v52, %v1837_v8 }
  0xe8   : > { %v1842_v38 = vunpack.i.h.bf16 %v1840_v51  ;;  %v1841_v58 = vunpack.i.l.bf16 %v1840_v51  ;;  %v764_v2 = vsel %vm745_vm5, %v372_v28, %v1836_v37 }
  0xea   : > { %v797_v25 = vsel %vm778_vm6, %v764_v2, %v1841_v58  ;;  %v798_v26 = vsel %vm778_vm6, %v765_v13, %v1842_v38 }
  0xeb   : > { %v821_v53 = vpack.c.bf16 %v798_v26, %v797_v25 }
  0xec   : > { %1569 = vmatmul.msk.bf16.gmra.mxu3 %vm838_vm7, %v2274_v33 }
  0xf3   : > { %1584 = vmatmul.msk.bf16.gmra.mxu2 %vm838_vm7, %v819_v49 }
  0xf4   : > { %1543 = vmatmul.msk.bf16.gmra.mxu0 %vm838_vm7, %v818_v21  ;;  %1563 = vmatmul.msk.bf16.gmra.mxu1 %vm838_vm7, %v818_v21 }
  0xfc   : > { %1570 = vmatmul.msk.bf16.gmra.mxu3 %vm838_vm7, %v2304_v6 }
 0x103   : > { %1585 = vmatmul.msk.bf16.gmra.mxu2 %vm838_vm7, %v820_v59 }
 0x104   : > { %1544 = vmatmul.msk.bf16.gmra.mxu0 %vm838_vm7, %v819_v49  ;;  %1564 = vmatmul.msk.bf16.gmra.mxu1 %vm838_vm7, %v819_v49 }
 0x10c   : > { %1571 = vmatmul.msk.bf16.gmra.mxu3 %vm838_vm7, %v2335_v24 }
 0x111   : > { %v900_v5 = vpop.f32.mrf.mxu0  ;;  %v1005_v10 = vpop.f32.mrf.mxu1 }
 0x112   : > { %v1001_v21 = vadd.f32 %v1000_v45, %v900_v5 }
 0x113   : > { %1586 = vmatmul.msk.bf16.gmra.mxu2 %vm838_vm7, %v821_v53 }
 0x114   : > { %1545 = vmatmul.msk.bf16.gmra.mxu0 %vm838_vm7, %v820_v59  ;;  %1565 = vmatmul.msk.bf16.gmra.mxu1 %vm838_vm7, %v820_v59 }
 0x116   : > { %v1100_v46 = vpop.f32.mrf.mxu2 }
 0x117   : > { %v1180_v30 = vadd.f32 %v1100_v46, %v1001_v21 }
 0x119   : > { %1385 = vst.msk [vmem:[%s2467_s12] sm:$0xff] %vm778_vm6, %v1180_v30  ;;  %v902_v19 = vpop.f32.mrf.mxu0  ;;  %v1007_v11 = vpop.f32.mrf.mxu1  ;;  %v1283_v48 = vmul.f32 %v1180_v30, %v1180_v30  ;;  %v1212_v40 = vsel %vm778_vm6, %v1180_v30, 0.0 }
 0x11a   : > { %v1003_v35 = vadd.f32 %v1002_v31, %v902_v19 }
 0x11b   : > { %v1315_v56 = vsel %vm778_vm6, %v1283_v48, 0.0 }
 0x11c   : > { %1590 = vmatmul.msk.bf16.vlgmr.msra.gmra.mxu3 %vm838_vm7, %v2304_v6 }
 0x11e   : > { %v1102_v49 = vpop.f32.mrf.mxu2 }
 0x11f   : > { %v2481_v50 = vpop.f32.mrf.mxu3  ;;  %v1181_v4 = vadd.f32 %v1102_v49, %v1003_v35 }
 0x121   : > { %v1213_v41 = vsel %vm778_vm6, %v1181_v4, 0.0  ;;  %v1284_v62 = vmul.f32 %v1181_v4, %v1181_v4  ;;  %1386 = vst.msk [vmem:[%s2467_s12 + $0x8] sm:$0xff] %vm778_vm6, %v1181_v4  ;;  %v905_v6 = vpop.f32.mrf.mxu0  ;;  %v1010_v63 = vpop.f32.mrf.mxu1 }
 0x122   : > { %v1214_v54 = vadd.f32 %v1213_v41, %v1212_v40  ;;  %v1006_v15 = vadd.f32 %v1005_v10, %v905_v6 }
 0x123   : > { %v1316_v12 = vsel %vm778_vm6, %v1284_v62, 0.0  ;;  %1587 = vmatmul.msk.bf16.gmra.mxu2 %vm838_vm7, %v822_v36 }
 0x124   : > { %v1317_v42 = vadd.f32 %v1316_v12, %v1315_v56  ;;  %1546 = vmatmul.msk.bf16.gmra.mxu0 %vm838_vm7, %v821_v53  ;;  %1566 = vmatmul.msk.bf16.gmra.mxu1 %vm838_vm7, %v821_v53 }
 0x126   : > { %v1105_v57 = vpop.f32.mrf.mxu2 }
 0x127   : > { %v2492_v43 = vpop.f32.mrf.mxu3  ;;  %v1182_v45 = vadd.f32 %v1105_v57, %v1006_v15 }
 0x129   : > { %v1215_v59 = vsel %vm778_vm6, %v1182_v45, 0.0  ;;  %v1285_v47 = vmul.f32 %v1182_v45, %v1182_v45  ;;  %1387 = vst.msk [vmem:[%s2467_s12 + $0x10] sm:$0xff] %vm778_vm6, %v1182_v45  ;;  %v907_v9 = vpop.f32.mrf.mxu0  ;;  %v1012_v60 = vpop.f32.mrf.mxu1 }
 0x12a   : > { %v1216_v7 = vadd.f32 %v1215_v59, %v1214_v54  ;;  %v1008_v51 = vadd.f32 %v1007_v11, %v907_v9 }
 0x12b   : > { %v1318_v8 = vsel %vm778_vm6, %v1285_v47, 0.0 }
 0x12c   : > { %v1319_v37 = vadd.f32 %v1318_v8, %v1317_v42  ;;  %1591 = vmatmul.msk.bf16.gmra.mxu3 %vm838_vm7, %v2335_v24 }
 0x12e   : > { %v1107_v52 = vpop.f32.mrf.mxu2 }
 0x12f   : > { %v2500_v28 = vpop.f32.mrf.mxu3  ;;  %v1183_v31 = vadd.f32 %v1107_v52, %v1008_v51 }
 0x131   : > { %v1217_v38 = vsel %vm778_vm6, %v1183_v31, 0.0  ;;  %v1286_v58 = vmul.f32 %v1183_v31, %v1183_v31  ;;  %1388 = vst.msk [vmem:[%s2467_s12 + $0x18] sm:$0xff] %vm778_vm6, %v1183_v31  ;;  %v910_v13 = vpop.f32.mrf.mxu0  ;;  %v1015_v2 = vpop.f32.mrf.mxu1 }
 0x132   : > { %v1218_v25 = vadd.f32 %v1217_v38, %v1216_v7  ;;  %v1011_v53 = vadd.f32 %v1010_v63, %v910_v13 }
 0x133   : > { %v1320_v26 = vsel %vm778_vm6, %v1286_v58, 0.0  ;;  %1588 = vmatmul.msk.bf16.gmra.mxu2 %vm838_vm7, %v2397_v14 }
 0x134   : > { %v1321_v24 = vadd.f32 %v1320_v26, %v1319_v37  ;;  %1547 = vmatmul.msk.bf16.gmra.mxu0 %vm838_vm7, %v822_v36  ;;  %1567 = vmatmul.msk.bf16.gmra.mxu1 %vm838_vm7, %v822_v36 }
 0x136   : > { %v1110_v44 = vpop.f32.mrf.mxu2 }
 0x137   : > { %v2510_v18 = vpop.f32.mrf.mxu3  ;;  %v1184_v5 = vadd.f32 %v1110_v44, %v1011_v53 }
 0x139   : > { %v1219_v10 = vsel %vm778_vm6, %v1184_v5, 0.0  ;;  %v1287_v16 = vmul.f32 %v1184_v5, %v1184_v5  ;;  %1389 = vst.msk [vmem:[%s2467_s12 + $0x20] sm:$0xff] %vm778_vm6, %v1184_v5  ;;  %v912_v20 = vpop.f32.mrf.mxu0  ;;  %v1017_v21 = vpop.f32.mrf.mxu1 }
 0x13a   : > { %v1220_v61 = vadd.f32 %v1219_v10, %v1218_v25  ;;  %v1013_v46 = vadd.f32 %v1012_v60, %v912_v20 }
 0x13b   : > { %v1322_v22 = vsel %vm778_vm6, %v1287_v16, 0.0 }
 0x13c   : > { %v1323_v23 = vadd.f32 %v1322_v22, %v1321_v24  ;;  %1592 = vmatmul.msk.bf16.gmra.mxu3 %vm838_vm7, %v2366_v34 }
 0x13e   : > { %v1112_v39 = vpop.f32.mrf.mxu2 }
 0x13f   : > { %v2518_v29 = vpop.f32.mrf.mxu3  ;;  %v1185_v30 = vadd.f32 %v1112_v39, %v1013_v46 }
 0x141   : > { %v1221_v0 = vsel %vm778_vm6, %v1185_v30, 0.0  ;;  %v1288_v17 = vmul.f32 %v1185_v30, %v1185_v30  ;;  %1390 = vst.msk [vmem:[%s2467_s12 + $0x28] sm:$0xff] %vm778_vm6, %v1185_v30  ;;  %v915_v19 = vpop.f32.mrf.mxu0  ;;  %v1020_v11 = vpop.f32.mrf.mxu1 }
 0x142   : > { %v1222_v3 = vadd.f32 %v1221_v0, %v1220_v61  ;;  %v1016_v32 = vadd.f32 %v1015_v2, %v915_v19 }
 0x143   : > { %v1324_v27 = vsel %vm778_vm6, %v1288_v17, 0.0  ;;  %1589 = vmatmul.msk.bf16.gmra.mxu2 %vm838_vm7, %v2274_v33 }
 0x144   : > { %v1325_v34 = vadd.f32 %v1324_v27, %v1323_v23  ;;  %1548 = vmatmul.msk.bf16.gmra.mxu0 %vm838_vm7, %v2397_v14 }
 0x146   : > { %v1115_v1 = vpop.f32.mrf.mxu2 }
 0x147   : > { %v2528_v35 = vpop.f32.mrf.mxu3  ;;  %v1186_v49 = vadd.f32 %v1115_v1, %v1016_v32 }
 0x149   : > { %v1223_v48 = vsel %vm778_vm6, %v1186_v49, 0.0  ;;  %v1289_v4 = vmul.f32 %v1186_v49, %v1186_v49  ;;  %1391 = vst.msk [vmem:[%s2467_s12 + $0x30] sm:$0xff] %vm778_vm6, %v1186_v49  ;;  %v917_v36 = vpop.f32.mrf.mxu0  ;;  %v1022_v40 = vpop.f32.mrf.mxu1 }
 0x14a   : > { %v1224_v41 = vadd.f32 %v1223_v48, %v1222_v3  ;;  %v1018_v14 = vadd.f32 %v1017_v21, %v917_v36 }
 0x14b   : > { %v1326_v33 = vsel %vm778_vm6, %v1289_v4, 0.0 }
 0x14c   : > { %v1327_v62 = vadd.f32 %v1326_v33, %v1325_v34  ;;  %1174 = vmatmul.bf16.gmra.mxu3 %v1863_v55 }
 0x14e   : > { %v1117_v6 = vpop.f32.mrf.mxu2 }
 0x14f   : > { %v2535_v63 = vpop.f32.mrf.mxu3  ;;  %v1187_v54 = vadd.f32 %v1117_v6, %v1018_v14 }
 0x151   : > { %v1225_v56 = vsel %vm778_vm6, %v1187_v54, 0.0  ;;  %v1290_v12 = vmul.f32 %v1187_v54, %v1187_v54  ;;  %1392 = vst.msk [vmem:[%s2467_s12 + $0x38] sm:$0xff] %vm778_vm6, %v1187_v54  ;;  %v920_v42 = vpop.f32.mrf.mxu0  ;;  %v1025_v15 = vpop.f32.mrf.mxu1 }
 0x152   : > { %v1226_v57 = vadd.f32 %v1225_v56, %v1224_v41  ;;  %v1021_v47 = vadd.f32 %v1020_v11, %v920_v42 }
 0x153   : > { %v1328_v45 = vsel %vm778_vm6, %v1290_v12, 0.0 }
 0x154   : > { %v1329_v59 = vadd.f32 %v1328_v45, %v1327_v62 }
 0x156   : > { %v1120_v9 = vpop.f32.mrf.mxu2 }
 0x157   : > { %v2541_v55 = vpop.f32.mrf.mxu3  ;;  %v1188_v60 = vadd.f32 %v1120_v9, %v1021_v47 }
 0x159   : > { %v1227_v7 = vsel %vm778_vm6, %v1188_v60, 0.0  ;;  %v1291_v8 = vmul.f32 %v1188_v60, %v1188_v60  ;;  %1393 = vst.msk [vmem:[%s2467_s12 + $0x40] sm:$0xff] %vm778_vm6, %v1188_v60  ;;  %v922_v37 = vpop.f32.mrf.mxu0  ;;  %v1027_v51 = vpop.f32.mrf.mxu1 }
 0x15a   : > { %v1228_v52 = vadd.f32 %v1227_v7, %v1226_v57  ;;  %v1023_v58 = vadd.f32 %v1022_v40, %v922_v37 }
 0x15b   : > { %v1330_v31 = vsel %vm778_vm6, %v1291_v8, 0.0 }
 0x15c   : > { %v1331_v38 = vadd.f32 %v1330_v31, %v1329_v59 }
 0x15e   : > { %v1122_v13 = vpop.f32.mrf.mxu2 }
 0x15f   : > { %v2547_v2 = vpop.f32.mrf.mxu3  ;;  %v1189_v25 = vadd.f32 %v1122_v13, %v1023_v58 }
 0x161   : > { %v1229_v26 = vsel %vm778_vm6, %v1189_v25, 0.0  ;;  %v1292_v24 = vmul.f32 %v1189_v25, %v1189_v25  ;;  %1394 = vst.msk [vmem:[%s2467_s12 + $0x48] sm:$0xff] %vm778_vm6, %v1189_v25  ;;  %v925_v53 = vpop.f32.mrf.mxu0  ;;  %v1030_v44 = vpop.f32.mrf.mxu1 }
 0x162   : > { %v1230_v5 = vadd.f32 %v1229_v26, %v1228_v52  ;;  %v1026_v20 = vadd.f32 %v1025_v15, %v925_v53 }
 0x163   : > { %v1332_v10 = vsel %vm778_vm6, %v1292_v24, 0.0 }
 0x164   : > { %v1333_v16 = vadd.f32 %v1332_v10, %v1331_v38 }
 0x166   : > { %v1125_v21 = vpop.f32.mrf.mxu2 }
 0x167   : > { %v2553_v61 = vpop.f32.mrf.mxu3  ;;  %v1190_v22 = vadd.f32 %v1125_v21, %v1026_v20 }
 0x169   : > { %v1231_v23 = vsel %vm778_vm6, %v1190_v22, 0.0  ;;  %v1293_v46 = vmul.f32 %v1190_v22, %v1190_v22  ;;  %1395 = vst.msk [vmem:[%s2467_s12 + $0x50] sm:$0xff] %vm778_vm6, %v1190_v22  ;;  %v927_v39 = vpop.f32.mrf.mxu0  ;;  %v1032_v30 = vpop.f32.mrf.mxu1  ;;  %v1061_v22 = vadd.f32 %v2547_v2, %v2481_v50  ;;  %v1063_v50 = vadd.f32 %v2553_v61, %v2492_v43 }
 0x16a   : > { %v1232_v0 = vadd.f32 %v1231_v23, %v1230_v5  ;;  %v1028_v11 = vadd.f32 %v1027_v51, %v927_v39 }
 0x16b   : > { %v1334_v17 = vsel %vm778_vm6, %v1293_v46, 0.0 }
 0x16c   : > { %v1335_v19 = vadd.f32 %v1334_v17, %v1333_v16 }
 0x16e   : > { %v1127_v3 = vpop.f32.mrf.mxu2 }
 0x16f   : > { %v2559_v27 = vpop.f32.mrf.mxu3  ;;  %v1191_v34 = vadd.f32 %v1127_v3, %v1028_v11 }
 0x171   : > { %v1233_v32 = vsel %vm778_vm6, %v1191_v34, 0.0  ;;  %v1294_v1 = vmul.f32 %v1191_v34, %v1191_v34  ;;  %1396 = vst.msk [vmem:[%s2467_s12 + $0x58] sm:$0xff] %vm778_vm6, %v1191_v34  ;;  %v930_v49 = vpop.f32.mrf.mxu0  ;;  %v1035_v4 = vpop.f32.mrf.mxu1 }
 0x172   : > { %v1234_v48 = vadd.f32 %v1233_v32, %v1232_v0  ;;  %v1031_v41 = vadd.f32 %v1030_v44, %v930_v49  ;;  %v1066_v49 = vadd.f32 %v2559_v27, %v2500_v28 }
 0x173   : > { %v1336_v36 = vsel %vm778_vm6, %v1294_v1, 0.0 }
 0x174   : > { %v1337_v40 = vadd.f32 %v1336_v36, %v1335_v19 }
 0x176   : > { %v1130_v33 = vpop.f32.mrf.mxu2 }
 0x177   : > { %v2565_v62 = vpop.f32.mrf.mxu3  ;;  %v1192_v14 = vadd.f32 %v1130_v33, %v1031_v41 }
 0x178   : > { %v1068_v33 = vadd.f32 %v2565_v62, %v2510_v18 }
 0x179   : > { %v1235_v6 = vsel %vm778_vm6, %v1192_v14, 0.0  ;;  %v1295_v54 = vmul.f32 %v1192_v14, %v1192_v14  ;;  %1397 = vst.msk [vmem:[%s2467_s12 + $0x60] sm:$0xff] %vm778_vm6, %v1192_v14  ;;  %v932_v56 = vpop.f32.mrf.mxu0  ;;  %v1037_v57 = vpop.f32.mrf.mxu1 }
 0x17a   : > { %v2570_v12 = vadd.f32 %v1235_v6, %v1234_v48  ;;  %v1033_v45 = vadd.f32 %v1032_v30, %v932_v56 }
 0x17b   : > { %v1338_v42 = vsel %vm778_vm6, %v1295_v54, 0.0 }
 0x17c   : > { %v2573_v15 = vadd.f32 %v1338_v42, %v1337_v40 }
 0x17e   : > { %v1132_v59 = vpop.f32.mrf.mxu2 }
 0x17f   : > { %v2575_v47 = vpop.f32.mrf.mxu3  ;;  %v2577_v9 = vadd.f32 %v1132_v59, %v1033_v45 }
 0x181   : > { %1398 = vst.msk [vmem:[%s2467_s12 + $0x68] sm:$0xff] %vm778_vm6, %v2577_v9  ;;  %v935_v60 = vpop.f32.mrf.mxu0  ;;  %v1040_v8 = vpop.f32.mrf.mxu1  ;;  %v1296_v56 = vmul.f32 %v2577_v9, %v2577_v9 }
 0x182   : > { %v1036_v7 = vadd.f32 %v1035_v4, %v935_v60 }
 0x183   : > { %v1340_v18 = vsel %vm778_vm6, %v1296_v56, 0.0 }
 0x186   : > { %v1135_v37 = vpop.f32.mrf.mxu2 }
 0x187   : > { %v2582_v51 = vpop.f32.mrf.mxu3  ;;  %v1194_v52 = vadd.f32 %v1135_v37, %v1036_v7  ;;  %v1071_v7 = vadd.f32 %v2575_v47, %v2518_v29 }
 0x189   : > { %1399 = vst.msk [vmem:[%s2467_s12 + $0x70] sm:$0xff] %vm778_vm6, %v1194_v52  ;;  %v937_v31 = vpop.f32.mrf.mxu0  ;;  %v1042_v26 = vpop.f32.mrf.mxu1  ;;  %v1297_v45 = vmul.f32 %v1194_v52, %v1194_v52  ;;  %v1239_v62 = vsel %vm778_vm6, %v1194_v52, 0.0 }
 0x18a   : > { %v1038_v38 = vadd.f32 %v1037_v57, %v937_v31  ;;  %v1237_v57 = vsel %vm778_vm6, %v2577_v9, 0.0 }
 0x18b   : > { %v1342_v31 = vsel %vm778_vm6, %v1297_v45, 0.0 }
 0x18e   : > { %v1137_v58 = vpop.f32.mrf.mxu2 }
 0x18f   : > { %v2586_v13 = vpop.f32.mrf.mxu3  ;;  %v1195_v25 = vadd.f32 %v1137_v58, %v1038_v38 }
 0x191   : > { %1400 = vst.msk [vmem:[%s2467_s12 + $0x78] sm:$0xff] %vm778_vm6, %v1195_v25  ;;  %v940_v24 = vpop.f32.mrf.mxu0  ;;  %v1045_v20 = vpop.f32.mrf.mxu1  ;;  %v1298_v59 = vmul.f32 %v1195_v25, %v1195_v25  ;;  %v1241_v38 = vsel %vm778_vm6, %v1195_v25, 0.0 }
 0x192   : > { %v1041_v53 = vadd.f32 %v1040_v8, %v940_v24  ;;  %v1238_v8 = vadd.f32 %v1237_v57, %v2570_v12  ;;  %v1341_v24 = vadd.f32 %v1340_v18, %v2573_v15 }
 0x194   : > { %v1240_v52 = vadd.f32 %v1239_v62, %v1238_v8 }
 0x196   : > { %v1140_v44 = vpop.f32.mrf.mxu2  ;;  %v1242_v25 = vadd.f32 %v1241_v38, %v1240_v52 }
 0x197   : > { %v2590_v5 = vpop.f32.mrf.mxu3  ;;  %v1196_v10 = vadd.f32 %v1140_v44, %v1041_v53  ;;  %v1344_v44 = vsel %vm778_vm6, %v1298_v59, 0.0  ;;  %v1076_v59 = vadd.f32 %v2586_v13, %v2535_v63 }
 0x199   : > { %1401 = vst.msk [vmem:[%s2467_s12 + $0x80] sm:$0xff] %vm778_vm6, %v1196_v10  ;;  %v942_v16 = vpop.f32.mrf.mxu0  ;;  %v1047_v17 = vpop.f32.mrf.mxu1  ;;  %v1299_v9 = vmul.f32 %v1196_v10, %v1196_v10  ;;  %v1243_v29 = vsel %vm778_vm6, %v1196_v10, 0.0 }
 0x19a   : > { %v1043_v21 = vadd.f32 %v1042_v26, %v942_v16  ;;  %v1343_v16 = vadd.f32 %v1342_v31, %v1341_v24  ;;  %v1244_v10 = vadd.f32 %v1243_v29, %v1242_v25 }
 0x19b   : > { %v1346_v15 = vsel %vm778_vm6, %v1299_v9, 0.0 }
 0x19e   : > { %v1142_v23 = vpop.f32.mrf.mxu2 }
 0x19f   : > { %v2596_v46 = vadd.f32 %v1142_v23, %v1043_v21  ;;  %v1160_v39 = vpop.f32.mrf.mxu3  ;;  %v1345_v23 = vadd.f32 %v1344_v44, %v1343_v16 }
 0x1a0   : > { %v2598_v30 = vadd.f32 %v1160_v39, %v1061_v22 }
 0x1a1   : > { %1402 = vst.msk [vmem:[%s2467_s12 + $0x88] sm:$0xff] %vm778_vm6, %v2596_v46  ;;  %v945_v0 = vpop.f32.mrf.mxu0  ;;  %v1050_v48 = vpop.f32.mrf.mxu1  ;;  %v1300_v12 = vmul.f32 %v2596_v46, %v2596_v46  ;;  %v1245_v21 = vsel %vm778_vm6, %v2596_v46, 0.0 }
 0x1a2   : > { %1409 = vst.msk [vmem:[%s2467_s12 + $0xc0] sm:$0xff] %vm778_vm6, %v2598_v30  ;;  %v1046_v19 = vadd.f32 %v1045_v20, %v945_v0  ;;  %v1307_v24 = vmul.f32 %v2598_v30, %v2598_v30  ;;  %v1259_v29 = vsel %vm778_vm6, %v2598_v30, 0.0 }
 0x1a3   : > { %v1348_v39 = vsel %vm778_vm6, %v1300_v12, 0.0 }
 0x1a6   : > { %v1145_v2 = vpop.f32.mrf.mxu2 }
 0x1a7   : > { %v1198_v11 = vadd.f32 %v1145_v2, %v1046_v19  ;;  %v1162_v3 = vpop.f32.mrf.mxu3  ;;  %v1347_v2 = vadd.f32 %v1346_v15, %v1345_v23 }
 0x1a8   : > { %v2608_v34 = vadd.f32 %v1162_v3, %v1063_v50  ;;  %v1073_v50 = vadd.f32 %v2582_v51, %v2528_v35  ;;  %v1246_v3 = vadd.f32 %v1245_v21, %v1244_v10 }
 0x1a9   : > { %1403 = vst.msk [vmem:[%s2467_s12 + $0x90] sm:$0xff] %vm778_vm6, %v1198_v11  ;;  %v947_v32 = vpop.f32.mrf.mxu0  ;;  %v1052_v6 = vpop.f32.mrf.mxu1  ;;  %v1301_v22 = vmul.f32 %v1198_v11, %v1198_v11  ;;  %v1247_v0 = vsel %vm778_vm6, %v1198_v11, 0.0 }
 0x1aa   : > { %1410 = vst.msk [vmem:[%s2467_s12 + $0xc8] sm:$0xff] %vm778_vm6, %v2608_v34  ;;  %v1048_v1 = vadd.f32 %v1047_v17, %v947_v32  ;;  %v1308_v12 = vmul.f32 %v2608_v34, %v2608_v34  ;;  %v1261_v15 = vsel %vm778_vm6, %v2608_v34, 0.0 }
 0x1ac   : > { %v1364_v10 = vsel %vm778_vm6, %v1308_v12, 0.0 }
 0x1ae   : > { %v1147_v4 = vpop.f32.mrf.mxu2 }
 0x1af   : > { %v1199_v43 = vadd.f32 %v1147_v4, %v1048_v1  ;;  %v1165_v61 = vpop.f32.mrf.mxu3  ;;  %v1350_v1 = vsel %vm778_vm6, %v1301_v22, 0.0  ;;  %v1078_v22 = vadd.f32 %v2590_v5, %v2541_v55 }
 0x1b0   : > { %v2617_v36 = vadd.f32 %v1165_v61, %v1066_v49  ;;  %v1349_v61 = vadd.f32 %v1348_v39, %v1347_v2 }
 0x1b1   : > { %1404 = vst.msk [vmem:[%s2467_s12 + $0x98] sm:$0xff] %vm778_vm6, %v1199_v43  ;;  %v950_v40 = vpop.f32.mrf.mxu0  ;;  %v1055_v20 = vpop.f32.mrf.mxu1  ;;  %v1302_v17 = vmul.f32 %v1199_v43, %v1199_v43  ;;  %v1249_v46 = vsel %vm778_vm6, %v1199_v43, 0.0 }
 0x1b2   : > { %1411 = vst.msk [vmem:[%s2467_s12 + $0xd0] sm:$0xff] %vm778_vm6, %v2617_v36  ;;  %v1051_v41 = vadd.f32 %v1050_v48, %v950_v40  ;;  %v1248_v40 = vadd.f32 %v1247_v0, %v1246_v3  ;;  %v1351_v51 = vadd.f32 %v1350_v1, %v1349_v61  ;;  %v1309_v21 = vmul.f32 %v2617_v36, %v2617_v36 }
 0x1b3   : > { %v1263_v39 = vsel %vm778_vm6, %v2617_v36, 0.0 }
 0x1b4   : > { %v1366_v2 = vsel %vm778_vm6, %v1309_v21, 0.0 }
 0x1b6   : > { %v1150_v14 = vpop.f32.mrf.mxu2 }
 0x1b7   : > { %v1200_v28 = vadd.f32 %v1150_v14, %v1051_v41  ;;  %v1167_v27 = vpop.f32.mrf.mxu3  ;;  %v1352_v41 = vsel %vm778_vm6, %v1302_v17, 0.0  ;;  %v1250_v14 = vadd.f32 %v1249_v46, %v1248_v40 }
 0x1b8   : > { %v2626_v54 = vadd.f32 %v1167_v27, %v1068_v33 }
 0x1b9   : > { %1405 = vst.msk [vmem:[%s2467_s12 + $0xa0] sm:$0xff] %vm778_vm6, %v1200_v28  ;;  %v952_v42 = vpop.f32.mrf.mxu0  ;;  %v1303_v49 = vmul.f32 %v1200_v28, %v1200_v28  ;;  %v1251_v33 = vsel %vm778_vm6, %v1200_v28, 0.0  ;;  %v1057_v45 = vpop.f32.mrf.mxu1 }
 0x1ba   : > { %1412 = vst.msk [vmem:[%s2467_s12 + $0xd8] sm:$0xff] %vm778_vm6, %v2626_v54  ;;  %v1053_v60 = vadd.f32 %v1052_v6, %v952_v42  ;;  %v1353_v42 = vadd.f32 %v1352_v41, %v1351_v51  ;;  %v1252_v57 = vadd.f32 %v1251_v33, %v1250_v14  ;;  %v1310_v0 = vmul.f32 %v2626_v54, %v2626_v54 }
 0x1bb   : > { %v1354_v27 = vsel %vm778_vm6, %v1303_v49, 0.0  ;;  %v1265_v3 = vsel %vm778_vm6, %v2626_v54, 0.0 }
 0x1bc   : > { %v1368_v36 = vsel %vm778_vm6, %v1310_v0, 0.0 }
 0x1be   : > { %v1152_v37 = vpop.f32.mrf.mxu2 }
 0x1bf   : > { %v1201_v58 = vadd.f32 %v1152_v37, %v1053_v60  ;;  %v1170_v26 = vpop.f32.mrf.mxu3  ;;  %v1355_v60 = vadd.f32 %v1354_v27, %v1353_v42 }
 0x1c0   : > { %v2645_v53 = vadd.f32 %v1170_v26, %v1071_v7 }
 0x1c1   : > { %1406 = vst.msk [vmem:[%s2467_s12 + $0xa8] sm:$0xff] %vm778_vm6, %v1201_v58  ;;  %v955_v47 = vpop.f32.mrf.mxu0  ;;  %v1304_v35 = vmul.f32 %v1201_v58, %v1201_v58  ;;  %v1253_v6 = vsel %vm778_vm6, %v1201_v58, 0.0 }
 0x1c2   : > { %1413 = vst.msk [vmem:[%s2467_s12 + $0xe0] sm:$0xff] %vm778_vm6, %v2645_v53  ;;  %v1056_v19 = vadd.f32 %v1055_v20, %v955_v47  ;;  %v1254_v7 = vadd.f32 %v1253_v6, %v1252_v57  ;;  %v1362_v20 = vsel %vm778_vm6, %v1307_v24, 0.0  ;;  %v1311_v55 = vmul.f32 %v2645_v53, %v2645_v53 }
 0x1c3   : > { %v1356_v18 = vsel %vm778_vm6, %v1304_v35, 0.0  ;;  %v1267_v1 = vsel %vm778_vm6, %v2645_v53, 0.0 }
 0x1c4   : > { %v1357_v9 = vadd.f32 %v1356_v18, %v1355_v60 }
 0x1c6   : > { %v1155_v32 = vpop.f32.mrf.mxu2 }
 0x1c7   : > { %v1202_v48 = vadd.f32 %v1155_v32, %v1056_v19  ;;  %v1172_v4 = vpop.f32.mrf.mxu3 }
 0x1c8   : > { %v2665_v11 = vadd.f32 %v1172_v4, %v1073_v50  ;;  %v1370_v4 = vsel %vm778_vm6, %v1311_v55, 0.0 }
 0x1c9   : > { %1407 = vst.msk [vmem:[%s2467_s12 + $0xb0] sm:$0xff] %vm778_vm6, %v1202_v48  ;;  %v957_v43 = vpop.f32.mrf.mxu0  ;;  %v1305_v56 = vmul.f32 %v1202_v48, %v1202_v48  ;;  %v1255_v28 = vsel %vm778_vm6, %v1202_v48, 0.0 }
 0x1ca   : > { %1414 = vst.msk [vmem:[%s2467_s12 + $0xe8] sm:$0xff] %vm778_vm6, %v2665_v11  ;;  %v1058_v62 = vadd.f32 %v1057_v45, %v957_v43  ;;  %v1256_v58 = vadd.f32 %v1255_v28, %v1254_v7  ;;  %v1312_v46 = vmul.f32 %v2665_v11, %v2665_v11  ;;  %v1269_v54 = vsel %vm778_vm6, %v2665_v11, 0.0 }
 0x1cb   : > { %v1358_v37 = vsel %vm778_vm6, %v1305_v56, 0.0 }
 0x1cc   : > { %v1359_v63 = vadd.f32 %v1358_v37, %v1357_v9  ;;  %v1372_v33 = vsel %vm778_vm6, %v1312_v46, 0.0 }
 0x1ce   : > { %v1157_v8 = vpop.f32.mrf.mxu2 }
 0x1cf   : > { %v1203_v31 = vadd.f32 %v1157_v8, %v1058_v62  ;;  %v1175_v38 = vpop.f32.mrf.mxu3 }
 0x1d0   : > { %v1210_v26 = vadd.f32 %v1175_v38, %v1076_v59 }
 0x1d1   : > { %v1257_v52 = vsel %vm778_vm6, %v1203_v31, 0.0  ;;  %v1306_v44 = vmul.f32 %v1203_v31, %v1203_v31  ;;  %1408 = vst.msk [vmem:[%s2467_s12 + $0xb8] sm:$0xff] %vm778_vm6, %v1203_v31 }
 0x1d2   : > { %v1258_v13 = vadd.f32 %v1257_v52, %v1256_v58  ;;  %1415 = vst.msk [vmem:[%s2467_s12 + $0xf0] sm:$0xff] %vm778_vm6, %v1210_v26  ;;  %v1313_v61 = vmul.f32 %v1210_v26, %v1210_v26  ;;  %v1271_v35 = vsel %vm778_vm6, %v1210_v26, 0.0 }
 0x1d3   : > { %v1360_v47 = vsel %vm778_vm6, %v1306_v44, 0.0 }
 0x1d4   : > { %v1260_v16 = vadd.f32 %v1259_v29, %v1258_v13  ;;  %v1361_v25 = vadd.f32 %v1360_v47, %v1359_v63  ;;  %v1374_v43 = vsel %vm778_vm6, %v1313_v61, 0.0 }
 0x1d6   : > { %v1262_v30 = vadd.f32 %v1261_v15, %v1260_v16  ;;  %v1363_v23 = vadd.f32 %v1362_v20, %v1361_v25 }
 0x1d7   : > { %v1177_v17 = vpop.f32.mrf.mxu3 }
 0x1d8   : > { %v1264_v19 = vadd.f32 %v1263_v39, %v1262_v30  ;;  %v1365_v34 = vadd.f32 %v1364_v10, %v1363_v23  ;;  %v1211_v50 = vadd.f32 %v1177_v17, %v1078_v22 }
 0x1da   : > { %v1367_v5 = vadd.f32 %v1366_v2, %v1365_v34  ;;  %v1266_v32 = vadd.f32 %v1265_v3, %v1264_v19  ;;  %1416 = vst.msk [vmem:[%s2467_s12 + $0xf8] sm:$0xff] %vm778_vm6, %v1211_v50  ;;  %v1314_v51 = vmul.f32 %v1211_v50, %v1211_v50  ;;  %v1273_v27 = vsel %vm778_vm6, %v1211_v50, 0.0 }
 0x1dc   : > { %v1268_v49 = vadd.f32 %v1267_v1, %v1266_v32  ;;  %v1369_v48 = vadd.f32 %v1368_v36, %v1367_v5  ;;  %v1376_v11 = vsel %vm778_vm6, %v1314_v51, 0.0 }
 0x1de   : > { %v1270_v40 = vadd.f32 %v1269_v54, %v1268_v49  ;;  %v1371_v41 = vadd.f32 %v1370_v4, %v1369_v48 }
 0x1e0   : > { %v1272_v14 = vadd.f32 %v1271_v35, %v1270_v40  ;;  %v1373_v53 = vadd.f32 %v1372_v33, %v1371_v41 }
 0x1e2   : > { %v1375_v6 = vadd.f32 %v1374_v43, %v1373_v53  ;;  %v1274_v56 = vadd.f32 %v1273_v27, %v1272_v14 }
 0x1e4   : > { %v1275_v42 = vrot.slane %v1274_v56, 4  ;;  %v1377_v57 = vadd.f32 %v1376_v11, %v1375_v6 }
 0x1e6   : > { %v1276_v45 = vadd.f32 %v1275_v42, %v1274_v56  ;;  %v1378_v18 = vrot.slane %v1377_v57, 4 }
 0x1e8   : > { %v1277_v28 = vrot.slane %v1276_v45, 2  ;;  %v1379_v62 = vadd.f32 %v1378_v18, %v1377_v57 }
 0x1ea   : > { %v1278_v59 = vadd.f32 %v1277_v28, %v1276_v45  ;;  %v1380_v60 = vrot.slane %v1379_v62, 2 }
 0x1ec   : > { %v1279_v7 = vrot.slane %v1278_v59, 1  ;;  %v1381_v8 = vadd.f32 %v1380_v60, %v1379_v62 }
 0x1ee   : > { %v1280_v37 = vadd.f32 %v1279_v7, %v1278_v59  ;;  %v1382_v31 = vrot.slane %v1381_v8, 1 }
 0x1f0   : > { %1282 = vst.msk [vmem:[%s211_s17] sm:$0x1] %vm1281_vm8, %v1280_v37  ;;  %v1383_v38 = vadd.f32 %v1382_v31, %v1381_v8 }
 0x1f2   : > { %1384 = vst.msk [vmem:[%s214_s20] sm:$0x1] %vm1281_vm8, %v1383_v38 }
 0x1f3 PF: > { %s15_s15 = sadd.s32 1, %s1859_s15  }
 0x1f4   : > { %p12_p4 = scmp.ge.s32.totalorder %s15_s15, 4  }
 0x1f6   :  { %14 = sbr.rel (!%p12_p4) target bundleno = 1 (0x1), region = 84 }

// kernel: up_forward.4
= control target key start
LH: loop header
LB: loop body
LE: loop exit
PB: predicated region body
PF: predicated region fallthrough
CT: control target
= control target key end

     0   :  { %s1968_s21 = smov 0   ;;  %s2916_s0 = inlined_call_operand.vmem [shape: f32[2,16,16,8], index: 0, kind: input, shape index: {}]   ;;  %s2917_s1 = inlined_call_operand.vmem [shape: f32[1,8], index: 1, kind: input, shape index: {}]   ;;  %s2918_s2 = inlined_call_operand.vmem [shape: f32[1,8], index: 2, kind: input, shape index: {}]   ;;  %s2919_s3 = inlined_call_operand.vmem [shape: bf16[3,24,8], index: 3, kind: input, shape index: {}]   ;;  %s2920_s4 = inlined_call_operand.vmem [shape: f32[2,16,16,8], index: 4, kind: output, shape index: {0}]   ;;  %s2921_s5 = inlined_call_operand.vmem [shape: f32[2,1,8], index: 5, kind: output, shape index: {1}]   ;;  %s2922_s6 = inlined_call_operand.vmem [shape: f32[2,1,8], index: 6, kind: output, shape index: {2}]  }
   0x1 LB: > { %s1663_s22 = sadd.s32 4294967295, %s1928_s21   ;;  %p1667_p0 = scmp.ge.s32.totalorder %s1928_s21, 1  ;;  %s1928_s21 = sphi %s1968_s21, %s17_s21  }
   0x2   : > { %p217_p1 = scmp.lt.s32.totalorder %s1928_s21, 3 }
   0x4   : > { %p218_p2 = pnand %p1667_p0, %p217_p1 }
   0x5   : > { %p253_p3 = scmp.lt.s32.totalorder (!%p218_p2), %s1663_s22, 1  ;;  %s1930_s7 = smov (!%p218_p2), 8  }
   0x6   : > { %221 = sbr.rel (%p218_p2) target bundleno = 503 (0x1f7), region = 36  ;;  %s1931_s8 = smov (!%p218_p2), 16  }
   0xb   : > { %v406_v0 = vlaneseq  ;;  %s2924_s22 = smov (!%p253_p3, %s1663_s22), 1  ;;  %v1981_v1 = vld [vmem:[%s2917_s1] ss:$0 sm:$0xff]  ;;  %vm1019_vm2 = vcmask 1043456   ;;  %vm871_vm5 = vcmask 64512   ;;  %vm904_vm6 = vcmask 130048  }
   0xc   : > { %s1738_s25 = sshll.u32 %s2924_s22, 8  ;;  %v1996_v3 = vld [vmem:[%s2918_s2] ss:$0 sm:$0xff]  ;;  %vm970_vm7 = vcmask 195584   ;;  %vm1422_vm8 = vcmask 57344  }
   0xd   : > { %v1984_v2 = vshrl.u32 %v406_v0, 7  ;;  %s1991_s28 = scalar_lea.vmem %s2916_s0, %s1738_s25  ;;  %s2647_s26 = scalar_lea.vmem %s2920_s4, %s1738_s25 }
   0xe   : > { %v272_v4 = vld [vmem:[%s1991_s28 + $0x10] sm:$0xff]  ;;  %v273_v5 = vld [vmem:[%s1991_s28 + $0x18] sm:$0xff]  ;;  %v270_v6 = vld [vmem:[%s1991_s28] sm:$0xff] }
   0xf   : > { %v308_v7 = vmul.f32 %v1981_v1, %v272_v4  ;;  %v309_v8 = vmul.f32 %v1981_v1, %v273_v5  ;;  %v271_v9 = vld [vmem:[%s1991_s28 + $0x8] sm:$0xff]  ;;  %v306_v10 = vmul.f32 %v1981_v1, %v270_v6  ;;  %v274_v11 = vld [vmem:[%s1991_s28 + $0x20] sm:$0xff]  ;;  %v2009_v14 = vadd.s32 8, %v1984_v2  ;;  %v276_v50 = vld [vmem:[%s1991_s28 + $0x30] sm:$0xff] }
  0x10   : > { %v275_v12 = vld [vmem:[%s1991_s28 + $0x28] sm:$0xff]  ;;  %v307_v13 = vmul.f32 %v1981_v1, %v271_v9  ;;  %v310_v15 = vmul.f32 %v1981_v1, %v274_v11  ;;  %v294_v17 = vld [vmem:[%s1991_s28 + $0xc0] sm:$0xff]  ;;  %vm546_vm0 = vcmp.lt.s32.totalorder %v1984_v2, 7  ;;  %v296_v53 = vld [vmem:[%s1991_s28 + $0xd0] sm:$0xff]  ;;  %v312_v60 = vmul.f32 %v1981_v1, %v276_v50 }
  0x11   : > { %v311_v16 = vmul.f32 %v1981_v1, %v275_v12  ;;  %v295_v18 = vld [vmem:[%s1991_s28 + $0xc8] sm:$0xff]  ;;  %v344_v19 = vadd.f32 %v1996_v3, %v308_v7  ;;  %v345_v20 = vadd.f32 %v1996_v3, %v309_v8  ;;  %v342_v21 = vadd.f32 %v1996_v3, %v306_v10  ;;  %v297_v54 = vld [vmem:[%s1991_s28 + $0xd8] sm:$0xff]  ;;  %v300_v50 = vld [vmem:[%s1991_s28 + $0xf0] sm:$0xff] }
  0x12   : > { %v330_v22 = vmul.f32 %v1981_v1, %v294_v17  ;;  %v343_v23 = vadd.f32 %v1996_v3, %v307_v13  ;;  %v346_v24 = vadd.f32 %v1996_v3, %v310_v15  ;;  %v331_v26 = vmul.f32 %v1981_v1, %v295_v18  ;;  %v277_v55 = vld [vmem:[%s1991_s28 + $0x38] sm:$0xff]  ;;  %v278_v17 = vld [vmem:[%s1991_s28 + $0x40] sm:$0xff] }
  0x13   : > { %v347_v25 = vadd.f32 %v1996_v3, %v311_v16  ;;  %v2023_v27 = vmax.f32 %v344_v19, 0.0  ;;  %v2025_v28 = vmax.f32 %v345_v20, 0.0  ;;  %v2027_v29 = vmax.f32 %v342_v21, 0.0  ;;  %v298_v18 = vld [vmem:[%s1991_s28 + $0xe0] sm:$0xff]  ;;  %v299_v19 = vld [vmem:[%s1991_s28 + $0xe8] sm:$0xff] }
  0x14   : > { %v2029_v30 = vmax.f32 %v343_v23, 0.0  ;;  %v2031_v31 = vmax.f32 %v346_v24, 0.0  ;;  %v366_v32 = vadd.f32 %v1996_v3, %v330_v22  ;;  %v367_v33 = vadd.f32 %v1996_v3, %v331_v26  ;;  %v279_v21 = vld [vmem:[%s1991_s28 + $0x48] sm:$0xff] }
  0x15   : > { %v1760_v34 = vpack.i.bf16 %v2025_v28, %v2023_v27  ;;  %v2038_v35 = vmax.f32 %v347_v25, 0.0  ;;  %vm513_vm1 = vcmp.le.s32.totalorder %v2009_v14, 14  ;;  %v515_v37 = vrot.slane %v2023_v27, 1 }
  0x16   : > { %v1770_v36 = vpack.i.bf16 %v2029_v30, %v2027_v29  ;;  %v531_v38 = vrot.slane %v2025_v28, 1  ;;  %v514_v39 = vrot.slane %v2027_v29, 1  ;;  %v530_v40 = vrot.slane %v2029_v30, 1 }
  0x17   : > { %1761 = vrot.lane.b32.xlu0 %v1760_v34, %s1930_s7  ;;  %v516_v41 = vrot.slane %v2031_v31, 1  ;;  %v2054_v44 = vmax.f32 %v366_v32, 0.0  ;;  %v2056_v45 = vmax.f32 %v367_v33, 0.0  ;;  %v532_v49 = vrot.slane %v2038_v35, 1 }
  0x18   : > { %1771 = vrot.lane.b32.xlu1 %v1770_v36, %s1930_s7  ;;  %v548_v42 = vsel %vm546_vm0, %v515_v37, %v531_v38  ;;  %v564_v43 = vsel %vm546_vm0, %v531_v38, %v515_v37  ;;  %v547_v47 = vsel %vm546_vm0, %v514_v39, %v530_v40  ;;  %v563_v48 = vsel %vm546_vm0, %v530_v40, %v514_v39 }
  0x19   : > { %v586_v46 = vsel %vm513_vm1, %v564_v43, 0.0  ;;  %v584_v51 = vsel %vm513_vm1, %v563_v48, 0.0  ;;  %v526_v52 = vrot.slane %v2054_v44, 1  ;;  %v542_v57 = vrot.slane %v2056_v45, 1 }
  0x1a   : > { %v1765_v56 = vpack.i.bf16 %v586_v46, %v548_v42  ;;  %v1780_v58 = vpack.i.bf16 %v2038_v35, %v2031_v31  ;;  %v1775_v59 = vpack.i.bf16 %v584_v51, %v547_v47  ;;  %v565_v61 = vsel %vm546_vm0, %v532_v49, %v516_v41  ;;  %v301_v51 = vld [vmem:[%s1991_s28 + $0xf8] sm:$0xff] }
  0x1b   : > { %v332_v62 = vmul.f32 %v1981_v1, %v296_v53  ;;  %v333_v63 = vmul.f32 %v1981_v1, %v297_v54  ;;  %v313_v0 = vmul.f32 %v1981_v1, %v277_v55  ;;  %v575_v4 = vsel %vm546_vm0, %v542_v57, %v526_v52 }
  0x1c   : > { %1781 = vrot.lane.b32.xlu2 %v1780_v58, %s1930_s7  ;;  %v348_v5 = vadd.f32 %v1996_v3, %v312_v60  ;;  %v549_v6 = vsel %vm546_vm0, %v516_v41, %v532_v49  ;;  %v588_v8 = vsel %vm513_vm1, %v565_v61, 0.0  ;;  %v559_v9 = vsel %vm546_vm0, %v526_v52, %v542_v57  ;;  %v280_v49 = vld [vmem:[%s1991_s28 + $0x50] sm:$0xff]  ;;  %v281_v58 = vld [vmem:[%s1991_s28 + $0x58] sm:$0xff] }
  0x1d   : > { %v349_v7 = vadd.f32 %v1996_v3, %v313_v0  ;;  %v1785_v11 = vpack.i.bf16 %v2056_v45, %v2054_v44  ;;  %v608_v12 = vsel %vm513_vm1, %v575_v4, 0.0  ;;  %v368_v13 = vadd.f32 %v1996_v3, %v332_v62 }
  0x1e   : > { %v2094_v10 = vmax.f32 %v348_v5, 0.0  ;;  %v369_v15 = vadd.f32 %v1996_v3, %v333_v63  ;;  %v1790_v22 = vpack.i.bf16 %v588_v8, %v549_v6  ;;  %v1795_v24 = vpack.i.bf16 %v608_v12, %v559_v9 }
  0x1f   : > { %1766 = vrot.lane.b32.xlu0 %v1765_v56, %s1931_s8  ;;  %v2102_v16 = vmax.f32 %v349_v7, 0.0  ;;  %v314_v25 = vmul.f32 %v1981_v1, %v278_v17  ;;  %v334_v26 = vmul.f32 %v1981_v1, %v298_v18  ;;  %v335_v32 = vmul.f32 %v1981_v1, %v299_v19  ;;  %v282_v19 = vld [vmem:[%s1991_s28 + $0x60] sm:$0xff] }
  0x20   : > { %1776 = vrot.lane.b32.xlu1 %v1775_v59, %s1931_s8  ;;  %v517_v20 = vrot.slane %v2094_v10, 1  ;;  %v2113_v33 = vmax.f32 %v368_v13, 0.0  ;;  %v2115_v34 = vmax.f32 %v369_v15, 0.0  ;;  %v315_v36 = vmul.f32 %v1981_v1, %v279_v21 }
  0x21   : > { %v533_v23 = vrot.slane %v2102_v16, 1  ;;  %v350_v40 = vadd.f32 %v1996_v3, %v314_v25  ;;  %v370_v41 = vadd.f32 %v1996_v3, %v334_v26  ;;  %v371_v42 = vadd.f32 %v1996_v3, %v335_v32 }
  0x22   : > { %v527_v38 = vrot.slane %v2113_v33, 1  ;;  %v543_v39 = vrot.slane %v2115_v34, 1  ;;  %v351_v47 = vadd.f32 %v1996_v3, %v315_v36  ;;  %v1800_v48 = vpack.i.bf16 %v2102_v16, %v2094_v10 }
  0x23   : > { %v566_v37 = vsel %vm546_vm0, %v533_v23, %v517_v20  ;;  %v550_v43 = vsel %vm546_vm0, %v517_v20, %v533_v23  ;;  %v1805_v52 = vpack.i.bf16 %v2115_v34, %v2113_v33  ;;  %v2142_v55 = vmax.f32 %v350_v40, 0.0  ;;  %v283_v20 = vld [vmem:[%s1991_s28 + $0x68] sm:$0xff] }
  0x24   : > { %1786 = vrot.lane.b32.xlu2 %v1785_v11, %s1930_s7  ;;  %v590_v46 = vsel %vm513_vm1, %v566_v37, 0.0  ;;  %v576_v53 = vsel %vm546_vm0, %v543_v39, %v527_v38  ;;  %v2144_v56 = vmax.f32 %v370_v41, 0.0  ;;  %v2146_v57 = vmax.f32 %v371_v42, 0.0  ;;  %v955_v42 = vld [vmem:[%s2919_s3 + $0x8] sm:$0xf] }
  0x25   : > { %v1810_v54 = vpack.i.bf16 %v590_v46, %v550_v43  ;;  %v2149_v59 = vmax.f32 %v351_v47, 0.0  ;;  %v316_v60 = vmul.f32 %v1981_v1, %v280_v49  ;;  %v336_v61 = vmul.f32 %v1981_v1, %v300_v50  ;;  %v292_v49 = vld [vmem:[%s1991_s28 + $0xb0] sm:$0xff]  ;;  %v293_v50 = vld [vmem:[%s1991_s28 + $0xb8] sm:$0xff] }
  0x26   : > { %v337_v62 = vmul.f32 %v1981_v1, %v301_v51  ;;  %v560_v63 = vsel %vm546_vm0, %v527_v38, %v543_v39  ;;  %v610_v0 = vsel %vm513_vm1, %v576_v53, 0.0  ;;  %v317_v4 = vmul.f32 %v1981_v1, %v281_v58  ;;  %v285_v58 = vld [vmem:[%s1991_s28 + $0x78] sm:$0xff] }
  0x27   : > { %1791 = vrot.lane.b32.xlu0 %v1790_v22, %s1931_s8  ;;  %v518_v5 = vrot.slane %v2142_v55, 1  ;;  %v534_v6 = vrot.slane %v2149_v59, 1  ;;  %v528_v7 = vrot.slane %v2144_v56, 1  ;;  %v544_v8 = vrot.slane %v2146_v57, 1 }
  0x28   : > { %1796 = vrot.lane.b32.xlu1 %v1795_v24, %s1931_s8  ;;  %v1815_v9 = vpack.i.bf16 %v610_v0, %v560_v63  ;;  %v352_v11 = vadd.f32 %v1996_v3, %v316_v60  ;;  %v372_v12 = vadd.f32 %v1996_v3, %v336_v61  ;;  %v373_v13 = vadd.f32 %v1996_v3, %v337_v62 }
  0x29   : > { %v1820_v15 = vpack.i.bf16 %v2149_v59, %v2142_v55  ;;  %v353_v17 = vadd.f32 %v1996_v3, %v317_v4  ;;  %v567_v18 = vsel %vm546_vm0, %v534_v6, %v518_v5  ;;  %v1825_v21 = vpack.i.bf16 %v2146_v57, %v2144_v56 }
  0x2a   : > { %v577_v22 = vsel %vm546_vm0, %v544_v8, %v528_v7  ;;  %v2181_v23 = vmax.f32 %v352_v11, 0.0  ;;  %v2183_v24 = vmax.f32 %v372_v12, 0.0  ;;  %v2185_v25 = vmax.f32 %v373_v13, 0.0 }
  0x2b   : > { %v551_v26 = vsel %vm546_vm0, %v518_v5, %v534_v6  ;;  %v592_v32 = vsel %vm513_vm1, %v567_v18, 0.0  ;;  %v318_v36 = vmul.f32 %v1981_v1, %v282_v19  ;;  %v319_v37 = vmul.f32 %v1981_v1, %v283_v20 }
  0x2c   : > { %1801 = vrot.lane.b32.xlu2 %v1800_v48, %s1930_s7  ;;  %v2194_v38 = vmax.f32 %v353_v17, 0.0  ;;  %v561_v39 = vsel %vm546_vm0, %v528_v7, %v544_v8  ;;  %v612_v40 = vsel %vm513_vm1, %v577_v22, 0.0  ;;  %v519_v41 = vrot.slane %v2181_v23, 1  ;;  %v2243_v17 = vld [vmem:[%s2919_s3] sm:$0xff] }
  0x2d   : > { %v529_v43 = vrot.slane %v2183_v24, 1  ;;  %v545_v46 = vrot.slane %v2185_v25, 1  ;;  %v1830_v48 = vpack.i.bf16 %v592_v32, %v551_v26  ;;  %v354_v51 = vadd.f32 %v1996_v3, %v318_v36 }
  0x2e   : > { %v535_v47 = vrot.slane %v2194_v38, 1  ;;  %v1835_v53 = vpack.i.bf16 %v612_v40, %v561_v39  ;;  %v1117_v60 = vunpack.c.l.b16 %v955_v42  ;;  %v1840_v61 = vpack.i.bf16 %v2194_v38, %v2181_v23 }
  0x2f   : > { %1806 = vrot.lane.b32.xlu0 %v1805_v52, %s1930_s7  ;;  %v355_v52 = vadd.f32 %v1996_v3, %v319_v37  ;;  %v328_v62 = vmul.f32 %v1981_v1, %v292_v49  ;;  %v578_v63 = vsel %vm546_vm0, %v545_v46, %v529_v43  ;;  %v329_v4 = vmul.f32 %v1981_v1, %v293_v50 }
  0x30   : > { %1811 = vrot.lane.b32.xlu1 %v1810_v54, %s1931_s8  ;;  %v284_v54 = vld [vmem:[%s1991_s28 + $0x70] sm:$0xff]  ;;  %v568_v0 = vsel %vm546_vm0, %v535_v47, %v519_v41  ;;  %v1119_v5 = vpack.c.b16 %v1117_v60, %v1117_v60  ;;  %v2223_v6 = vmax.f32 %v354_v51, 0.0  ;;  %v552_v12 = vsel %vm546_vm0, %v519_v41, %v535_v47 }
  0x31   : > { %v2225_v7 = vmax.f32 %v355_v52, 0.0  ;;  %v320_v8 = vmul.f32 %v1981_v1, %v284_v54  ;;  %v594_v13 = vsel %vm513_vm1, %v568_v0, 0.0  ;;  %v562_v18 = vsel %vm546_vm0, %v529_v43, %v545_v46 }
  0x32   : > { %v2231_v11 = vsel %vm1019_vm2, %v1119_v5, 0  ;;  %v614_v19 = vsel %vm513_vm1, %v578_v63, 0.0  ;;  %v365_v20 = vadd.f32 %v1996_v3, %v329_v4  ;;  %v520_v22 = vrot.slane %v2223_v6, 1 }
  0x33   : > { %1133 = vmatpush.bf16.msra.mxu1 %v2231_v11  ;;  %v536_v26 = vrot.slane %v2225_v7, 1  ;;  %v356_v32 = vadd.f32 %v1996_v3, %v320_v8  ;;  %v1850_v37 = vpack.i.bf16 %v594_v13, %v552_v12  ;;  %v1855_v39 = vpack.i.bf16 %v614_v19, %v562_v18  ;;  %v286_v13 = vld [vmem:[%s1991_s28 + $0x80] sm:$0xff] }
  0x34   : > { %1816 = vrot.lane.b32.xlu2 %v1815_v9, %s1931_s8  ;;  %v321_v9 = vmul.f32 %v1981_v1, %v285_v58  ;;  %v2259_v41 = vmax.f32 %v365_v20, 0.0  ;;  %v1932_v49 = vmov 0.0|0.0   ;;  %v1860_v52 = vpack.i.bf16 %v2225_v7, %v2223_v6 }
  0x35   : > { %v569_v42 = vsel %vm546_vm0, %v536_v26, %v520_v22  ;;  %v2264_v43 = vmax.f32 %v356_v32, 0.0  ;;  %v553_v50 = vsel %vm546_vm0, %v520_v22, %v536_v26  ;;  %v322_v18 = vmul.f32 %v1981_v1, %v286_v13 }
  0x36   : > { %v357_v36 = vadd.f32 %v1996_v3, %v321_v9  ;;  %v596_v51 = vsel %vm513_vm1, %v569_v42, 0.0  ;;  %v428_v20 = vrot.slane %v2025_v28, 7  ;;  %vm443_vm3 = vcmp.lt.s32.totalorder %v1984_v2, 1 }
  0x37   : > { %1821 = vrot.lane.b32.xlu0 %v1820_v15, %s1930_s7  ;;  %v364_v15 = vadd.f32 %v1996_v3, %v328_v62  ;;  %1134 = vmatpush.bf16.msra.mxu1 %v2243_v17  ;;  %v358_v22 = vadd.f32 %v1996_v3, %v322_v18  ;;  %v427_v32 = vrot.slane %v2029_v30, 7  ;;  %v1674_v30 = vld [vmem:[%s2919_s3 + $0x14] sm:$0xf]  ;;  %vm409_vm4 = vcmp.ge.s32.totalorder %v1984_v2, 1 }
  0x38   : > { %1826 = vrot.lane.b32.xlu1 %v1825_v21, %s1930_s7  ;;  %v1845_v21 = vpack.i.bf16 %v2185_v25, %v2183_v24  ;;  %v2266_v46 = vmax.f32 %v357_v36, 0.0  ;;  %v411_v36 = vrot.slane %v2027_v29, 7  ;;  %v1716_v29 = vld [vmem:[%s2919_s3 + $0x20] sm:$0xf] }
  0x39   : > { %v2257_v40 = vmax.f32 %v364_v15, 0.0  ;;  %v287_v15 = vld [vmem:[%s1991_s28 + $0x88] sm:$0xff] }
  0x3a   : > { %1135 = vmatmul.bf16.vlgmr.msra.gmra.mxu1 %v1932_v49  ;;  %v537_v54 = vrot.slane %v2266_v46, 1  ;;  %v1880_v9 = vpack.i.bf16 %v2266_v46, %v2264_v43  ;;  %v323_v19 = vmul.f32 %v1981_v1, %v287_v15 }
  0x3b   : > { %v525_v47 = vrot.slane %v2257_v40, 1  ;;  %v1865_v58 = vpack.i.bf16 %v2259_v41, %v2257_v40 }
  0x3c   : > { %1831 = vrot.lane.b32.xlu2 %v1830_v48, %s1931_s8  ;;  %v541_v48 = vrot.slane %v2259_v41, 1  ;;  %v359_v26 = vadd.f32 %v1996_v3, %v323_v19 }
  0x3e   : > { %v574_v60 = vsel %vm546_vm0, %v541_v48, %v525_v47  ;;  %v558_v62 = vsel %vm546_vm0, %v525_v47, %v541_v48  ;;  %v2334_v48 = vsel %vm443_vm3, %v411_v36, %v427_v32 }
  0x3f   : > { %1836 = vrot.lane.b32.xlu0 %v1835_v53, %s1931_s8  ;;  %v521_v53 = vrot.slane %v2264_v43, 1  ;;  %v606_v63 = vsel %vm513_vm1, %v574_v60, 0.0 }
  0x40   : > { %1841 = vrot.lane.b32.xlu1 %v1840_v61, %s1930_s7  ;;  %v1870_v61 = vpack.i.bf16 %v596_v51, %v553_v50  ;;  %v1875_v4 = vpack.i.bf16 %v606_v63, %v558_v62  ;;  %v460_v50 = vsel %vm443_vm3, %v427_v32, %v411_v36 }
  0x41   : > { %v570_v0 = vsel %vm546_vm0, %v537_v54, %v521_v53  ;;  %v554_v5 = vsel %vm546_vm0, %v521_v53, %v537_v54 }
  0x42   : > { %v598_v8 = vsel %vm513_vm1, %v570_v0, 0.0 }
  0x43   : > { %v1885_v12 = vpack.i.bf16 %v598_v8, %v554_v5  ;;  %v2356_v5 = vld [vmem:[%s2919_s3 + $0x18] sm:$0xff]  ;;  %v288_v8 = vld [vmem:[%s1991_s28 + $0x90] sm:$0xff] }
  0x44   : > { %1846 = vrot.lane.b32.xlu2 %v1845_v21, %s1930_s7  ;;  %v412_v21 = vrot.slane %v2023_v27, 7 }
  0x46   : > { %v2320_v42 = vsel %vm443_vm3, %v412_v21, %v428_v20  ;;  %v461_v27 = vsel %vm443_vm3, %v428_v20, %v412_v21 }
  0x47   : > { %1851 = vrot.lane.b32.xlu0 %v1850_v37, %s1931_s8  ;;  %v2314_v37 = vmax.f32 %v358_v22, 0.0  ;;  %v290_v22 = vld [vmem:[%s1991_s28 + $0xa0] sm:$0xff] }
  0x48   : > { %1856 = vrot.lane.b32.xlu1 %v1855_v39, %s1931_s8  ;;  %v2316_v39 = vmax.f32 %v359_v26, 0.0  ;;  %v291_v26 = vld [vmem:[%s1991_s28 + $0xa8] sm:$0xff] }
  0x49   : > { %v522_v28 = vrot.slane %v2314_v37, 1  ;;  %v327_v36 = vmul.f32 %v1981_v1, %v291_v26 }
  0x4a   : > { %v538_v47 = vrot.slane %v2316_v39, 1 }
  0x4c   : > { %1861 = vrot.lane.b32.xlu2 %v1860_v52, %s1930_s7  ;;  %v571_v51 = vsel %vm546_vm0, %v538_v47, %v522_v28  ;;  %v966_v52 = vunpack.c.l.b16 %v1674_v30  ;;  %v555_v53 = vsel %vm546_vm0, %v522_v28, %v538_v47  ;;  %v363_v47 = vadd.f32 %v1996_v3, %v327_v36 }
  0x4d   : > { %v600_v54 = vsel %vm513_vm1, %v571_v51, 0.0 }
  0x4e   : > { %v1895_v60 = vpack.i.bf16 %v600_v54, %v555_v53  ;;  %v2387_v51 = vmax.f32 %v363_v47, 0.0  ;;  %v482_v54 = vsel %vm409_vm4, %v461_v27, 0.0 }
  0x4f   : > { %1866 = vrot.lane.b32.xlu0 %v1865_v58, %s1930_s7  ;;  %v1225_v58 = vunpack.c.l.b16 %v1716_v29 }
  0x50   : > { %1871 = vrot.lane.b32.xlu1 %v1870_v61, %s1931_s8  ;;  %v968_v61 = vpack.c.b16 %v966_v52, %v966_v52 }
  0x51   : > { %v1227_v62 = vpack.c.b16 %v1225_v58, %v1225_v58  ;;  %v540_v58 = vrot.slane %v2387_v51, 1 }
  0x52   : > { %v1021_v63 = vsel %vm1019_vm2, %v968_v61, 0  ;;  %v429_v61 = vrot.slane %v2038_v35, 7 }
  0x53   : > { %1029 = vmatpush.bf16.msra.mxu0 %v1021_v63  ;;  %v2347_v0 = vsel %vm1019_vm2, %v1227_v62, 0  ;;  %1743 = vmatpush.bf16.msra.mxu3 %v1021_v63  ;;  %v423_v62 = vrot.slane %v2054_v44, 7  ;;  %v439_v63 = vrot.slane %v2056_v45, 7 }
  0x54   : > { %1876 = vrot.lane.b32.xlu2 %v1875_v4, %s1931_s8  ;;  %1238 = vmatpush.bf16.msra.mxu2 %v2347_v0  ;;  %v1741_v4 = vld [vmem:[%s2919_s3 + $0xc] sm:$0xff] }
  0x57   : > { %1881 = vrot.lane.b32.xlu0 %v1880_v9, %s1930_s7  ;;  %1030 = vmatpush.bf16.msra.mxu0 %v1741_v4  ;;  %v289_v9 = vld [vmem:[%s1991_s28 + $0x98] sm:$0xff]  ;;  %s265_s28 = scalar_lea.vmem %s2921_s5, %s2924_s22 }
  0x58   : > { %1886 = vrot.lane.b32.xlu1 %v1885_v12, %s1931_s8  ;;  %1744 = vmatpush.bf16.msra.mxu3 %v1741_v4  ;;  %v324_v12 = vmul.f32 %v1981_v1, %v288_v8  ;;  %v325_v13 = vmul.f32 %v1981_v1, %v289_v9 }
  0x59   : > { %1239 = vmatpush.bf16.msra.mxu2 %v2356_v5 }
  0x5a   : > { %v360_v15 = vadd.f32 %v1996_v3, %v324_v12  ;;  %v361_v18 = vadd.f32 %v1996_v3, %v325_v13  ;;  %v413_v13 = vrot.slane %v2031_v31, 7 }
  0x5c   : > { %1745 = vmatpush.bf16.msrb.mxu3 %v2231_v11  ;;  %v2367_v19 = vmax.f32 %v360_v15, 0.0  ;;  %v2369_v20 = vmax.f32 %v361_v18, 0.0  ;;  %v1890_v11 = vpack.i.bf16 %v2316_v39, %v2314_v37 }
  0x5e   : > { %v1900_v21 = vpack.i.bf16 %v2369_v20, %v2367_v19  ;;  %1891 = vrot.lane.b32.xlu2 %v1890_v11, %s1930_s7  ;;  %v523_v15 = vrot.slane %v2367_v19, 1  ;;  %v539_v18 = vrot.slane %v2369_v20, 1 }
  0x5f   : > { %1896 = vrot.lane.b32.xlu0 %v1895_v60, %s1931_s8 }
  0x60   : > { %1746 = vmatpush.bf16.msrb.mxu3 %v2243_v17  ;;  %1901 = vrot.lane.b32.xlu1 %v1900_v21, %s1930_s7  ;;  %v326_v17 = vmul.f32 %v1981_v1, %v290_v22  ;;  %v480_v1 = vsel %vm409_vm4, %v460_v50, 0.0 }
  0x62   : > { %v362_v28 = vadd.f32 %v1996_v3, %v326_v17  ;;  %v472_v17 = vsel %vm443_vm3, %v439_v63, %v423_v62 }
  0x64   : > { %v2385_v29 = vmax.f32 %v362_v28, 0.0 }
  0x66   : > { %v1910_v53 = vpack.i.bf16 %v2387_v51, %v2385_v29  ;;  %v524_v3 = vrot.slane %v2385_v29, 1 }
  0x68   : > { %1911 = vrot.lane.b32.xlu0 %v1910_v53, %s1930_s7  ;;  %v557_v27 = vsel %vm546_vm0, %v524_v3, %v540_v58  ;;  %v573_v50 = vsel %vm546_vm0, %v540_v58, %v524_v3  ;;  %s268_s7 = scalar_lea.vmem %s2922_s6, %s2924_s22 }
  0x69   : > { %v604_v35 = vsel %vm513_vm1, %v573_v50, 0.0  ;;  %v504_v50 = vsel %vm409_vm4, %v472_v17, 0.0  ;;  %v440_v17 = vrot.slane %v2115_v34, 7 }
  0x6a   : > { %v1915_v45 = vpack.i.bf16 %v604_v35, %v557_v27  ;;  %v456_v27 = vsel %vm443_vm3, %v423_v62, %v439_v63 }
  0x6c   : > { %1916 = vrot.lane.b32.xlu1 %v1915_v45, %s1931_s8 }
  0x76   : > { %v2379_v32 = vpop.permute.xlu2 %1781 }
  0x77   : > { %v1784_v63 = vunpack.i.h.bf16 %v2379_v32 }
  0x7e   : > { %v1787_v4 = vpop.permute.xlu2 %1786 }
  0x86   : > { %v1802_v35 = vpop.permute.xlu2 %1801 }
  0x89   : > { %v1762_v30 = vpop.permute.xlu0 %1761 }
  0x8a   : > { %v1772_v52 = vpop.permute.xlu1 %1771  ;;  %v1763_v60 = vunpack.i.l.bf16 %v1762_v30  ;;  %v1764_v8 = vunpack.i.h.bf16 %v1762_v30 }
  0x8b   : > { %v1773_v9 = vunpack.i.l.bf16 %v1772_v52  ;;  %v1774_v12 = vunpack.i.h.bf16 %v1772_v52 }
  0x8c   : > { %v874_v21 = vsel %vm871_vm5, %v482_v54, %v1763_v60  ;;  %v875_v31 = vsel %vm871_vm5, %v2320_v42, %v1764_v8  ;;  %v556_v54 = vsel %vm546_vm0, %v523_v15, %v539_v18  ;;  %v1789_v8 = vunpack.i.h.bf16 %v1787_v4 }
  0x8d   : > { %v872_v36 = vsel %vm871_vm5, %v480_v1, %v1773_v9  ;;  %v873_v30 = vsel %vm871_vm5, %v2334_v48, %v1774_v12  ;;  %v572_v1 = vsel %vm546_vm0, %v539_v18, %v523_v15  ;;  %v1788_v9 = vunpack.i.l.bf16 %v1787_v4 }
  0x8e   : > { %v602_v48 = vsel %vm513_vm1, %v572_v1, 0.0  ;;  %v462_v4 = vsel %vm443_vm3, %v429_v61, %v413_v13  ;;  %v897_v14 = vsel %vm871_vm5, %v456_v27, %v1789_v8  ;;  %v1783_v15 = vunpack.i.l.bf16 %v2379_v32 }
  0x8f   : > { %v1905_v12 = vpack.i.bf16 %v602_v48, %v556_v54  ;;  %v896_v45 = vsel %vm871_vm5, %v504_v50, %v1788_v9  ;;  %v430_v8 = vrot.slane %v2102_v16, 7 }
  0x91   : > { %v1767_v44 = vpop.permute.xlu0 %1766  ;;  %1906 = vrot.lane.b32.xlu2 %v1905_v12, %s1931_s8 }
  0x92   : > { %v1769_v11 = vunpack.i.h.bf16 %v1767_v44  ;;  %v1768_v22 = vunpack.i.l.bf16 %v1767_v44  ;;  %v1777_v26 = vpop.permute.xlu1 %1776 }
  0x93   : > { %v1779_v28 = vunpack.i.h.bf16 %v1777_v26  ;;  %v1778_v47 = vunpack.i.l.bf16 %v1777_v26  ;;  %v424_v26 = vrot.slane %v2113_v33, 7 }
  0x94   : > { %v907_v52 = vsel %vm904_vm6, %v874_v21, %v1768_v22  ;;  %v908_v53 = vsel %vm904_vm6, %v875_v31, %v1769_v11  ;;  %v446_v11 = vsel %vm443_vm3, %v413_v13, %v429_v61  ;;  %v484_v22 = vsel %vm409_vm4, %v462_v4, 0.0 }
  0x95   : > { %v905_v3 = vsel %vm904_vm6, %v872_v36, %v1778_v47  ;;  %v906_v42 = vsel %vm904_vm6, %v873_v30, %v1779_v28  ;;  %v939_v58 = vpack.c.bf16 %v908_v53, %v907_v52  ;;  %v876_v32 = vsel %vm871_vm5, %v484_v22, %v1783_v15 }
  0x96   : > { %v938_v60 = vpack.c.bf16 %v906_v42, %v905_v3  ;;  %v877_v52 = vsel %vm871_vm5, %v446_v11, %v1784_v63  ;;  %v473_v33 = vsel %vm443_vm3, %v440_v17, %v424_v26  ;;  %v1817_v3 = vpop.permute.xlu2 %1816  ;;  %v457_v42 = vsel %vm443_vm3, %v424_v26, %v440_v17 }
  0x97   : > { %1721 = vmatmul.msk.bf16.vlgmr.msra.gmra.mxu2 %vm970_vm7, %v939_v58  ;;  %v506_v1 = vsel %vm409_vm4, %v473_v33, 0.0  ;;  %v1819_v48 = vunpack.i.h.bf16 %v1817_v3  ;;  %v441_v15 = vrot.slane %v2146_v57, 7 }
  0x98   : > { %1679 = vmatmul.msk.bf16.vlgmr.msra.gmra.mxu0 %vm970_vm7, %v938_v60  ;;  %1699 = vmatmul.msk.bf16.gmra.mxu1 %vm970_vm7, %v938_v60  ;;  %v414_v60 = vrot.slane %v2094_v10, 7 }
  0x99   : > { %v1792_v44 = vpop.permute.xlu0 %1791 }
  0x9a   : > { %v1797_v62 = vpop.permute.xlu1 %1796  ;;  %v1794_v28 = vunpack.i.h.bf16 %v1792_v44  ;;  %v1793_v47 = vunpack.i.l.bf16 %v1792_v44  ;;  %v463_v10 = vsel %vm443_vm3, %v430_v8, %v414_v60 }
  0x9b   : > { %v1799_v18 = vunpack.i.h.bf16 %v1797_v62  ;;  %v1798_v21 = vunpack.i.l.bf16 %v1797_v62  ;;  %v486_v62 = vsel %vm409_vm4, %v463_v10, 0.0 }
  0x9c   : > { %v909_v34 = vsel %vm904_vm6, %v876_v32, %v1793_v47  ;;  %v910_v13 = vsel %vm904_vm6, %v877_v52, %v1794_v28  ;;  %v415_v32 = vrot.slane %v2142_v55, 7  ;;  %v431_v52 = vrot.slane %v2149_v59, 7 }
  0x9d   : > { %v929_v31 = vsel %vm904_vm6, %v896_v45, %v1798_v21  ;;  %v930_v36 = vsel %vm904_vm6, %v897_v14, %v1799_v18  ;;  %v940_v9 = vpack.c.bf16 %v910_v13, %v909_v34  ;;  %v1804_v14 = vunpack.i.h.bf16 %v1802_v35 }
  0x9e   : > { %v2452_v30 = vpack.c.bf16 %v930_v36, %v929_v31  ;;  %v1803_v45 = vunpack.i.l.bf16 %v1802_v35  ;;  %v464_v55 = vsel %vm443_vm3, %v431_v52, %v415_v32 }
  0xa0   : > { %1691 = vmatmul.msk.bf16.vlgmr.msra.gmra.mxu3 %vm970_vm7, %v2452_v30  ;;  %v878_v26 = vsel %vm871_vm5, %v486_v62, %v1803_v45 }
  0xa1   : > { %v1807_v61 = vpop.permute.xlu0 %1806  ;;  %1747 = vmatpush.bf16.msra.mxu3 %v2347_v0  ;;  %v1818_v0 = vunpack.i.l.bf16 %v1817_v3 }
  0xa2   : > { %v1809_v53 = vunpack.i.h.bf16 %v1807_v61  ;;  %v1808_v54 = vunpack.i.l.bf16 %v1807_v61  ;;  %v1812_v12 = vpop.permute.xlu1 %1811 }
  0xa3   : > { %v1814_v18 = vunpack.i.h.bf16 %v1812_v12  ;;  %v1813_v21 = vunpack.i.l.bf16 %v1812_v12 }
  0xa4   : > { %v899_v27 = vsel %vm871_vm5, %v457_v42, %v1809_v53  ;;  %v898_v50 = vsel %vm871_vm5, %v506_v1, %v1808_v54  ;;  %v1832_v54 = vpop.permute.xlu2 %1831  ;;  %v448_v1 = vsel %vm443_vm3, %v415_v32, %v431_v52  ;;  %v422_v52 = vrot.slane %v2257_v40, 7 }
  0xa5   : > { %1748 = vmatpush.bf16.msra.mxu3 %v2356_v5  ;;  %v931_v16 = vsel %vm904_vm6, %v898_v50, %v1818_v0  ;;  %v932_v4 = vsel %vm904_vm6, %v899_v27, %v1819_v48  ;;  %v447_v5 = vsel %vm443_vm3, %v414_v60, %v430_v8  ;;  %v911_v17 = vsel %vm904_vm6, %v878_v26, %v1813_v21 }
  0xa6   : > { %v2483_v63 = vpack.c.bf16 %v932_v4, %v931_v16  ;;  %v879_v22 = vsel %vm871_vm5, %v447_v5, %v1804_v14  ;;  %v488_v48 = vsel %vm409_vm4, %v464_v55, 0.0  ;;  %v442_v27 = vrot.slane %v2185_v25, 7 }
  0xa7   : > { %1722 = vmatmul.msk.bf16.gmra.mxu2 %vm970_vm7, %v940_v9  ;;  %v912_v31 = vsel %vm904_vm6, %v879_v22, %v1814_v18  ;;  %v1834_v50 = vunpack.i.h.bf16 %v1832_v54  ;;  %v1833_v12 = vunpack.i.l.bf16 %v1832_v54  ;;  %v432_v18 = vrot.slane %v2194_v38, 7 }
  0xa8   : > { %1680 = vmatmul.msk.bf16.gmra.mxu0 %vm970_vm7, %v939_v58  ;;  %1700 = vmatmul.msk.bf16.gmra.mxu1 %vm970_vm7, %v939_v58  ;;  %v425_v58 = vrot.slane %v2144_v56, 7  ;;  %v941_v33 = vpack.c.bf16 %v912_v31, %v911_v17 }
  0xa9   : > { %v1822_v44 = vpop.permute.xlu0 %1821 }
  0xaa   : > { %v1827_v11 = vpop.permute.xlu1 %1826  ;;  %v474_v35 = vsel %vm443_vm3, %v441_v15, %v425_v58  ;;  %v458_v28 = vsel %vm443_vm3, %v425_v58, %v441_v15  ;;  %v1824_v60 = vunpack.i.h.bf16 %v1822_v44  ;;  %v1823_v8 = vunpack.i.l.bf16 %v1822_v44 }
  0xab   : > { %v1829_v56 = vunpack.i.h.bf16 %v1827_v11  ;;  %v1828_v36 = vunpack.i.l.bf16 %v1827_v11  ;;  %v508_v47 = vsel %vm409_vm4, %v474_v35, 0.0  ;;  %v416_v15 = vrot.slane %v2181_v23, 7 }
  0xac   : > { %v1847_v10 = vpop.permute.xlu2 %1846  ;;  %v881_v16 = vsel %vm871_vm5, %v448_v1, %v1824_v60  ;;  %v880_v4 = vsel %vm871_vm5, %v488_v48, %v1823_v8  ;;  %v417_v8 = vrot.slane %v2223_v6, 7  ;;  %v433_v48 = vrot.slane %v2225_v7, 7 }
  0xad   : > { %v901_v13 = vsel %vm871_vm5, %v458_v28, %v1829_v56  ;;  %v900_v53 = vsel %vm871_vm5, %v508_v47, %v1828_v36  ;;  %v913_v5 = vsel %vm904_vm6, %v880_v4, %v1833_v12  ;;  %v914_v14 = vsel %vm904_vm6, %v881_v16, %v1834_v50 }
  0xae   : > { %v1848_v45 = vunpack.i.l.bf16 %v1847_v10  ;;  %v942_v21 = vpack.c.bf16 %v914_v14, %v913_v5  ;;  %v465_v23 = vsel %vm443_vm3, %v432_v18, %v416_v15  ;;  %v449_v36 = vsel %vm443_vm3, %v416_v15, %v432_v18 }
  0xaf   : > { %v490_v47 = vsel %vm409_vm4, %v465_v23, 0.0  ;;  %v466_v16 = vsel %vm443_vm3, %v433_v48, %v417_v8  ;;  %v450_v14 = vsel %vm443_vm3, %v417_v8, %v433_v48 }
  0xb0   : > { %1692 = vmatmul.msk.bf16.gmra.mxu3 %vm970_vm7, %v2483_v63 }
  0xb1   : > { %v1837_v57 = vpop.permute.xlu0 %1836 }
  0xb2   : > { %v1839_v61 = vunpack.i.h.bf16 %v1837_v57  ;;  %v1838_v34 = vunpack.i.l.bf16 %v1837_v57  ;;  %v1842_v3 = vpop.permute.xlu1 %1841 }
  0xb3   : > { %v1844_v57 = vunpack.i.h.bf16 %v1842_v3  ;;  %v1843_v28 = vunpack.i.l.bf16 %v1842_v3 }
  0xb4   : > { %v933_v59 = vsel %vm904_vm6, %v900_v53, %v1838_v34  ;;  %v934_v42 = vsel %vm904_vm6, %v901_v13, %v1839_v61  ;;  %v1862_v31 = vpop.permute.xlu2 %1861 }
  0xb5   : > { %v2514_v0 = vpack.c.bf16 %v934_v42, %v933_v59  ;;  %v883_v13 = vsel %vm871_vm5, %v449_v36, %v1844_v57  ;;  %v882_v53 = vsel %vm871_vm5, %v490_v47, %v1843_v28  ;;  %v1864_v4 = vunpack.i.h.bf16 %v1862_v31 }
  0xb7   : > { %1723 = vmatmul.msk.bf16.gmra.mxu2 %vm970_vm7, %v941_v33  ;;  %v1136_v8 = vpop.f32.mrf.mxu1 }
  0xb8   : > { %1681 = vmatmul.msk.bf16.gmra.mxu0 %vm970_vm7, %v940_v9  ;;  %1701 = vmatmul.msk.bf16.gmra.mxu1 %vm970_vm7, %v940_v9  ;;  %v426_v9 = vrot.slane %v2183_v24, 7  ;;  %v1849_v24 = vunpack.i.h.bf16 %v1847_v10 }
  0xb9   : > { %v1852_v17 = vpop.permute.xlu0 %1851 }
  0xba   : > { %v475_v44 = vsel %vm443_vm3, %v442_v27, %v426_v9  ;;  %v1857_v25 = vpop.permute.xlu1 %1856  ;;  %v459_v62 = vsel %vm443_vm3, %v426_v9, %v442_v27  ;;  %v1854_v61 = vunpack.i.h.bf16 %v1852_v17  ;;  %v1853_v34 = vunpack.i.l.bf16 %v1852_v17 }
  0xbb   : > { %v510_v58 = vsel %vm409_vm4, %v475_v44, 0.0  ;;  %v1859_v11 = vunpack.i.h.bf16 %v1857_v25  ;;  %v1858_v22 = vunpack.i.l.bf16 %v1857_v25  ;;  %v903_v26 = vsel %vm871_vm5, %v459_v62, %v1849_v24 }
  0xbc   : > { %v902_v35 = vsel %vm871_vm5, %v510_v58, %v1848_v45  ;;  %v915_v55 = vsel %vm904_vm6, %v882_v53, %v1853_v34  ;;  %v916_v59 = vsel %vm904_vm6, %v883_v13, %v1854_v61  ;;  %v1863_v44 = vunpack.i.l.bf16 %v1862_v31 }
  0xbd   : > { %v935_v38 = vsel %vm904_vm6, %v902_v35, %v1858_v22  ;;  %v936_v56 = vsel %vm904_vm6, %v903_v26, %v1859_v11  ;;  %v943_v9 = vpack.c.bf16 %v916_v59, %v915_v55  ;;  %v492_v24 = vsel %vm409_vm4, %v466_v16, 0.0 }
  0xbe   : > { %v2545_v32 = vpack.c.bf16 %v936_v56, %v935_v38  ;;  %v885_v58 = vsel %vm871_vm5, %v450_v14, %v1864_v4  ;;  %v884_v15 = vsel %vm871_vm5, %v492_v24, %v1863_v44  ;;  %v418_v11 = vrot.slane %v2264_v43, 7 }
  0xbf   : > { %v434_v22 = vrot.slane %v2266_v46, 7  ;;  %v419_v61 = vrot.slane %v2314_v37, 7  ;;  %v435_v34 = vrot.slane %v2316_v39, 7 }
  0xc0   : > { %1693 = vmatmul.msk.bf16.gmra.mxu3 %vm970_vm7, %v2514_v0 }
  0xc1   : > { %v1867_v54 = vpop.permute.xlu0 %1866  ;;  %v467_v17 = vsel %vm443_vm3, %v434_v22, %v418_v11  ;;  %v451_v56 = vsel %vm443_vm3, %v418_v11, %v434_v22  ;;  %v468_v53 = vsel %vm443_vm3, %v435_v34, %v419_v61  ;;  %v452_v59 = vsel %vm443_vm3, %v419_v61, %v435_v34 }
  0xc2   : > { %v1869_v40 = vunpack.i.h.bf16 %v1867_v54  ;;  %v1868_v42 = vunpack.i.l.bf16 %v1867_v54  ;;  %v1872_v5 = vpop.permute.xlu1 %1871  ;;  %v494_v43 = vsel %vm409_vm4, %v467_v17, 0.0  ;;  %v496_v37 = vsel %vm409_vm4, %v468_v53, 0.0 }
  0xc3   : > { %v1874_v25 = vunpack.i.h.bf16 %v1872_v5  ;;  %v1873_v62 = vunpack.i.l.bf16 %v1872_v5 }
  0xc5   : > { %v917_v18 = vsel %vm904_vm6, %v884_v15, %v1873_v62  ;;  %v437_v15 = vrot.slane %v2387_v51, 7 }
  0xc7   : > { %1724 = vmatmul.msk.bf16.gmra.mxu2 %vm970_vm7, %v942_v21 }
  0xc8   : > { %1682 = vmatmul.msk.bf16.gmra.mxu0 %vm970_vm7, %v941_v33  ;;  %1702 = vmatmul.msk.bf16.gmra.mxu1 %vm970_vm7, %v941_v33  ;;  %v438_v33 = vrot.slane %v2259_v41, 7  ;;  %v1877_v41 = vpop.permute.xlu2 %1876 }
  0xc9   : > { %v1879_v27 = vunpack.i.h.bf16 %v1877_v41  ;;  %v1878_v50 = vunpack.i.l.bf16 %v1877_v41  ;;  %v1882_v35 = vpop.permute.xlu0 %1881 }
  0xca   : > { %v471_v3 = vsel %vm443_vm3, %v438_v33, %v422_v52  ;;  %v455_v1 = vsel %vm443_vm3, %v422_v52, %v438_v33  ;;  %v1884_v31 = vunpack.i.h.bf16 %v1882_v35  ;;  %v1883_v23 = vunpack.i.l.bf16 %v1882_v35  ;;  %v1887_v38 = vpop.permute.xlu1 %1886 }
  0xcb   : > { %v502_v60 = vsel %vm409_vm4, %v471_v3, 0.0  ;;  %v895_v12 = vsel %vm871_vm5, %v455_v1, %v1869_v40  ;;  %v1889_v46 = vunpack.i.h.bf16 %v1887_v38  ;;  %v1888_v36 = vunpack.i.l.bf16 %v1887_v38 }
  0xcc   : > { %v894_v10 = vsel %vm871_vm5, %v502_v60, %v1868_v42  ;;  %v928_v7 = vsel %vm904_vm6, %v895_v12, %v1879_v27  ;;  %v887_v57 = vsel %vm871_vm5, %v451_v56, %v1884_v31  ;;  %v886_v28 = vsel %vm871_vm5, %v494_v43, %v1883_v23 }
  0xcd   : > { %v927_v6 = vsel %vm904_vm6, %v894_v10, %v1878_v50  ;;  %v919_v47 = vsel %vm904_vm6, %v886_v28, %v1888_v36  ;;  %v920_v52 = vsel %vm904_vm6, %v887_v57, %v1889_v46  ;;  %v436_v27 = vrot.slane %v2369_v20, 7  ;;  %v1138_v20 = vpop.f32.mrf.mxu1 }
  0xce   : > { %v2576_v45 = vpack.c.bf16 %v928_v7, %v927_v6  ;;  %v945_v33 = vpack.c.bf16 %v920_v52, %v919_v47 }
  0xd0   : > { %1694 = vmatmul.msk.bf16.gmra.mxu3 %vm970_vm7, %v2545_v32  ;;  %v1892_v13 = vpop.permute.xlu2 %1891 }
  0xd1   : > { %v1894_v54 = vunpack.i.h.bf16 %v1892_v13  ;;  %v1893_v3 = vunpack.i.l.bf16 %v1892_v13  ;;  %v1897_v55 = vpop.permute.xlu0 %1896 }
  0xd2   : > { %v1899_v39 = vunpack.i.h.bf16 %v1897_v55  ;;  %v1898_v40 = vunpack.i.l.bf16 %v1897_v55  ;;  %v1902_v50 = vpop.permute.xlu1 %1901 }
  0xd3   : > { %v889_v42 = vsel %vm871_vm5, %v452_v59, %v1894_v54  ;;  %v888_v41 = vsel %vm871_vm5, %v496_v37, %v1893_v3  ;;  %v1904_v10 = vunpack.i.h.bf16 %v1902_v50  ;;  %v1903_v16 = vunpack.i.l.bf16 %v1902_v50 }
  0xd4   : > { %v921_v1 = vsel %vm904_vm6, %v888_v41, %v1898_v40  ;;  %v922_v60 = vsel %vm904_vm6, %v889_v42, %v1899_v39 }
  0xd5   : > { %v946_v48 = vpack.c.bf16 %v922_v60, %v921_v1 }
  0xd7   : > { %1725 = vmatmul.msk.bf16.gmra.mxu2 %vm970_vm7, %v943_v9 }
  0xd8   : > { %1683 = vmatmul.msk.bf16.gmra.mxu0 %vm970_vm7, %v942_v21  ;;  %1703 = vmatmul.msk.bf16.gmra.mxu1 %vm970_vm7, %v942_v21  ;;  %v918_v21 = vsel %vm904_vm6, %v885_v58, %v1874_v25  ;;  %v421_v58 = vrot.slane %v2385_v29, 7 }
  0xd9   : > { %v944_v26 = vpack.c.bf16 %v918_v21, %v917_v18 }
  0xda   : > { %v1912_v11 = vpop.permute.xlu0 %1911  ;;  %v470_v22 = vsel %vm443_vm3, %v437_v15, %v421_v58  ;;  %v454_v51 = vsel %vm443_vm3, %v421_v58, %v437_v15 }
  0xdb   : > { %v1914_v35 = vunpack.i.h.bf16 %v1912_v11  ;;  %v1913_v17 = vunpack.i.l.bf16 %v1912_v11  ;;  %v500_v23 = vsel %vm409_vm4, %v470_v22, 0.0 }
  0xdd   : > { %v893_v57 = vsel %vm871_vm5, %v454_v51, %v1914_v35  ;;  %v892_v28 = vsel %vm871_vm5, %v500_v23, %v1913_v17 }
  0xde   : > { %v1917_v31 = vpop.permute.xlu1 %1916 }
  0xdf   : > { %v1919_v56 = vunpack.i.h.bf16 %v1917_v31  ;;  %v1918_v43 = vunpack.i.l.bf16 %v1917_v31 }
  0xe0   : > { %1710 = vmatmul.msk.bf16.vlgmr.msrb.gmra.mxu3 %vm970_vm7, %v2576_v45 }
  0xe1   : > { %v925_v47 = vsel %vm904_vm6, %v892_v28, %v1918_v43  ;;  %v926_v2 = vsel %vm904_vm6, %v893_v57, %v1919_v56 }
  0xe2   : > { %v948_v53 = vpack.c.bf16 %v926_v2, %v925_v47 }
  0xe7   : > { %1726 = vmatmul.msk.bf16.gmra.mxu2 %vm970_vm7, %v944_v26 }
  0xe8   : > { %1684 = vmatmul.msk.bf16.gmra.mxu0 %vm970_vm7, %v943_v9  ;;  %1704 = vmatmul.msk.bf16.gmra.mxu1 %vm970_vm7, %v943_v9  ;;  %v420_v9 = vrot.slane %v2367_v19, 7 }
  0xea   : > { %v469_v12 = vsel %vm443_vm3, %v436_v27, %v420_v9  ;;  %v453_v7 = vsel %vm443_vm3, %v420_v9, %v436_v27 }
  0xeb   : > { %v1907_v6 = vpop.permute.xlu2 %1906  ;;  %v498_v19 = vsel %vm409_vm4, %v469_v12, 0.0  ;;  %v891_v5 = vsel %vm871_vm5, %v453_v7, %v1904_v10 }
  0xec   : > { %v1909_v4 = vunpack.i.h.bf16 %v1907_v6  ;;  %v1908_v44 = vunpack.i.l.bf16 %v1907_v6  ;;  %v890_v14 = vsel %vm871_vm5, %v498_v19, %v1903_v16 }
  0xee   : > { %v923_v24 = vsel %vm904_vm6, %v890_v14, %v1908_v44  ;;  %v924_v25 = vsel %vm904_vm6, %v891_v5, %v1909_v4 }
  0xef   : > { %v947_v62 = vpack.c.bf16 %v924_v25, %v923_v24 }
  0xf0   : > { %1711 = vmatmul.msk.bf16.gmra.mxu3 %vm970_vm7, %v2452_v30 }
  0xf7   : > { %1727 = vmatmul.msk.bf16.gmra.mxu2 %vm970_vm7, %v945_v33 }
  0xf8   : > { %1685 = vmatmul.msk.bf16.gmra.mxu0 %vm970_vm7, %v944_v26  ;;  %1705 = vmatmul.msk.bf16.gmra.mxu1 %vm970_vm7, %v944_v26 }
 0x100   : > { %1712 = vmatmul.msk.bf16.gmra.mxu3 %vm970_vm7, %v2483_v63 }
 0x107   : > { %1728 = vmatmul.msk.bf16.gmra.mxu2 %vm970_vm7, %v946_v48 }
 0x108   : > { %1686 = vmatmul.msk.bf16.gmra.mxu0 %vm970_vm7, %v945_v33  ;;  %1706 = vmatmul.msk.bf16.gmra.mxu1 %vm970_vm7, %v945_v33 }
 0x110   : > { %1713 = vmatmul.msk.bf16.gmra.mxu3 %vm970_vm7, %v2514_v0 }
 0x115   : > { %v1032_v18 = vpop.f32.mrf.mxu0  ;;  %v1141_v21 = vpop.f32.mrf.mxu1 }
 0x116   : > { %v1137_v26 = vadd.f32 %v1136_v8, %v1032_v18 }
 0x117   : > { %1729 = vmatmul.msk.bf16.gmra.mxu2 %vm970_vm7, %v947_v62 }
 0x118   : > { %1687 = vmatmul.msk.bf16.gmra.mxu0 %vm970_vm7, %v946_v48  ;;  %1707 = vmatmul.msk.bf16.gmra.mxu1 %vm970_vm7, %v946_v48 }
 0x11a   : > { %v1241_v29 = vpop.f32.mrf.mxu2 }
 0x11b   : > { %v1321_v38 = vadd.f32 %v1241_v29, %v1137_v26 }
 0x11d   : > { %1526 = vst.msk [vmem:[%s2647_s26] sm:$0xff] %vm871_vm5, %v1321_v38  ;;  %v1034_v46 = vpop.f32.mrf.mxu0  ;;  %v1143_v36 = vpop.f32.mrf.mxu1  ;;  %v1424_v61 = vmul.f32 %v1321_v38, %v1321_v38  ;;  %v1353_v54 = vsel %vm871_vm5, %v1321_v38, 0.0 }
 0x11e   : > { %v1139_v52 = vadd.f32 %v1138_v20, %v1034_v46 }
 0x11f   : > { %v1456_v39 = vsel %vm871_vm5, %v1424_v61, 0.0 }
 0x120   : > { %1733 = vmatmul.msk.bf16.vlgmr.msra.gmra.mxu3 %vm970_vm7, %v2483_v63 }
 0x122   : > { %v1243_v33 = vpop.f32.mrf.mxu2 }
 0x123   : > { %v2661_v34 = vpop.f32.mrf.mxu3  ;;  %v1322_v13 = vadd.f32 %v1243_v33, %v1139_v52 }
 0x125   : > { %v1354_v3 = vsel %vm871_vm5, %v1322_v13, 0.0  ;;  %v1425_v55 = vmul.f32 %v1322_v13, %v1322_v13  ;;  %1527 = vst.msk [vmem:[%s2647_s26 + $0x8] sm:$0xff] %vm871_vm5, %v1322_v13  ;;  %v1037_v63 = vpop.f32.mrf.mxu0  ;;  %v1146_v59 = vpop.f32.mrf.mxu1 }
 0x126   : > { %v1355_v37 = vadd.f32 %v1354_v3, %v1353_v54  ;;  %v1142_v41 = vadd.f32 %v1141_v21, %v1037_v63 }
 0x127   : > { %v1457_v40 = vsel %vm871_vm5, %v1425_v55, 0.0  ;;  %1730 = vmatmul.msk.bf16.gmra.mxu2 %vm970_vm7, %v948_v53 }
 0x128   : > { %v1458_v42 = vadd.f32 %v1457_v40, %v1456_v39  ;;  %1688 = vmatmul.msk.bf16.gmra.mxu0 %vm970_vm7, %v947_v62  ;;  %1708 = vmatmul.msk.bf16.gmra.mxu1 %vm970_vm7, %v947_v62 }
 0x12a   : > { %v1246_v1 = vpop.f32.mrf.mxu2 }
 0x12b   : > { %v2672_v60 = vpop.f32.mrf.mxu3  ;;  %v1323_v8 = vadd.f32 %v1246_v1, %v1142_v41 }
 0x12d   : > { %v1356_v48 = vsel %vm871_vm5, %v1323_v8, 0.0  ;;  %v1426_v9 = vmul.f32 %v1323_v8, %v1323_v8  ;;  %1528 = vst.msk [vmem:[%s2647_s26 + $0x10] sm:$0xff] %vm871_vm5, %v1323_v8  ;;  %v1039_v27 = vpop.f32.mrf.mxu0  ;;  %v1148_v50 = vpop.f32.mrf.mxu1 }
 0x12e   : > { %v1357_v12 = vadd.f32 %v1356_v48, %v1355_v37  ;;  %v1144_v6 = vadd.f32 %v1143_v36, %v1039_v27 }
 0x12f   : > { %v1459_v10 = vsel %vm871_vm5, %v1426_v9, 0.0 }
 0x130   : > { %v1460_v16 = vadd.f32 %v1459_v10, %v1458_v42  ;;  %1734 = vmatmul.msk.bf16.gmra.mxu3 %vm970_vm7, %v2514_v0 }
 0x132   : > { %v1248_v7 = vpop.f32.mrf.mxu2 }
 0x133   : > { %v2680_v19 = vpop.f32.mrf.mxu3  ;;  %v1324_v20 = vadd.f32 %v1248_v7, %v1144_v6 }
 0x135   : > { %v1358_v4 = vsel %vm871_vm5, %v1324_v20, 0.0  ;;  %v1427_v44 = vmul.f32 %v1324_v20, %v1324_v20  ;;  %1529 = vst.msk [vmem:[%s2647_s26 + $0x18] sm:$0xff] %vm871_vm5, %v1324_v20  ;;  %v1042_v5 = vpop.f32.mrf.mxu0  ;;  %v1151_v14 = vpop.f32.mrf.mxu1 }
 0x136   : > { %v1359_v24 = vadd.f32 %v1358_v4, %v1357_v12  ;;  %v1147_v62 = vadd.f32 %v1146_v59, %v1042_v5 }
 0x137   : > { %v1461_v25 = vsel %vm871_vm5, %v1427_v44, 0.0  ;;  %1731 = vmatmul.msk.bf16.gmra.mxu2 %vm970_vm7, %v2576_v45 }
 0x138   : > { %v1462_v0 = vadd.f32 %v1461_v25, %v1460_v16  ;;  %1689 = vmatmul.msk.bf16.gmra.mxu0 %vm970_vm7, %v948_v53  ;;  %1709 = vmatmul.msk.bf16.gmra.mxu1 %vm970_vm7, %v948_v53 }
 0x13a   : > { %v1251_v58 = vpop.f32.mrf.mxu2 }
 0x13b   : > { %v2690_v15 = vpop.f32.mrf.mxu3  ;;  %v1325_v18 = vadd.f32 %v1251_v58, %v1147_v62 }
 0x13d   : > { %v1360_v21 = vsel %vm871_vm5, %v1325_v18, 0.0  ;;  %v1428_v11 = vmul.f32 %v1325_v18, %v1325_v18  ;;  %1530 = vst.msk [vmem:[%s2647_s26 + $0x20] sm:$0xff] %vm871_vm5, %v1325_v18  ;;  %v1044_v22 = vpop.f32.mrf.mxu0  ;;  %v1153_v26 = vpop.f32.mrf.mxu1 }
 0x13e   : > { %v1361_v35 = vadd.f32 %v1360_v21, %v1359_v24  ;;  %v1149_v29 = vadd.f32 %v1148_v50, %v1044_v22 }
 0x13f   : > { %v1463_v17 = vsel %vm871_vm5, %v1428_v11, 0.0 }
 0x140   : > { %v1464_v31 = vadd.f32 %v1463_v17, %v1462_v0  ;;  %1735 = vmatmul.msk.bf16.gmra.mxu3 %vm970_vm7, %v2545_v32 }
 0x142   : > { %v1253_v51 = vpop.f32.mrf.mxu2 }
 0x143   : > { %v2698_v23 = vpop.f32.mrf.mxu3  ;;  %v1326_v38 = vadd.f32 %v1253_v51, %v1149_v29 }
 0x145   : > { %v1362_v56 = vsel %vm871_vm5, %v1326_v38, 0.0  ;;  %v1429_v43 = vmul.f32 %v1326_v38, %v1326_v38  ;;  %1531 = vst.msk [vmem:[%s2647_s26 + $0x28] sm:$0xff] %vm871_vm5, %v1326_v38  ;;  %v1047_v46 = vpop.f32.mrf.mxu0  ;;  %v1156_v36 = vpop.f32.mrf.mxu1 }
 0x146   : > { %v1363_v57 = vadd.f32 %v1362_v56, %v1361_v35  ;;  %v1152_v47 = vadd.f32 %v1151_v14, %v1047_v46 }
 0x147   : > { %v1465_v28 = vsel %vm871_vm5, %v1429_v43, 0.0  ;;  %1732 = vmatmul.msk.bf16.gmra.mxu2 %vm970_vm7, %v2452_v30 }
 0x148   : > { %v1466_v32 = vadd.f32 %v1465_v28, %v1464_v31  ;;  %1690 = vmatmul.msk.bf16.gmra.mxu0 %vm970_vm7, %v2576_v45 }
 0x14a   : > { %v1256_v2 = vpop.f32.mrf.mxu2 }
 0x14b   : > { %v2708_v52 = vpop.f32.mrf.mxu3  ;;  %v1327_v33 = vadd.f32 %v1256_v2, %v1152_v47 }
 0x14d   : > { %v1364_v61 = vsel %vm871_vm5, %v1327_v33, 0.0  ;;  %v1430_v13 = vmul.f32 %v1327_v33, %v1327_v33  ;;  %1532 = vst.msk [vmem:[%s2647_s26 + $0x30] sm:$0xff] %vm871_vm5, %v1327_v33  ;;  %v1049_v53 = vpop.f32.mrf.mxu0  ;;  %v1158_v54 = vpop.f32.mrf.mxu1 }
 0x14e   : > { %v1365_v3 = vadd.f32 %v1364_v61, %v1363_v57  ;;  %v1154_v45 = vadd.f32 %v1153_v26, %v1049_v53 }
 0x14f   : > { %v1467_v30 = vsel %vm871_vm5, %v1430_v13, 0.0 }
 0x150   : > { %v1468_v55 = vadd.f32 %v1467_v30, %v1466_v32  ;;  %1315 = vmatmul.bf16.gmra.mxu3 %v1932_v49 }
 0x152   : > { %v1258_v63 = vpop.f32.mrf.mxu2 }
 0x153   : > { %v2715_v59 = vpop.f32.mrf.mxu3  ;;  %v1328_v37 = vadd.f32 %v1258_v63, %v1154_v45 }
 0x155   : > { %v1366_v39 = vsel %vm871_vm5, %v1328_v37, 0.0  ;;  %v1431_v40 = vmul.f32 %v1328_v37, %v1328_v37  ;;  %1533 = vst.msk [vmem:[%s2647_s26 + $0x38] sm:$0xff] %vm871_vm5, %v1328_v37  ;;  %v1052_v42 = vpop.f32.mrf.mxu0  ;;  %v1161_v41 = vpop.f32.mrf.mxu1 }
 0x156   : > { %v1367_v1 = vadd.f32 %v1366_v39, %v1365_v3  ;;  %v1157_v9 = vadd.f32 %v1156_v36, %v1052_v42 }
 0x157   : > { %v1469_v8 = vsel %vm871_vm5, %v1431_v40, 0.0 }
 0x158   : > { %v1470_v48 = vadd.f32 %v1469_v8, %v1468_v55 }
 0x15a   : > { %v1261_v27 = vpop.f32.mrf.mxu2 }
 0x15b   : > { %v2721_v49 = vpop.f32.mrf.mxu3  ;;  %v1329_v50 = vadd.f32 %v1261_v27, %v1157_v9 }
 0x15d   : > { %v1368_v12 = vsel %vm871_vm5, %v1329_v50, 0.0  ;;  %v1432_v10 = vmul.f32 %v1329_v50, %v1329_v50  ;;  %1534 = vst.msk [vmem:[%s2647_s26 + $0x40] sm:$0xff] %vm871_vm5, %v1329_v50  ;;  %v1054_v16 = vpop.f32.mrf.mxu0  ;;  %v1163_v6 = vpop.f32.mrf.mxu1 }
 0x15e   : > { %v1369_v7 = vadd.f32 %v1368_v12, %v1367_v1  ;;  %v1159_v44 = vadd.f32 %v1158_v54, %v1054_v16 }
 0x15f   : > { %v1471_v20 = vsel %vm871_vm5, %v1432_v10, 0.0 }
 0x160   : > { %v1472_v4 = vadd.f32 %v1471_v20, %v1470_v48 }
 0x162   : > { %v1263_v5 = vpop.f32.mrf.mxu2 }
 0x163   : > { %v2727_v14 = vpop.f32.mrf.mxu3  ;;  %v1330_v24 = vadd.f32 %v1263_v5, %v1159_v44 }
 0x165   : > { %v1370_v25 = vsel %vm871_vm5, %v1330_v24, 0.0  ;;  %v1433_v0 = vmul.f32 %v1330_v24, %v1330_v24  ;;  %1535 = vst.msk [vmem:[%s2647_s26 + $0x48] sm:$0xff] %vm871_vm5, %v1330_v24  ;;  %v1057_v62 = vpop.f32.mrf.mxu0  ;;  %v1166_v58 = vpop.f32.mrf.mxu1 }
 0x166   : > { %v1371_v18 = vadd.f32 %v1370_v25, %v1369_v7  ;;  %v1162_v22 = vadd.f32 %v1161_v41, %v1057_v62 }
 0x167   : > { %v1473_v21 = vsel %vm871_vm5, %v1433_v0, 0.0 }
 0x168   : > { %v1474_v11 = vadd.f32 %v1473_v21, %v1472_v4 }
 0x16a   : > { %v1266_v26 = vpop.f32.mrf.mxu2 }
 0x16b   : > { %v2733_v35 = vpop.f32.mrf.mxu3  ;;  %v1331_v17 = vadd.f32 %v1266_v26, %v1162_v22 }
 0x16d   : > { %v1372_v31 = vsel %vm871_vm5, %v1331_v17, 0.0  ;;  %v1434_v29 = vmul.f32 %v1331_v17, %v1331_v17  ;;  %1536 = vst.msk [vmem:[%s2647_s26 + $0x50] sm:$0xff] %vm871_vm5, %v1331_v17  ;;  %v1059_v51 = vpop.f32.mrf.mxu0  ;;  %v1168_v38 = vpop.f32.mrf.mxu1  ;;  %v1197_v17 = vadd.f32 %v2727_v14, %v2661_v34  ;;  %v1199_v34 = vadd.f32 %v2733_v35, %v2672_v60 }
 0x16e   : > { %v1373_v56 = vadd.f32 %v1372_v31, %v1371_v18  ;;  %v1164_v36 = vadd.f32 %v1163_v6, %v1059_v51 }
 0x16f   : > { %v1475_v43 = vsel %vm871_vm5, %v1434_v29, 0.0 }
 0x170   : > { %v1476_v46 = vadd.f32 %v1475_v43, %v1474_v11 }
 0x172   : > { %v1268_v57 = vpop.f32.mrf.mxu2 }
 0x173   : > { %v2739_v28 = vpop.f32.mrf.mxu3  ;;  %v1332_v32 = vadd.f32 %v1268_v57, %v1164_v36 }
 0x175   : > { %v1374_v47 = vsel %vm871_vm5, %v1332_v32, 0.0  ;;  %v1435_v2 = vmul.f32 %v1332_v32, %v1332_v32  ;;  %1537 = vst.msk [vmem:[%s2647_s26 + $0x58] sm:$0xff] %vm871_vm5, %v1332_v32  ;;  %v1062_v33 = vpop.f32.mrf.mxu0  ;;  %v1171_v13 = vpop.f32.mrf.mxu1 }
 0x176   : > { %v1375_v61 = vadd.f32 %v1374_v47, %v1373_v56  ;;  %v1167_v3 = vadd.f32 %v1166_v58, %v1062_v33  ;;  %v1202_v33 = vadd.f32 %v2739_v28, %v2680_v19 }
 0x177   : > { %v1477_v53 = vsel %vm871_vm5, %v1435_v2, 0.0 }
 0x178   : > { %v1478_v54 = vadd.f32 %v1477_v53, %v1476_v46 }
 0x17a   : > { %v1271_v30 = vpop.f32.mrf.mxu2 }
 0x17b   : > { %v2745_v55 = vpop.f32.mrf.mxu3  ;;  %v1333_v45 = vadd.f32 %v1271_v30, %v1167_v3 }
 0x17c   : > { %v1204_v30 = vadd.f32 %v2745_v55, %v2690_v15 }
 0x17d   : > { %v1376_v63 = vsel %vm871_vm5, %v1333_v45, 0.0  ;;  %v1436_v37 = vmul.f32 %v1333_v45, %v1333_v45  ;;  %1538 = vst.msk [vmem:[%s2647_s26 + $0x60] sm:$0xff] %vm871_vm5, %v1333_v45  ;;  %v1064_v39 = vpop.f32.mrf.mxu0  ;;  %v1173_v1 = vpop.f32.mrf.mxu1 }
 0x17e   : > { %v2750_v40 = vadd.f32 %v1376_v63, %v1375_v61  ;;  %v1169_v8 = vadd.f32 %v1168_v38, %v1064_v39 }
 0x17f   : > { %v1479_v42 = vsel %vm871_vm5, %v1436_v37, 0.0 }
 0x180   : > { %v2753_v41 = vadd.f32 %v1479_v42, %v1478_v54 }
 0x182   : > { %v1273_v48 = vpop.f32.mrf.mxu2 }
 0x183   : > { %v2755_v9 = vpop.f32.mrf.mxu3  ;;  %v2757_v27 = vadd.f32 %v1273_v48, %v1169_v8 }
 0x185   : > { %1539 = vst.msk [vmem:[%s2647_s26 + $0x68] sm:$0xff] %vm871_vm5, %v2757_v27  ;;  %v1067_v50 = vpop.f32.mrf.mxu0  ;;  %v1176_v10 = vpop.f32.mrf.mxu1  ;;  %v1437_v39 = vmul.f32 %v2757_v27, %v2757_v27 }
 0x186   : > { %v1172_v12 = vadd.f32 %v1171_v13, %v1067_v50 }
 0x187   : > { %v1481_v15 = vsel %vm871_vm5, %v1437_v39, 0.0 }
 0x18a   : > { %v1276_v16 = vpop.f32.mrf.mxu2 }
 0x18b   : > { %v2762_v6 = vpop.f32.mrf.mxu3  ;;  %v1335_v7 = vadd.f32 %v1276_v16, %v1172_v12  ;;  %v1207_v12 = vadd.f32 %v2755_v9, %v2698_v23 }
 0x18d   : > { %1540 = vst.msk [vmem:[%s2647_s26 + $0x70] sm:$0xff] %vm871_vm5, %v1335_v7  ;;  %v1069_v20 = vpop.f32.mrf.mxu0  ;;  %v1178_v25 = vpop.f32.mrf.mxu1  ;;  %v1438_v8 = vmul.f32 %v1335_v7, %v1335_v7  ;;  %v1380_v55 = vsel %vm871_vm5, %v1335_v7, 0.0 }
 0x18e   : > { %v1174_v4 = vadd.f32 %v1173_v1, %v1069_v20  ;;  %v1378_v1 = vsel %vm871_vm5, %v2757_v27, 0.0 }
 0x18f   : > { %v1483_v20 = vsel %vm871_vm5, %v1438_v8, 0.0 }
 0x192   : > { %v1278_v44 = vpop.f32.mrf.mxu2 }
 0x193   : > { %v2766_v5 = vpop.f32.mrf.mxu3  ;;  %v1336_v24 = vadd.f32 %v1278_v44, %v1174_v4 }
 0x195   : > { %1541 = vst.msk [vmem:[%s2647_s26 + $0x78] sm:$0xff] %vm871_vm5, %v1336_v24  ;;  %v1072_v0 = vpop.f32.mrf.mxu0  ;;  %v1181_v22 = vpop.f32.mrf.mxu1  ;;  %v1439_v48 = vmul.f32 %v1336_v24, %v1336_v24  ;;  %v1382_v4 = vsel %vm871_vm5, %v1336_v24, 0.0 }
 0x196   : > { %v1177_v62 = vadd.f32 %v1176_v10, %v1072_v0  ;;  %v1379_v10 = vadd.f32 %v1378_v1, %v2750_v40  ;;  %v1482_v0 = vadd.f32 %v1481_v15, %v2753_v41 }
 0x198   : > { %v1381_v7 = vadd.f32 %v1380_v55, %v1379_v10 }
 0x19a   : > { %v1281_v58 = vpop.f32.mrf.mxu2  ;;  %v1383_v24 = vadd.f32 %v1382_v4, %v1381_v7 }
 0x19b   : > { %v2770_v18 = vpop.f32.mrf.mxu3  ;;  %v1337_v21 = vadd.f32 %v1281_v58, %v1177_v62  ;;  %v1485_v58 = vsel %vm871_vm5, %v1439_v48, 0.0  ;;  %v1212_v48 = vadd.f32 %v2766_v5, %v2715_v59 }
 0x19d   : > { %1542 = vst.msk [vmem:[%s2647_s26 + $0x80] sm:$0xff] %vm871_vm5, %v1337_v21  ;;  %v1074_v11 = vpop.f32.mrf.mxu0  ;;  %v1183_v43 = vpop.f32.mrf.mxu1  ;;  %v1440_v27 = vmul.f32 %v1337_v21, %v1337_v21  ;;  %v1384_v23 = vsel %vm871_vm5, %v1337_v21, 0.0 }
 0x19e   : > { %v1179_v26 = vadd.f32 %v1178_v25, %v1074_v11  ;;  %v1484_v11 = vadd.f32 %v1483_v20, %v1482_v0  ;;  %v1385_v21 = vadd.f32 %v1384_v23, %v1383_v24 }
 0x19f   : > { %v1487_v41 = vsel %vm871_vm5, %v1440_v27, 0.0 }
 0x1a2   : > { %v1283_v31 = vpop.f32.mrf.mxu2 }
 0x1a3   : > { %v2776_v29 = vadd.f32 %v1283_v31, %v1179_v26  ;;  %v1301_v51 = vpop.f32.mrf.mxu3  ;;  %v1486_v31 = vadd.f32 %v1485_v58, %v1484_v11 }
 0x1a4   : > { %v2778_v38 = vadd.f32 %v1301_v51, %v1197_v17 }
 0x1a5   : > { %1543 = vst.msk [vmem:[%s2647_s26 + $0x88] sm:$0xff] %vm871_vm5, %v2776_v29  ;;  %v1077_v56 = vpop.f32.mrf.mxu0  ;;  %v1186_v61 = vpop.f32.mrf.mxu1  ;;  %v1441_v40 = vmul.f32 %v2776_v29, %v2776_v29  ;;  %v1386_v26 = vsel %vm871_vm5, %v2776_v29, 0.0 }
 0x1a6   : > { %1550 = vst.msk [vmem:[%s2647_s26 + $0xc0] sm:$0xff] %vm871_vm5, %v2778_v38  ;;  %v1182_v46 = vadd.f32 %v1181_v22, %v1077_v56  ;;  %v1448_v0 = vmul.f32 %v2778_v38, %v2778_v38  ;;  %v1400_v23 = vsel %vm871_vm5, %v2778_v38, 0.0 }
 0x1a7   : > { %v1489_v51 = vsel %vm871_vm5, %v1441_v40, 0.0 }
 0x1aa   : > { %v1286_v14 = vpop.f32.mrf.mxu2 }
 0x1ab   : > { %v1339_v36 = vadd.f32 %v1286_v14, %v1182_v46  ;;  %v1303_v57 = vpop.f32.mrf.mxu3  ;;  %v1488_v14 = vadd.f32 %v1487_v41, %v1486_v31 }
 0x1ac   : > { %v2788_v32 = vadd.f32 %v1303_v57, %v1199_v34  ;;  %v1209_v34 = vadd.f32 %v2762_v6, %v2708_v52  ;;  %v1387_v57 = vadd.f32 %v1386_v26, %v1385_v21 }
 0x1ad   : > { %1544 = vst.msk [vmem:[%s2647_s26 + $0x90] sm:$0xff] %vm871_vm5, %v1339_v36  ;;  %v1079_v47 = vpop.f32.mrf.mxu0  ;;  %v1188_v63 = vpop.f32.mrf.mxu1  ;;  %v1442_v17 = vmul.f32 %v1339_v36, %v1339_v36  ;;  %v1388_v56 = vsel %vm871_vm5, %v1339_v36, 0.0 }
 0x1ae   : > { %1551 = vst.msk [vmem:[%s2647_s26 + $0xc8] sm:$0xff] %vm871_vm5, %v2788_v32  ;;  %v1184_v2 = vadd.f32 %v1183_v43, %v1079_v47  ;;  %v1449_v40 = vmul.f32 %v2788_v32, %v2788_v32  ;;  %v1402_v41 = vsel %vm871_vm5, %v2788_v32, 0.0 }
 0x1b0   : > { %v1505_v21 = vsel %vm871_vm5, %v1449_v40, 0.0 }
 0x1b2   : > { %v1288_v13 = vpop.f32.mrf.mxu2 }
 0x1b3   : > { %v1340_v60 = vadd.f32 %v1288_v13, %v1184_v2  ;;  %v1306_v35 = vpop.f32.mrf.mxu3  ;;  %v1491_v2 = vsel %vm871_vm5, %v1442_v17, 0.0  ;;  %v1214_v17 = vadd.f32 %v2770_v18, %v2721_v49 }
 0x1b4   : > { %v2797_v53 = vadd.f32 %v1306_v35, %v1202_v33  ;;  %v1490_v35 = vadd.f32 %v1489_v51, %v1488_v14 }
 0x1b5   : > { %1545 = vst.msk [vmem:[%s2647_s26 + $0x98] sm:$0xff] %vm871_vm5, %v1340_v60  ;;  %v1082_v54 = vpop.f32.mrf.mxu0  ;;  %v1191_v22 = vpop.f32.mrf.mxu1  ;;  %v1443_v43 = vmul.f32 %v1340_v60, %v1340_v60  ;;  %v1390_v29 = vsel %vm871_vm5, %v1340_v60, 0.0 }
 0x1b6   : > { %1552 = vst.msk [vmem:[%s2647_s26 + $0xd0] sm:$0xff] %vm871_vm5, %v2797_v53  ;;  %v1187_v3 = vadd.f32 %v1186_v61, %v1082_v54  ;;  %v1389_v54 = vadd.f32 %v1388_v56, %v1387_v57  ;;  %v1492_v6 = vadd.f32 %v1491_v2, %v1490_v35  ;;  %v1450_v26 = vmul.f32 %v2797_v53, %v2797_v53 }
 0x1b7   : > { %v1404_v51 = vsel %vm871_vm5, %v2797_v53, 0.0 }
 0x1b8   : > { %v1507_v14 = vsel %vm871_vm5, %v1450_v26, 0.0 }
 0x1ba   : > { %v1291_v45 = vpop.f32.mrf.mxu2 }
 0x1bb   : > { %v1341_v19 = vadd.f32 %v1291_v45, %v1187_v3  ;;  %v1308_v28 = vpop.f32.mrf.mxu3  ;;  %v1493_v3 = vsel %vm871_vm5, %v1443_v43, 0.0  ;;  %v1391_v45 = vadd.f32 %v1390_v29, %v1389_v54 }
 0x1bc   : > { %v2806_v37 = vadd.f32 %v1308_v28, %v1204_v30 }
 0x1bd   : > { %1546 = vst.msk [vmem:[%s2647_s26 + $0xa0] sm:$0xff] %vm871_vm5, %v1341_v19  ;;  %v1084_v42 = vpop.f32.mrf.mxu0  ;;  %v1444_v33 = vmul.f32 %v1341_v19, %v1341_v19  ;;  %v1392_v30 = vsel %vm871_vm5, %v1341_v19, 0.0  ;;  %v1193_v8 = vpop.f32.mrf.mxu1 }
 0x1be   : > { %1553 = vst.msk [vmem:[%s2647_s26 + $0xd8] sm:$0xff] %vm871_vm5, %v2806_v37  ;;  %v1189_v50 = vadd.f32 %v1188_v63, %v1084_v42  ;;  %v1494_v42 = vadd.f32 %v1493_v3, %v1492_v6  ;;  %v1393_v1 = vadd.f32 %v1392_v30, %v1391_v45  ;;  %v1451_v56 = vmul.f32 %v2806_v37, %v2806_v37 }
 0x1bf   : > { %v1495_v28 = vsel %vm871_vm5, %v1444_v33, 0.0  ;;  %v1406_v57 = vsel %vm871_vm5, %v2806_v37, 0.0 }
 0x1c0   : > { %v1509_v53 = vsel %vm871_vm5, %v1451_v56, 0.0 }
 0x1c2   : > { %v1293_v16 = vpop.f32.mrf.mxu2 }
 0x1c3   : > { %v1342_v44 = vadd.f32 %v1293_v16, %v1189_v50  ;;  %v1311_v25 = vpop.f32.mrf.mxu3  ;;  %v1496_v50 = vadd.f32 %v1495_v28, %v1494_v42 }
 0x1c4   : > { %v2825_v62 = vadd.f32 %v1311_v25, %v1207_v12 }
 0x1c5   : > { %1547 = vst.msk [vmem:[%s2647_s26 + $0xa8] sm:$0xff] %vm871_vm5, %v1342_v44  ;;  %v1087_v9 = vpop.f32.mrf.mxu0  ;;  %v1445_v52 = vmul.f32 %v1342_v44, %v1342_v44  ;;  %v1394_v63 = vsel %vm871_vm5, %v1342_v44, 0.0 }
 0x1c6   : > { %1554 = vst.msk [vmem:[%s2647_s26 + $0xe0] sm:$0xff] %vm871_vm5, %v2825_v62  ;;  %v1192_v46 = vadd.f32 %v1191_v22, %v1087_v9  ;;  %v1395_v12 = vadd.f32 %v1394_v63, %v1393_v1  ;;  %v1503_v22 = vsel %vm871_vm5, %v1448_v0, 0.0  ;;  %v1452_v49 = vmul.f32 %v2825_v62, %v2825_v62 }
 0x1c7   : > { %v1497_v15 = vsel %vm871_vm5, %v1445_v52, 0.0  ;;  %v1408_v2 = vsel %vm871_vm5, %v2825_v62, 0.0 }
 0x1c8   : > { %v1498_v27 = vadd.f32 %v1497_v15, %v1496_v50 }
 0x1ca   : > { %v1296_v47 = vpop.f32.mrf.mxu2 }
 0x1cb   : > { %v1343_v61 = vadd.f32 %v1296_v47, %v1192_v46  ;;  %v1313_v13 = vpop.f32.mrf.mxu3 }
 0x1cc   : > { %v2845_v36 = vadd.f32 %v1313_v13, %v1209_v34  ;;  %v1511_v13 = vsel %vm871_vm5, %v1452_v49, 0.0 }
 0x1cd   : > { %1548 = vst.msk [vmem:[%s2647_s26 + $0xb0] sm:$0xff] %vm871_vm5, %v1343_v61  ;;  %v1089_v60 = vpop.f32.mrf.mxu0  ;;  %v1446_v39 = vmul.f32 %v1343_v61, %v1343_v61  ;;  %v1396_v19 = vsel %vm871_vm5, %v1343_v61, 0.0 }
 0x1ce   : > { %1555 = vst.msk [vmem:[%s2647_s26 + $0xe8] sm:$0xff] %vm871_vm5, %v2845_v36  ;;  %v1194_v55 = vadd.f32 %v1193_v8, %v1089_v60  ;;  %v1397_v44 = vadd.f32 %v1396_v19, %v1395_v12  ;;  %v1453_v29 = vmul.f32 %v2845_v36, %v2845_v36  ;;  %v1410_v37 = vsel %vm871_vm5, %v2845_v36, 0.0 }
 0x1cf   : > { %v1499_v16 = vsel %vm871_vm5, %v1446_v39, 0.0 }
 0x1d0   : > { %v1500_v59 = vadd.f32 %v1499_v16, %v1498_v27  ;;  %v1513_v30 = vsel %vm871_vm5, %v1453_v29, 0.0 }
 0x1d2   : > { %v1298_v10 = vpop.f32.mrf.mxu2 }
 0x1d3   : > { %v1344_v20 = vadd.f32 %v1298_v10, %v1194_v55  ;;  %v1316_v4 = vpop.f32.mrf.mxu3 }
 0x1d4   : > { %v1351_v25 = vadd.f32 %v1316_v4, %v1212_v48 }
 0x1d5   : > { %v1398_v7 = vsel %vm871_vm5, %v1344_v20, 0.0  ;;  %v1447_v58 = vmul.f32 %v1344_v20, %v1344_v20  ;;  %1549 = vst.msk [vmem:[%s2647_s26 + $0xb8] sm:$0xff] %vm871_vm5, %v1344_v20 }
 0x1d6   : > { %v1399_v5 = vadd.f32 %v1398_v7, %v1397_v44  ;;  %1556 = vst.msk [vmem:[%s2647_s26 + $0xf0] sm:$0xff] %vm871_vm5, %v1351_v25  ;;  %v1454_v35 = vmul.f32 %v1351_v25, %v1351_v25  ;;  %v1412_v52 = vsel %vm871_vm5, %v1351_v25, 0.0 }
 0x1d7   : > { %v1501_v9 = vsel %vm871_vm5, %v1447_v58, 0.0 }
 0x1d8   : > { %v1401_v11 = vadd.f32 %v1400_v23, %v1399_v5  ;;  %v1502_v24 = vadd.f32 %v1501_v9, %v1500_v59  ;;  %v1515_v60 = vsel %vm871_vm5, %v1454_v35, 0.0 }
 0x1da   : > { %v1403_v38 = vadd.f32 %v1402_v41, %v1401_v11  ;;  %v1504_v31 = vadd.f32 %v1503_v22, %v1502_v24 }
 0x1db   : > { %v1318_v43 = vpop.f32.mrf.mxu3 }
 0x1dc   : > { %v1405_v46 = vadd.f32 %v1404_v51, %v1403_v38  ;;  %v1506_v32 = vadd.f32 %v1505_v21, %v1504_v31  ;;  %v1352_v34 = vadd.f32 %v1318_v43, %v1214_v17 }
 0x1de   : > { %v1508_v18 = vadd.f32 %v1507_v14, %v1506_v32  ;;  %v1407_v47 = vadd.f32 %v1406_v57, %v1405_v46  ;;  %1557 = vst.msk [vmem:[%s2647_s26 + $0xf8] sm:$0xff] %vm871_vm5, %v1352_v34  ;;  %v1455_v6 = vmul.f32 %v1352_v34, %v1352_v34  ;;  %v1414_v28 = vsel %vm871_vm5, %v1352_v34, 0.0 }
 0x1e0   : > { %v1409_v33 = vadd.f32 %v1408_v2, %v1407_v47  ;;  %v1510_v61 = vadd.f32 %v1509_v53, %v1508_v18  ;;  %v1517_v36 = vsel %vm871_vm5, %v1455_v6, 0.0 }
 0x1e2   : > { %v1411_v54 = vadd.f32 %v1410_v37, %v1409_v33  ;;  %v1512_v3 = vadd.f32 %v1511_v13, %v1510_v61 }
 0x1e4   : > { %v1413_v45 = vadd.f32 %v1412_v52, %v1411_v54  ;;  %v1514_v62 = vadd.f32 %v1513_v30, %v1512_v3 }
 0x1e6   : > { %v1516_v63 = vadd.f32 %v1515_v60, %v1514_v62  ;;  %v1415_v39 = vadd.f32 %v1414_v28, %v1413_v45 }
 0x1e8   : > { %v1416_v42 = vrot.slane %v1415_v39, 4  ;;  %v1518_v1 = vadd.f32 %v1517_v36, %v1516_v63 }
 0x1ea   : > { %v1417_v8 = vadd.f32 %v1416_v42, %v1415_v39  ;;  %v1519_v15 = vrot.slane %v1518_v1, 4 }
 0x1ec   : > { %v1418_v19 = vrot.slane %v1417_v8, 2  ;;  %v1520_v55 = vadd.f32 %v1519_v15, %v1518_v1 }
 0x1ee   : > { %v1419_v48 = vadd.f32 %v1418_v19, %v1417_v8  ;;  %v1521_v50 = vrot.slane %v1520_v55, 2 }
 0x1f0   : > { %v1420_v12 = vrot.slane %v1419_v48, 1  ;;  %v1522_v10 = vadd.f32 %v1521_v50, %v1520_v55 }
 0x1f2   : > { %v1421_v16 = vadd.f32 %v1420_v12, %v1419_v48  ;;  %v1523_v20 = vrot.slane %v1522_v10, 1 }
 0x1f4   : > { %1423 = vst.msk [vmem:[%s265_s28] sm:$0x1] %vm1422_vm8, %v1421_v16  ;;  %v1524_v4 = vadd.f32 %v1523_v20, %v1522_v10 }
 0x1f6   : > { %1525 = vst.msk [vmem:[%s268_s7] sm:$0x1] %vm1422_vm8, %v1524_v4 }
 0x1f7 PF: > { %s17_s21 = sadd.s32 1, %s1928_s21  }
 0x1f8   : > { %p14_p4 = scmp.ge.s32.totalorder %s17_s21, 4  }
 0x1fa   :  { %16 = sbr.rel (!%p14_p4) target bundleno = 1 (0x1), region = 92 }

</bundles_post_ra>
